<compile_context>
chip_gen: v5e
topology: v5e:2x2
jax: 0.10.0
libtpu: 0.0.40
codegen_flags: <defaults>
</compile_context>

<pallas_src>
import collections
import functools

import numpy as np
import jax
import jax.numpy as jnp
from jax import lax
from jax.experimental import pallas as pl
from jax.experimental.pallas import tpu as pltpu

ModelSpec = collections.namedtuple("ModelSpec", ["matrix", "ops"])

BN_EPS = 1e-5
LANE = 128                        # lane width / minimum dense last dim
VMEM_LIMIT = 32 * 1024 * 1024     # safe scoped-VMEM budget on v5e/v6e/v7x
VMEM_TILE_BUDGET = 20 * 1024 * 1024


def _round_up(x, m):
    return ((x + m - 1) // m) * m


# ----------------------------------------------------------------------------
# Pallas kernels
# ----------------------------------------------------------------------------
def _gemm_bn_kernel(a_ref, b_ref, s_ref, c_ref, o_ref, acc_ref):
    """(TM,TK)@(TK,TN) accumulated over k; epilogue y = acc*scale + bias."""
    k = pl.program_id(2)

    @pl.when(k == 0)
    def _():
        acc_ref[...] = jnp.zeros_like(acc_ref)

    acc_ref[...] += jnp.dot(a_ref[...], b_ref[...],
                            preferred_element_type=jnp.float32)

    @pl.when(k == pl.num_programs(2) - 1)
    def _():
        o_ref[...] = acc_ref[...] * s_ref[...] + c_ref[...]


def _pick_tile_m(m):
    # Prefer 256 (>=2 grid steps for the two v7x TensorCores at M>=512 while
    # fitting its halved 64 MiB VMEM); fall back to any divisor that is a
    # multiple of the 8-row sublane tier so no M padding is needed.
    for tm in (256, 128, 64, 32, 16, 8):
        if m % tm == 0:
            return tm
    return None


def _pick_tile_k(k, tm, tn):
    # Keep double-buffered A/B tiles + out + acc comfortably under budget.
    def fits(tk):
        return 4 * (2 * (tm * tk + tk * tn) + 3 * tm * tn + 4 * tn) \
            <= VMEM_TILE_BUDGET
    if fits(k):
        return k                      # single K step (block == full K dim)
    for tk in (2048, 1024, 512, 256, 128):
        if k % tk == 0 and fits(tk):
            return tk
    return k                          # correctness fallback


def gemm_bn_pallas(a, w_pad, scale_pad, bias_pad, n_out):
    """Fused (M,K)@(K,N_pad) GEMM with per-output-channel scale/shift epilogue.

    `w_pad`, `scale_pad`, `bias_pad` are padded to a multiple of 128 output
    channels once at init (lane-dense MXU tile + unmasked stores).  Returns
    the (M, n_out) slice (typically fused into the consumer by XLA).
    """
    m, k = a.shape
    kw, n_pad = w_pad.shape
    assert k == kw and n_pad % LANE == 0

    tm = _pick_tile_m(m)
    if tm is None:                    # M not a multiple of 8: pad (rare)
        tm = LANE
        mp = _round_up(m, tm)
        a = jnp.pad(a, ((0, mp - m), (0, 0)))
    else:
        mp = m
    tn = LANE
    tk = _pick_tile_k(k, tm, tn)
    grid = (mp // tm, n_pad // tn, k // tk)

    out = pl.pallas_call(
        _gemm_bn_kernel,
        out_shape=jax.ShapeDtypeStruct((mp, n_pad), jnp.float32),
        grid=grid,
        in_specs=[
            pl.BlockSpec((tm, tk), lambda i, j, kk: (i, kk)),
            pl.BlockSpec((tk, tn), lambda i, j, kk: (kk, j)),
            pl.BlockSpec((1, tn), lambda i, j, kk: (0, j)),
            pl.BlockSpec((1, tn), lambda i, j, kk: (0, j)),
        ],
        out_specs=pl.BlockSpec((tm, tn), lambda i, j, kk: (i, j)),
        scratch_shapes=[pltpu.VMEM((tm, tn), jnp.float32)],
        compiler_params=pltpu.CompilerParams(
            dimension_semantics=("parallel", "parallel", "arbitrary"),
            vmem_limit_bytes=VMEM_LIMIT),
    )(a, w_pad, scale_pad, bias_pad)

    if mp != m or n_pad != n_out:
        out = out[:m, :n_out]
    return out


def _gap_fc_kernel(x_ref, w_ref, b_ref, o_ref, *, inv_hw):
    pooled = jnp.sum(x_ref[...], axis=1) * inv_hw          # (B, C)
    o_ref[...] = jnp.dot(pooled, w_ref[...],
                         preferred_element_type=jnp.float32) + b_ref[...]


def gap_classifier_pallas(x, w_pad, b_pad, num_labels):
    """Fused AdaptiveAvgPool2d(1) + Linear in a single tiny kernel. x: NHWC."""
    n, h, w, c = x.shape
    bp = _round_up(max(n, 8), 8)
    x3 = x.reshape(n, h * w, c)
    if bp != n:
        x3 = jnp.pad(x3, ((0, bp - n), (0, 0), (0, 0)))
    l_pad = w_pad.shape[1]
    out = pl.pallas_call(
        functools.partial(_gap_fc_kernel, inv_hw=1.0 / (h * w)),
        out_shape=jax.ShapeDtypeStruct((bp, l_pad), jnp.float32),
    )(x3, w_pad, b_pad)
    return out[:n, :num_labels]


# ----------------------------------------------------------------------------
# JAX glue around the kernels
# ----------------------------------------------------------------------------
def im2col(x, kh, kw, stride, pad):
    """x: NHWC -> (N*Ho*Wo, kh*kw*C) patch matrix."""
    # TODO(synk): patch slab still materialized in XLA; an in-kernel per-tap
    # gather (memory_space=pl.ANY + strided DMA) would cut kh*kw x HBM reads.
    n, h, w, c = x.shape
    xp = jnp.pad(x, ((0, 0), (pad, pad), (pad, pad), (0, 0)))
    ho = (h + 2 * pad - kh) // stride + 1
    wo = (w + 2 * pad - kw) // stride + 1
    cols = []
    for i in range(kh):
        for j in range(kw):
            cols.append(xp[:, i:i + stride * ho:stride,
                           j:j + stride * wo:stride, :])
    patches = jnp.concatenate(cols, axis=-1)
    return patches.reshape(n * ho * wo, kh * kw * c), (n, ho, wo)


# TODO(synk): 3x3 avg/max pooling kept as lax.reduce_window glue (tiny ops).
def avg_pool3x3(x, stride):
    pads = [(0, 0), (1, 1), (1, 1), (0, 0)]
    win, strd = (1, 3, 3, 1), (1, stride, stride, 1)
    summed = lax.reduce_window(x, 0.0, lax.add, win, strd, pads)
    counts = lax.reduce_window(jnp.ones_like(x), 0.0, lax.add, win, strd, pads)
    return summed / counts  # count_include_pad=False


def max_pool3x3(x, stride):
    pads = [(0, 0), (1, 1), (1, 1), (0, 0)]
    return lax.reduce_window(x, -jnp.inf, lax.max,
                             (1, 3, 3, 1), (1, stride, stride, 1), pads)


# ----------------------------------------------------------------------------
# Deterministic parameter init (kaiming-normal, like model.init_parameters)
# ----------------------------------------------------------------------------
class PRNG:
    def __init__(self, seed):
        self.key = jax.random.PRNGKey(seed)

    def take(self):
        self.key, k = jax.random.split(self.key)
        return k


def kaiming(rng, shape, fan_in):
    std = float(np.sqrt(2.0 / fan_in))
    return (std * jax.random.normal(rng.take(), shape)).astype(jnp.float32)


# ----------------------------------------------------------------------------
# Network building blocks (NAO-style; sources for these helper modules were
# not provided with the reference, so standard implementations are used).
# ----------------------------------------------------------------------------
class FusedConvBN:
    """(optional pre-ReLU) -> Conv(k, stride, pad) -> BN, one Pallas GEMM."""

    def __init__(self, rng, cin, cout, k, stride, pad, pre_relu):
        self.k, self.stride, self.pad = k, stride, pad
        self.pre_relu = pre_relu
        self.cout = cout
        w = kaiming(rng, (k, k, cin, cout), cin * k * k)
        n_pad = _round_up(cout, LANE)
        self.w_pad = jnp.pad(w.reshape(k * k * cin, cout),
                             ((0, 0), (0, n_pad - cout)))
        gamma = jnp.ones((cout,), jnp.float32)
        beta = jnp.zeros((cout,), jnp.float32)
        # Eval-mode BatchNorm2d with fresh running stats (mean=0, var=1),
        # folded into the GEMM epilogue.
        scale = gamma / jnp.sqrt(1.0 + BN_EPS)
        self.scale_pad = jnp.pad(scale, (0, n_pad - cout)).reshape(1, n_pad)
        self.bias_pad = jnp.pad(beta, (0, n_pad - cout)).reshape(1, n_pad)

    def __call__(self, x):
        if self.pre_relu:
            x = jnp.maximum(x, 0.0)   # fuses into the im2col pad/slice in XLA
        patches, (n, ho, wo) = im2col(x, self.k, self.k, self.stride, self.pad)
        out = gemm_bn_pallas(patches, self.w_pad, self.scale_pad,
                             self.bias_pad, self.cout)
        return out.reshape(n, ho, wo, self.cout)


def ConvBN(rng, cin, cout, k, stride, pad):
    return FusedConvBN(rng, cin, cout, k, stride, pad, pre_relu=False)


def ReLUConvBN(rng, cin, cout, k, stride, pad):
    return FusedConvBN(rng, cin, cout, k, stride, pad, pre_relu=True)


class FactorizedReduce:
    # TODO(synk): FactorizedReduce source not provided; NAO/DARTS-style
    # (ReLU, two 1x1 stride-2 paths with a 1-pixel shift, concat, BN), here
    # fused into a single block-diagonal GEMM with the BN epilogue.
    def __init__(self, rng, cin, cout):
        assert cout % 2 == 0
        half = cout // 2
        w1 = kaiming(rng, (cin, half), cin)
        w2 = kaiming(rng, (cin, half), cin)
        n_pad = _round_up(cout, LANE)
        wf = jnp.zeros((2 * cin, n_pad), jnp.float32)
        wf = wf.at[:cin, :half].set(w1)
        wf = wf.at[cin:, half:cout].set(w2)
        self.w_pad = wf
        scale = jnp.full((cout,), 1.0 / np.sqrt(1.0 + BN_EPS), jnp.float32)
        self.scale_pad = jnp.pad(scale, (0, n_pad - cout)).reshape(1, n_pad)
        self.bias_pad = jnp.zeros((1, n_pad), jnp.float32)
        self.cout = cout

    def __call__(self, x):
        x = jnp.maximum(x, 0.0)
        n, h, w, c = x.shape
        x_even = x[:, ::2, ::2, :]                 # path-1 taps
        x_odd = x[:, 1::2, 1::2, :]                # path-2 taps (1-pixel shift)
        feat = jnp.concatenate([x_even, x_odd], axis=-1)
        feat = feat.reshape(n * (h // 2) * (w // 2), 2 * c)
        out = gemm_bn_pallas(feat, self.w_pad, self.scale_pad,
                             self.bias_pad, self.cout)
        return out.reshape(n, h // 2, w // 2, self.cout)


class MaybeCalibrateSize:
    # TODO(synk): source not provided; NAO-style spatial/channel calibration.
    def __init__(self, rng, prev_layers, channels):
        hw0, c0 = prev_layers[0][0], prev_layers[0][-1]
        hw1, c1 = prev_layers[1][0], prev_layers[1][-1]
        self.pre0 = self.pre1 = None
        if hw0 != hw1:
            assert hw0 == 2 * hw1
            self.pre0 = FactorizedReduce(rng, c0, channels)
        elif c0 != channels:
            self.pre0 = ReLUConvBN(rng, c0, channels, 1, 1, 0)
        if c1 != channels:
            self.pre1 = ReLUConvBN(rng, c1, channels, 1, 1, 0)
        self.out_shape = [[hw1, hw1, channels], [hw1, hw1, channels]]

    def __call__(self, s0, s1):
        if self.pre0 is not None:
            s0 = self.pre0(s0)
        if self.pre1 is not None:
            s1 = self.pre1(s1)
        return s0, s1


class VertexInputSum:
    # TODO(synk): VertexInputSum source not provided; each predecessor is
    # calibrated to (target_hw, channels) then element-wise summed.
    def __init__(self, rng, prev_layers, target_hw, channels, pres):
        self.pres = pres
        self.cal = {}
        for src in pres:
            hw, c = prev_layers[src][0], prev_layers[src][-1]
            if hw != target_hw:
                self.cal[src] = FactorizedReduce(rng, c, channels)
            elif c != channels:
                self.cal[src] = ReLUConvBN(rng, c, channels, 1, 1, 0)
            else:
                self.cal[src] = None

    def __call__(self, states):
        out = None
        for src in self.pres:
            h = states[src]
            if self.cal[src] is not None:
                h = self.cal[src](h)
            out = h if out is None else out + h
        return out


class FinalCombine:
    # TODO(synk): FinalCombine source not provided; NAO-style reduce+concat.
    def __init__(self, rng, prev_layers, out_hw, channels, concat):
        self.concat = concat
        self.ops = {}
        for i in concat:
            hw, c = prev_layers[i][0], prev_layers[i][-1]
            self.ops[i] = (FactorizedReduce(rng, c, channels)
                           if hw > out_hw else None)

    def __call__(self, states):
        outs = []
        for i in self.concat:
            h = states[i]
            if self.ops[i] is not None:
                h = self.ops[i](h)
            outs.append(h)
        return jnp.concatenate(outs, axis=-1)


class Node:
    def __init__(self, rng, op, shape, channels, stride):
        self.op_name = op
        self.id_fact_reduce = None
        shape = list(shape)
        if op == "seqconv3x3":
            # TODO(synk): OP_MAP source not provided; using ReLU-Conv3x3-BN.
            self.op = ReLUConvBN(rng, channels, channels, 3, stride, 1)
            shape = [shape[0] // stride, shape[1] // stride, channels]
        elif op == "seqconv5x5":
            self.op = ReLUConvBN(rng, channels, channels, 5, stride, 2)
            shape = [shape[0] // stride, shape[1] // stride, channels]
        elif op == "avgpool3x3":
            self.op = functools.partial(avg_pool3x3, stride=stride)
            shape = [shape[0] // stride, shape[1] // stride, shape[-1]]
        elif op == "maxpool3x3":
            self.op = functools.partial(max_pool3x3, stride=stride)
            shape = [shape[0] // stride, shape[1] // stride, shape[-1]]
        elif op == "identity":
            self.op = lambda x: x
            if stride > 1:
                assert stride == 2
                self.id_fact_reduce = FactorizedReduce(rng, shape[-1], channels)
                shape = [shape[0] // stride, shape[1] // stride, channels]
        else:
            raise ValueError(op)
        self.out_shape = list(shape)

    def __call__(self, x, step=None):
        out = self.op(x)
        if self.id_fact_reduce is not None:
            out = self.id_fact_reduce(out)
        # drop_path skipped: drop_path_keep_prob is None / eval mode.
        return out


class Cell:
    def __init__(self, rng, spec, prev_layers, channels, reduction):
        self.num_vertices = np.shape(spec.matrix)[0]
        prev_layers = [list(prev_layers[0]), list(prev_layers[1])]
        self.maybe_calibrate_size = MaybeCalibrateSize(rng, prev_layers, channels)
        prev_layers = [list(s) for s in self.maybe_calibrate_size.out_shape]
        stride = 2 if reduction else 1
        self.vertex_ops = [None, None]
        self.vertex_sums = [None, None]
        for t in range(2, self.num_vertices - 1):
            shape = min([prev_layers[src] for src in range(t)
                         if spec.matrix[src, t]])
            pres = [src for src in range(t) if spec.matrix[src, t]]
            self.vertex_sums.append(
                VertexInputSum(rng, prev_layers, shape[0], channels, pres))
            stride_t = stride if sum(
                [src not in [0, 1] for src in range(t)
                 if spec.matrix[src, t]]) == 0 else 1
            op = Node(rng, spec.ops[t], shape, channels, stride_t)
            self.vertex_ops.append(op)
            prev_layers.append(op.out_shape)
        self.concat = [src for src in range(self.num_vertices - 1)
                       if spec.matrix[src, -1]]
        out_hw = min([shape[0] // 2 if reduction and i in [0, 1] else shape[0]
                      for i, shape in enumerate(prev_layers)
                      if i in self.concat])
        self.final_combine = FinalCombine(rng, prev_layers, out_hw,
                                          channels, self.concat)
        self.out_shape = [out_hw, out_hw, channels * len(self.concat)]

    def __call__(self, s0, s1, step=None):
        s0, s1 = self.maybe_calibrate_size(s0, s1)
        states = [s0, s1]
        for t in range(2, self.num_vertices - 1):
            vertex_input = self.vertex_sums[t](states)
            states.append(self.vertex_ops[t](vertex_input, step))
        return self.final_combine(states)


class NASNetworkCIFAR:
    def __init__(self, rng, num_labels, layers, channels, keep_prob,
                 drop_path_keep_prob, use_aux_head, steps, spec):
        self.num_labels = num_labels
        self.keep_prob = keep_prob
        self.use_aux_head = use_aux_head
        self.conv_spec, self.reduc_spec = spec[0], spec[1]
        self.pool_layers = [layers, 2 * layers + 1]
        self.layers = layers * 3 + 2

        stem_multiplier = 3
        ch = stem_multiplier * channels
        self.stem = ConvBN(rng, 3, ch, 3, 1, 1)  # Conv2d(3,ch,3,pad=1) + BN
        outs = [[32, 32, ch], [32, 32, ch]]
        ch = channels
        self.cells = []
        for i in range(self.layers):
            if i not in self.pool_layers:
                cell = Cell(rng, self.conv_spec, outs, ch, False)
            else:
                ch *= 2
                cell = Cell(rng, self.reduc_spec, outs, ch, True)
            self.cells.append(cell)
            outs = [outs[-1], cell.out_shape]
        # TODO(synk): AuxHeadCIFAR omitted (use_aux_head=False; training only).
        c_final = outs[-1][-1]
        w_fc = kaiming(rng, (num_labels, c_final), c_final)  # nn.Linear weight
        l_pad = _round_up(num_labels, LANE)
        self.fc_w_pad = jnp.pad(w_fc.T, ((0, 0), (0, l_pad - num_labels)))
        self.fc_b_pad = jnp.zeros((1, l_pad), jnp.float32)

    def __call__(self, x_nchw, step=None):
        # layout: NCHW input (PyTorch convention) -> NHWC internal.
        x = jnp.transpose(x_nchw, (0, 2, 3, 1)).astype(jnp.float32)
        s0 = s1 = self.stem(x)
        for cell in self.cells:
            s0, s1 = s1, cell(s0, s1, step)
        # Dropout(1 - keep_prob) with keep_prob=1.0 -> identity (eval).
        logits = gap_classifier_pallas(s1, self.fc_w_pad, self.fc_b_pad,
                                       self.num_labels)
        return logits, None


# ----------------------------------------------------------------------------
if __name__ == "__main__":
    # Small spec: 5 vertices (2 inputs, 2 ops, 1 output).
    matrix = np.array([[0, 0, 1, 0, 0],
                       [0, 0, 1, 1, 0],
                       [0, 0, 0, 1, 1],
                       [0, 0, 0, 0, 1],
                       [0, 0, 0, 0, 0]], dtype=np.int64)
    conv_spec = ModelSpec(matrix=matrix,
                          ops=["input", "input", "seqconv3x3",
                               "maxpool3x3", "output"])
    reduc_spec = ModelSpec(matrix=matrix,
                           ops=["input", "input", "seqconv5x5",
                                "avgpool3x3", "output"])

    rng = PRNG(0)
    model = NASNetworkCIFAR(rng,
                            num_labels=10, layers=1, channels=4,
                            keep_prob=1.0, drop_path_keep_prob=None,
                            use_aux_head=False, steps=1,
                            spec=(conv_spec, reduc_spec))

    key = jax.random.PRNGKey(0)
    x = jax.random.normal(key, (2, 3, 32, 32), dtype=jnp.float32)

    fwd = jax.jit(lambda inp: model(inp))
    logits, aux_logits = fwd(x)
    jax.block_until_ready(logits)

    assert logits.shape == (2, model.num_labels), logits.shape
    assert aux_logits is None
    assert bool(jnp.all(jnp.isfinite(logits)))
    print("KERNEL_OK")
</pallas_src>

<mosaic_0001>
module attributes {stable_mosaic.version = 11 : i64} {
  func.func @_gemm_bn_kernel(%arg0: i32, %arg1: i32, %arg2: i32, %arg3: memref<256x27xf32, #tpu.memory_space<vmem>>, %arg4: memref<27x128xf32, #tpu.memory_space<vmem>>, %arg5: memref<1x128xf32, #tpu.memory_space<vmem>>, %arg6: memref<1x128xf32, #tpu.memory_space<vmem>>, %arg7: memref<256x128xf32, #tpu.memory_space<vmem>>, %arg8: memref<256x128xf32, #tpu.memory_space<vmem>>) attributes {dimension_semantics = [#tpu.dimension_semantics<parallel>, #tpu.dimension_semantics<parallel>, #tpu.dimension_semantics<arbitrary>], iteration_bounds = array<i64: 8, 1, 1>, scalar_prefetch = 0 : i64, scratch_operands = 1 : i64, tpu.core_type = #tpu.core_type<tc>, window_params = [{transform_indices = @transform_0, window_bounds = array<i64: 256, 27>}, {transform_indices = @transform_1, window_bounds = array<i64: 27, 128>}, {transform_indices = @transform_2, window_bounds = array<i64: 1, 128>}, {transform_indices = @transform_3, window_bounds = array<i64: 1, 128>}, {transform_indices = @transform_4, window_bounds = array<i64: 256, 128>}]} {
    %c0_i32 = arith.constant 0 : i32
    %0 = arith.cmpi eq, %arg2, %c0_i32 : i32
    %1 = arith.extui %0 : i1 to i32
    %c0_i32_0 = arith.constant 0 : i32
    %2 = arith.cmpi ne, %1, %c0_i32_0 : i32
    scf.if %2 {
      %cst_10 = arith.constant 0.000000e+00 : f32
      %12 = vector.broadcast %cst_10 : f32 to vector<256x128xf32>
      %c0_11 = arith.constant 0 : index
      %c0_12 = arith.constant 0 : index
      %13 = vector.load %arg8[%c0_11, %c0_12] : memref<256x128xf32, #tpu.memory_space<vmem>>, vector<256x128xf32>
      tpu.vector_store %arg8[%c0_11, %c0_12], %12 {strides = array<i32>} : memref<256x128xf32, #tpu.memory_space<vmem>>, vector<256x128xf32>,
    } else {
    }
    %c0 = arith.constant 0 : index
    %c0_1 = arith.constant 0 : index
    %3 = vector.load %arg8[%c0, %c0_1] : memref<256x128xf32, #tpu.memory_space<vmem>>, vector<256x128xf32>
    %c0_2 = arith.constant 0 : index
    %c0_3 = arith.constant 0 : index
    %4 = vector.load %arg3[%c0_2, %c0_3] : memref<256x27xf32, #tpu.memory_space<vmem>>, vector<256x27xf32>
    %c0_4 = arith.constant 0 : index
    %c0_5 = arith.constant 0 : index
    %5 = vector.load %arg4[%c0_4, %c0_5] : memref<27x128xf32, #tpu.memory_space<vmem>>, vector<27x128xf32>
    %cst = arith.constant dense<0.000000e+00> : vector<256x128xf32>
    %6 = tpu.matmul %4, %5, %cst {dimension_numbers = #tpu.dot_dimension_numbers<[1], [0], [0], [1], [0, 0, 1, 1], [], []>} : vector<256x27xf32>, vector<27x128xf32>, vector<256x128xf32> -> vector<256x128xf32>
    %7 = arith.addf %3, %6 : vector<256x128xf32>
    %c0_6 = arith.constant 0 : index
    %c0_7 = arith.constant 0 : index
    %8 = vector.load %arg8[%c0_6, %c0_7] : memref<256x128xf32, #tpu.memory_space<vmem>>, vector<256x128xf32>
    tpu.vector_store %arg8[%c0_6, %c0_7], %7 {strides = array<i32>} : memref<256x128xf32, #tpu.memory_space<vmem>>, vector<256x128xf32>,
    %c0_i32_8 = arith.constant 0 : i32
    %9 = arith.cmpi eq, %arg2, %c0_i32_8 : i32
    %10 = arith.extui %9 : i1 to i32
    %c0_i32_9 = arith.constant 0 : i32
    %11 = arith.cmpi ne, %10, %c0_i32_9 : i32
    scf.if %11 {
      %c0_10 = arith.constant 0 : index
      %c0_11 = arith.constant 0 : index
      %12 = vector.load %arg8[%c0_10, %c0_11] : memref<256x128xf32, #tpu.memory_space<vmem>>, vector<256x128xf32>
      %c0_12 = arith.constant 0 : index
      %c0_13 = arith.constant 0 : index
      %13 = vector.load %arg5[%c0_12, %c0_13] : memref<1x128xf32, #tpu.memory_space<vmem>>, vector<1x128xf32>
      %14 = vector.broadcast %13 : vector<1x128xf32> to vector<256x128xf32>
      %15 = arith.mulf %12, %14 : vector<256x128xf32>
      %c0_14 = arith.constant 0 : index
      %c0_15 = arith.constant 0 : index
      %16 = vector.load %arg6[%c0_14, %c0_15] : memref<1x128xf32, #tpu.memory_space<vmem>>, vector<1x128xf32>
      %17 = vector.broadcast %16 : vector<1x128xf32> to vector<256x128xf32>
      %18 = arith.addf %15, %17 : vector<256x128xf32>
      %c0_16 = arith.constant 0 : index
      %c0_17 = arith.constant 0 : index
      %19 = vector.load %arg7[%c0_16, %c0_17] : memref<256x128xf32, #tpu.memory_space<vmem>>, vector<256x128xf32>
      tpu.vector_store %arg7[%c0_16, %c0_17], %18 {strides = array<i32>} : memref<256x128xf32, #tpu.memory_space<vmem>>, vector<256x128xf32>,
    } else {
    }
    return
  }
  func.func @transform_0(%arg0: i32, %arg1: i32, %arg2: i32) -> (i32, i32) {
    %c0_i32 = arith.constant 0 : i32
    return %arg0, %arg2 : i32, i32
  }
  func.func @transform_1(%arg0: i32, %arg1: i32, %arg2: i32) -> (i32, i32) {
    %c0_i32 = arith.constant 0 : i32
    return %arg2, %arg1 : i32, i32
  }
  func.func @transform_2(%arg0: i32, %arg1: i32, %arg2: i32) -> (i32, i32) {
    %c0_i32 = arith.constant 0 : i32
    %c0_i32_0 = arith.constant 0 : i32
    return %c0_i32, %arg1 : i32, i32
  }
  func.func @transform_3(%arg0: i32, %arg1: i32, %arg2: i32) -> (i32, i32) {
    %c0_i32 = arith.constant 0 : i32
    %c0_i32_0 = arith.constant 0 : i32
    return %c0_i32, %arg1 : i32, i32
  }
  func.func @transform_4(%arg0: i32, %arg1: i32, %arg2: i32) -> (i32, i32) {
    %c0_i32 = arith.constant 0 : i32
    return %arg0, %arg1 : i32, i32
  }
}

module attributes {stable_mosaic.version = 11 : i64} {
  func.func @_gemm_bn_kernel(%arg0: i32, %arg1: i32, %arg2: i32, %arg3: memref<256x12xf32, #tpu.memory_space<vmem>>, %arg4: memref<12x128xf32, #tpu.memory_space<vmem>>, %arg5: memref<1x128xf32, #tpu.memory_space<vmem>>, %arg6: memref<1x128xf32, #tpu.memory_space<vmem>>, %arg7: memref<256x128xf32, #tpu.memory_space<vmem>>, %arg8: memref<256x128xf32, #tpu.memory_space<vmem>>) attributes {dimension_semantics = [#tpu.dimension_semantics<parallel>, #tpu.dimension_semantics<parallel>, #tpu.dimension_semantics<arbitrary>], iteration_bounds = array<i64: 8, 1, 1>, scalar_prefetch = 0 : i64, scratch_operands = 1 : i64, tpu.core_type = #tpu.core_type<tc>, window_params = [{transform_indices = @transform_0, window_bounds = array<i64: 256, 12>}, {transform_indices = @transform_1, window_bounds = array<i64: 12, 128>}, {transform_indices = @transform_2, window_bounds = array<i64: 1, 128>}, {transform_indices = @transform_3, window_bounds = array<i64: 1, 128>}, {transform_indices = @transform_4, window_bounds = array<i64: 256, 128>}]} {
    %c0_i32 = arith.constant 0 : i32
    %0 = arith.cmpi eq, %arg2, %c0_i32 : i32
    %1 = arith.extui %0 : i1 to i32
    %c0_i32_0 = arith.constant 0 : i32
    %2 = arith.cmpi ne, %1, %c0_i32_0 : i32
    scf.if %2 {
      %cst_10 = arith.constant 0.000000e+00 : f32
      %12 = vector.broadcast %cst_10 : f32 to vector<256x128xf32>
      %c0_11 = arith.constant 0 : index
      %c0_12 = arith.constant 0 : index
      %13 = vector.load %arg8[%c0_11, %c0_12] : memref<256x128xf32, #tpu.memory_space<vmem>>, vector<256x128xf32>
      tpu.vector_store %arg8[%c0_11, %c0_12], %12 {strides = array<i32>} : memref<256x128xf32, #tpu.memory_space<vmem>>, vector<256x128xf32>,
    } else {
    }
    %c0 = arith.constant 0 : index
    %c0_1 = arith.constant 0 : index
    %3 = vector.load %arg8[%c0, %c0_1] : memref<256x128xf32, #tpu.memory_space<vmem>>, vector<256x128xf32>
    %c0_2 = arith.constant 0 : index
    %c0_3 = arith.constant 0 : index
    %4 = vector.load %arg3[%c0_2, %c0_3] : memref<256x12xf32, #tpu.memory_space<vmem>>, vector<256x12xf32>
    %c0_4 = arith.constant 0 : index
    %c0_5 = arith.constant 0 : index
    %5 = vector.load %arg4[%c0_4, %c0_5] : memref<12x128xf32, #tpu.memory_space<vmem>>, vector<12x128xf32>
    %cst = arith.constant dense<0.000000e+00> : vector<256x128xf32>
    %6 = tpu.matmul %4, %5, %cst {dimension_numbers = #tpu.dot_dimension_numbers<[1], [0], [0], [1], [0, 0, 1, 1], [], []>} : vector<256x12xf32>, vector<12x128xf32>, vector<256x128xf32> -> vector<256x128xf32>
    %7 = arith.addf %3, %6 : vector<256x128xf32>
    %c0_6 = arith.constant 0 : index
    %c0_7 = arith.constant 0 : index
    %8 = vector.load %arg8[%c0_6, %c0_7] : memref<256x128xf32, #tpu.memory_space<vmem>>, vector<256x128xf32>
    tpu.vector_store %arg8[%c0_6, %c0_7], %7 {strides = array<i32>} : memref<256x128xf32, #tpu.memory_space<vmem>>, vector<256x128xf32>,
    %c0_i32_8 = arith.constant 0 : i32
    %9 = arith.cmpi eq, %arg2, %c0_i32_8 : i32
    %10 = arith.extui %9 : i1 to i32
    %c0_i32_9 = arith.constant 0 : i32
    %11 = arith.cmpi ne, %10, %c0_i32_9 : i32
    scf.if %11 {
      %c0_10 = arith.constant 0 : index
      %c0_11 = arith.constant 0 : index
      %12 = vector.load %arg8[%c0_10, %c0_11] : memref<256x128xf32, #tpu.memory_space<vmem>>, vector<256x128xf32>
      %c0_12 = arith.constant 0 : index
      %c0_13 = arith.constant 0 : index
      %13 = vector.load %arg5[%c0_12, %c0_13] : memref<1x128xf32, #tpu.memory_space<vmem>>, vector<1x128xf32>
      %14 = vector.broadcast %13 : vector<1x128xf32> to vector<256x128xf32>
      %15 = arith.mulf %12, %14 : vector<256x128xf32>
      %c0_14 = arith.constant 0 : index
      %c0_15 = arith.constant 0 : index
      %16 = vector.load %arg6[%c0_14, %c0_15] : memref<1x128xf32, #tpu.memory_space<vmem>>, vector<1x128xf32>
      %17 = vector.broadcast %16 : vector<1x128xf32> to vector<256x128xf32>
      %18 = arith.addf %15, %17 : vector<256x128xf32>
      %c0_16 = arith.constant 0 : index
      %c0_17 = arith.constant 0 : index
      %19 = vector.load %arg7[%c0_16, %c0_17] : memref<256x128xf32, #tpu.memory_space<vmem>>, vector<256x128xf32>
      tpu.vector_store %arg7[%c0_16, %c0_17], %18 {strides = array<i32>} : memref<256x128xf32, #tpu.memory_space<vmem>>, vector<256x128xf32>,
    } else {
    }
    return
  }
  func.func @transform_0(%arg0: i32, %arg1: i32, %arg2: i32) -> (i32, i32) {
    %c0_i32 = arith.constant 0 : i32
    return %arg0, %arg2 : i32, i32
  }
  func.func @transform_1(%arg0: i32, %arg1: i32, %arg2: i32) -> (i32, i32) {
    %c0_i32 = arith.constant 0 : i32
    return %arg2, %arg1 : i32, i32
  }
  func.func @transform_2(%arg0: i32, %arg1: i32, %arg2: i32) -> (i32, i32) {
    %c0_i32 = arith.constant 0 : i32
    %c0_i32_0 = arith.constant 0 : i32
    return %c0_i32, %arg1 : i32, i32
  }
  func.func @transform_3(%arg0: i32, %arg1: i32, %arg2: i32) -> (i32, i32) {
    %c0_i32 = arith.constant 0 : i32
    %c0_i32_0 = arith.constant 0 : i32
    return %c0_i32, %arg1 : i32, i32
  }
  func.func @transform_4(%arg0: i32, %arg1: i32, %arg2: i32) -> (i32, i32) {
    %c0_i32 = arith.constant 0 : i32
    return %arg0, %arg1 : i32, i32
  }
}

module attributes {stable_mosaic.version = 11 : i64} {
  func.func @_gemm_bn_kernel(%arg0: i32, %arg1: i32, %arg2: i32, %arg3: memref<256x36xf32, #tpu.memory_space<vmem>>, %arg4: memref<36x128xf32, #tpu.memory_space<vmem>>, %arg5: memref<1x128xf32, #tpu.memory_space<vmem>>, %arg6: memref<1x128xf32, #tpu.memory_space<vmem>>, %arg7: memref<256x128xf32, #tpu.memory_space<vmem>>, %arg8: memref<256x128xf32, #tpu.memory_space<vmem>>) attributes {dimension_semantics = [#tpu.dimension_semantics<parallel>, #tpu.dimension_semantics<parallel>, #tpu.dimension_semantics<arbitrary>], iteration_bounds = array<i64: 8, 1, 1>, scalar_prefetch = 0 : i64, scratch_operands = 1 : i64, tpu.core_type = #tpu.core_type<tc>, window_params = [{transform_indices = @transform_0, window_bounds = array<i64: 256, 36>}, {transform_indices = @transform_1, window_bounds = array<i64: 36, 128>}, {transform_indices = @transform_2, window_bounds = array<i64: 1, 128>}, {transform_indices = @transform_3, window_bounds = array<i64: 1, 128>}, {transform_indices = @transform_4, window_bounds = array<i64: 256, 128>}]} {
    %c0_i32 = arith.constant 0 : i32
    %0 = arith.cmpi eq, %arg2, %c0_i32 : i32
    %1 = arith.extui %0 : i1 to i32
    %c0_i32_0 = arith.constant 0 : i32
    %2 = arith.cmpi ne, %1, %c0_i32_0 : i32
    scf.if %2 {
      %cst_10 = arith.constant 0.000000e+00 : f32
      %12 = vector.broadcast %cst_10 : f32 to vector<256x128xf32>
      %c0_11 = arith.constant 0 : index
      %c0_12 = arith.constant 0 : index
      %13 = vector.load %arg8[%c0_11, %c0_12] : memref<256x128xf32, #tpu.memory_space<vmem>>, vector<256x128xf32>
      tpu.vector_store %arg8[%c0_11, %c0_12], %12 {strides = array<i32>} : memref<256x128xf32, #tpu.memory_space<vmem>>, vector<256x128xf32>,
    } else {
    }
    %c0 = arith.constant 0 : index
    %c0_1 = arith.constant 0 : index
    %3 = vector.load %arg8[%c0, %c0_1] : memref<256x128xf32, #tpu.memory_space<vmem>>, vector<256x128xf32>
    %c0_2 = arith.constant 0 : index
    %c0_3 = arith.constant 0 : index
    %4 = vector.load %arg3[%c0_2, %c0_3] : memref<256x36xf32, #tpu.memory_space<vmem>>, vector<256x36xf32>
    %c0_4 = arith.constant 0 : index
    %c0_5 = arith.constant 0 : index
    %5 = vector.load %arg4[%c0_4, %c0_5] : memref<36x128xf32, #tpu.memory_space<vmem>>, vector<36x128xf32>
    %cst = arith.constant dense<0.000000e+00> : vector<256x128xf32>
    %6 = tpu.matmul %4, %5, %cst {dimension_numbers = #tpu.dot_dimension_numbers<[1], [0], [0], [1], [0, 0, 1, 1], [], []>} : vector<256x36xf32>, vector<36x128xf32>, vector<256x128xf32> -> vector<256x128xf32>
    %7 = arith.addf %3, %6 : vector<256x128xf32>
    %c0_6 = arith.constant 0 : index
    %c0_7 = arith.constant 0 : index
    %8 = vector.load %arg8[%c0_6, %c0_7] : memref<256x128xf32, #tpu.memory_space<vmem>>, vector<256x128xf32>
    tpu.vector_store %arg8[%c0_6, %c0_7], %7 {strides = array<i32>} : memref<256x128xf32, #tpu.memory_space<vmem>>, vector<256x128xf32>,
    %c0_i32_8 = arith.constant 0 : i32
    %9 = arith.cmpi eq, %arg2, %c0_i32_8 : i32
    %10 = arith.extui %9 : i1 to i32
    %c0_i32_9 = arith.constant 0 : i32
    %11 = arith.cmpi ne, %10, %c0_i32_9 : i32
    scf.if %11 {
      %c0_10 = arith.constant 0 : index
      %c0_11 = arith.constant 0 : index
      %12 = vector.load %arg8[%c0_10, %c0_11] : memref<256x128xf32, #tpu.memory_space<vmem>>, vector<256x128xf32>
      %c0_12 = arith.constant 0 : index
      %c0_13 = arith.constant 0 : index
      %13 = vector.load %arg5[%c0_12, %c0_13] : memref<1x128xf32, #tpu.memory_space<vmem>>, vector<1x128xf32>
      %14 = vector.broadcast %13 : vector<1x128xf32> to vector<256x128xf32>
      %15 = arith.mulf %12, %14 : vector<256x128xf32>
      %c0_14 = arith.constant 0 : index
      %c0_15 = arith.constant 0 : index
      %16 = vector.load %arg6[%c0_14, %c0_15] : memref<1x128xf32, #tpu.memory_space<vmem>>, vector<1x128xf32>
      %17 = vector.broadcast %16 : vector<1x128xf32> to vector<256x128xf32>
      %18 = arith.addf %15, %17 : vector<256x128xf32>
      %c0_16 = arith.constant 0 : index
      %c0_17 = arith.constant 0 : index
      %19 = vector.load %arg7[%c0_16, %c0_17] : memref<256x128xf32, #tpu.memory_space<vmem>>, vector<256x128xf32>
      tpu.vector_store %arg7[%c0_16, %c0_17], %18 {strides = array<i32>} : memref<256x128xf32, #tpu.memory_space<vmem>>, vector<256x128xf32>,
    } else {
    }
    return
  }
  func.func @transform_0(%arg0: i32, %arg1: i32, %arg2: i32) -> (i32, i32) {
    %c0_i32 = arith.constant 0 : i32
    return %arg0, %arg2 : i32, i32
  }
  func.func @transform_1(%arg0: i32, %arg1: i32, %arg2: i32) -> (i32, i32) {
    %c0_i32 = arith.constant 0 : i32
    return %arg2, %arg1 : i32, i32
  }
  func.func @transform_2(%arg0: i32, %arg1: i32, %arg2: i32) -> (i32, i32) {
    %c0_i32 = arith.constant 0 : i32
    %c0_i32_0 = arith.constant 0 : i32
    return %c0_i32, %arg1 : i32, i32
  }
  func.func @transform_3(%arg0: i32, %arg1: i32, %arg2: i32) -> (i32, i32) {
    %c0_i32 = arith.constant 0 : i32
    %c0_i32_0 = arith.constant 0 : i32
    return %c0_i32, %arg1 : i32, i32
  }
  func.func @transform_4(%arg0: i32, %arg1: i32, %arg2: i32) -> (i32, i32) {
    %c0_i32 = arith.constant 0 : i32
    return %arg0, %arg1 : i32, i32
  }
}

module attributes {stable_mosaic.version = 11 : i64} {
  func.func @_gemm_bn_kernel(%arg0: i32, %arg1: i32, %arg2: i32, %arg3: memref<256x200xf32, #tpu.memory_space<vmem>>, %arg4: memref<200x128xf32, #tpu.memory_space<vmem>>, %arg5: memref<1x128xf32, #tpu.memory_space<vmem>>, %arg6: memref<1x128xf32, #tpu.memory_space<vmem>>, %arg7: memref<256x128xf32, #tpu.memory_space<vmem>>, %arg8: memref<256x128xf32, #tpu.memory_space<vmem>>) attributes {dimension_semantics = [#tpu.dimension_semantics<parallel>, #tpu.dimension_semantics<parallel>, #tpu.dimension_semantics<arbitrary>], iteration_bounds = array<i64: 2, 1, 1>, scalar_prefetch = 0 : i64, scratch_operands = 1 : i64, tpu.core_type = #tpu.core_type<tc>, window_params = [{transform_indices = @transform_0, window_bounds = array<i64: 256, 200>}, {transform_indices = @transform_1, window_bounds = array<i64: 200, 128>}, {transform_indices = @transform_2, window_bounds = array<i64: 1, 128>}, {transform_indices = @transform_3, window_bounds = array<i64: 1, 128>}, {transform_indices = @transform_4, window_bounds = array<i64: 256, 128>}]} {
    %c0_i32 = arith.constant 0 : i32
    %0 = arith.cmpi eq, %arg2, %c0_i32 : i32
    %1 = arith.extui %0 : i1 to i32
    %c0_i32_0 = arith.constant 0 : i32
    %2 = arith.cmpi ne, %1, %c0_i32_0 : i32
    scf.if %2 {
      %cst_10 = arith.constant 0.000000e+00 : f32
      %12 = vector.broadcast %cst_10 : f32 to vector<256x128xf32>
      %c0_11 = arith.constant 0 : index
      %c0_12 = arith.constant 0 : index
      %13 = vector.load %arg8[%c0_11, %c0_12] : memref<256x128xf32, #tpu.memory_space<vmem>>, vector<256x128xf32>
      tpu.vector_store %arg8[%c0_11, %c0_12], %12 {strides = array<i32>} : memref<256x128xf32, #tpu.memory_space<vmem>>, vector<256x128xf32>,
    } else {
    }
    %c0 = arith.constant 0 : index
    %c0_1 = arith.constant 0 : index
    %3 = vector.load %arg8[%c0, %c0_1] : memref<256x128xf32, #tpu.memory_space<vmem>>, vector<256x128xf32>
    %c0_2 = arith.constant 0 : index
    %c0_3 = arith.constant 0 : index
    %4 = vector.load %arg3[%c0_2, %c0_3] : memref<256x200xf32, #tpu.memory_space<vmem>>, vector<256x200xf32>
    %c0_4 = arith.constant 0 : index
    %c0_5 = arith.constant 0 : index
    %5 = vector.load %arg4[%c0_4, %c0_5] : memref<200x128xf32, #tpu.memory_space<vmem>>, vector<200x128xf32>
    %cst = arith.constant dense<0.000000e+00> : vector<256x128xf32>
    %6 = tpu.matmul %4, %5, %cst {dimension_numbers = #tpu.dot_dimension_numbers<[1], [0], [0], [1], [0, 0, 1, 1], [], []>} : vector<256x200xf32>, vector<200x128xf32>, vector<256x128xf32> -> vector<256x128xf32>
    %7 = arith.addf %3, %6 : vector<256x128xf32>
    %c0_6 = arith.constant 0 : index
    %c0_7 = arith.constant 0 : index
    %8 = vector.load %arg8[%c0_6, %c0_7] : memref<256x128xf32, #tpu.memory_space<vmem>>, vector<256x128xf32>
    tpu.vector_store %arg8[%c0_6, %c0_7], %7 {strides = array<i32>} : memref<256x128xf32, #tpu.memory_space<vmem>>, vector<256x128xf32>,
    %c0_i32_8 = arith.constant 0 : i32
    %9 = arith.cmpi eq, %arg2, %c0_i32_8 : i32
    %10 = arith.extui %9 : i1 to i32
    %c0_i32_9 = arith.constant 0 : i32
    %11 = arith.cmpi ne, %10, %c0_i32_9 : i32
    scf.if %11 {
      %c0_10 = arith.constant 0 : index
      %c0_11 = arith.constant 0 : index
      %12 = vector.load %arg8[%c0_10, %c0_11] : memref<256x128xf32, #tpu.memory_space<vmem>>, vector<256x128xf32>
      %c0_12 = arith.constant 0 : index
      %c0_13 = arith.constant 0 : index
      %13 = vector.load %arg5[%c0_12, %c0_13] : memref<1x128xf32, #tpu.memory_space<vmem>>, vector<1x128xf32>
      %14 = vector.broadcast %13 : vector<1x128xf32> to vector<256x128xf32>
      %15 = arith.mulf %12, %14 : vector<256x128xf32>
      %c0_14 = arith.constant 0 : index
      %c0_15 = arith.constant 0 : index
      %16 = vector.load %arg6[%c0_14, %c0_15] : memref<1x128xf32, #tpu.memory_space<vmem>>, vector<1x128xf32>
      %17 = vector.broadcast %16 : vector<1x128xf32> to vector<256x128xf32>
      %18 = arith.addf %15, %17 : vector<256x128xf32>
      %c0_16 = arith.constant 0 : index
      %c0_17 = arith.constant 0 : index
      %19 = vector.load %arg7[%c0_16, %c0_17] : memref<256x128xf32, #tpu.memory_space<vmem>>, vector<256x128xf32>
      tpu.vector_store %arg7[%c0_16, %c0_17], %18 {strides = array<i32>} : memref<256x128xf32, #tpu.memory_space<vmem>>, vector<256x128xf32>,
    } else {
    }
    return
  }
  func.func @transform_0(%arg0: i32, %arg1: i32, %arg2: i32) -> (i32, i32) {
    %c0_i32 = arith.constant 0 : i32
    return %arg0, %arg2 : i32, i32
  }
  func.func @transform_1(%arg0: i32, %arg1: i32, %arg2: i32) -> (i32, i32) {
    %c0_i32 = arith.constant 0 : i32
    return %arg2, %arg1 : i32, i32
  }
  func.func @transform_2(%arg0: i32, %arg1: i32, %arg2: i32) -> (i32, i32) {
    %c0_i32 = arith.constant 0 : i32
    %c0_i32_0 = arith.constant 0 : i32
    return %c0_i32, %arg1 : i32, i32
  }
  func.func @transform_3(%arg0: i32, %arg1: i32, %arg2: i32) -> (i32, i32) {
    %c0_i32 = arith.constant 0 : i32
    %c0_i32_0 = arith.constant 0 : i32
    return %c0_i32, %arg1 : i32, i32
  }
  func.func @transform_4(%arg0: i32, %arg1: i32, %arg2: i32) -> (i32, i32) {
    %c0_i32 = arith.constant 0 : i32
    return %arg0, %arg1 : i32, i32
  }
}

module attributes {stable_mosaic.version = 11 : i64} {
  func.func @_gemm_bn_kernel(%arg0: i32, %arg1: i32, %arg2: i32, %arg3: memref<256x16xf32, #tpu.memory_space<vmem>>, %arg4: memref<16x128xf32, #tpu.memory_space<vmem>>, %arg5: memref<1x128xf32, #tpu.memory_space<vmem>>, %arg6: memref<1x128xf32, #tpu.memory_space<vmem>>, %arg7: memref<256x128xf32, #tpu.memory_space<vmem>>, %arg8: memref<256x128xf32, #tpu.memory_space<vmem>>) attributes {dimension_semantics = [#tpu.dimension_semantics<parallel>, #tpu.dimension_semantics<parallel>, #tpu.dimension_semantics<arbitrary>], iteration_bounds = array<i64: 2, 1, 1>, scalar_prefetch = 0 : i64, scratch_operands = 1 : i64, tpu.core_type = #tpu.core_type<tc>, window_params = [{transform_indices = @transform_0, window_bounds = array<i64: 256, 16>}, {transform_indices = @transform_1, window_bounds = array<i64: 16, 128>}, {transform_indices = @transform_2, window_bounds = array<i64: 1, 128>}, {transform_indices = @transform_3, window_bounds = array<i64: 1, 128>}, {transform_indices = @transform_4, window_bounds = array<i64: 256, 128>}]} {
    %c0_i32 = arith.constant 0 : i32
    %0 = arith.cmpi eq, %arg2, %c0_i32 : i32
    %1 = arith.extui %0 : i1 to i32
    %c0_i32_0 = arith.constant 0 : i32
    %2 = arith.cmpi ne, %1, %c0_i32_0 : i32
    scf.if %2 {
      %cst_10 = arith.constant 0.000000e+00 : f32
      %12 = vector.broadcast %cst_10 : f32 to vector<256x128xf32>
      %c0_11 = arith.constant 0 : index
      %c0_12 = arith.constant 0 : index
      %13 = vector.load %arg8[%c0_11, %c0_12] : memref<256x128xf32, #tpu.memory_space<vmem>>, vector<256x128xf32>
      tpu.vector_store %arg8[%c0_11, %c0_12], %12 {strides = array<i32>} : memref<256x128xf32, #tpu.memory_space<vmem>>, vector<256x128xf32>,
    } else {
    }
    %c0 = arith.constant 0 : index
    %c0_1 = arith.constant 0 : index
    %3 = vector.load %arg8[%c0, %c0_1] : memref<256x128xf32, #tpu.memory_space<vmem>>, vector<256x128xf32>
    %c0_2 = arith.constant 0 : index
    %c0_3 = arith.constant 0 : index
    %4 = vector.load %arg3[%c0_2, %c0_3] : memref<256x16xf32, #tpu.memory_space<vmem>>, vector<256x16xf32>
    %c0_4 = arith.constant 0 : index
    %c0_5 = arith.constant 0 : index
    %5 = vector.load %arg4[%c0_4, %c0_5] : memref<16x128xf32, #tpu.memory_space<vmem>>, vector<16x128xf32>
    %cst = arith.constant dense<0.000000e+00> : vector<256x128xf32>
    %6 = tpu.matmul %4, %5, %cst {dimension_numbers = #tpu.dot_dimension_numbers<[1], [0], [0], [1], [0, 0, 1, 1], [], []>} : vector<256x16xf32>, vector<16x128xf32>, vector<256x128xf32> -> vector<256x128xf32>
    %7 = arith.addf %3, %6 : vector<256x128xf32>
    %c0_6 = arith.constant 0 : index
    %c0_7 = arith.constant 0 : index
    %8 = vector.load %arg8[%c0_6, %c0_7] : memref<256x128xf32, #tpu.memory_space<vmem>>, vector<256x128xf32>
    tpu.vector_store %arg8[%c0_6, %c0_7], %7 {strides = array<i32>} : memref<256x128xf32, #tpu.memory_space<vmem>>, vector<256x128xf32>,
    %c0_i32_8 = arith.constant 0 : i32
    %9 = arith.cmpi eq, %arg2, %c0_i32_8 : i32
    %10 = arith.extui %9 : i1 to i32
    %c0_i32_9 = arith.constant 0 : i32
    %11 = arith.cmpi ne, %10, %c0_i32_9 : i32
    scf.if %11 {
      %c0_10 = arith.constant 0 : index
      %c0_11 = arith.constant 0 : index
      %12 = vector.load %arg8[%c0_10, %c0_11] : memref<256x128xf32, #tpu.memory_space<vmem>>, vector<256x128xf32>
      %c0_12 = arith.constant 0 : index
      %c0_13 = arith.constant 0 : index
      %13 = vector.load %arg5[%c0_12, %c0_13] : memref<1x128xf32, #tpu.memory_space<vmem>>, vector<1x128xf32>
      %14 = vector.broadcast %13 : vector<1x128xf32> to vector<256x128xf32>
      %15 = arith.mulf %12, %14 : vector<256x128xf32>
      %c0_14 = arith.constant 0 : index
      %c0_15 = arith.constant 0 : index
      %16 = vector.load %arg6[%c0_14, %c0_15] : memref<1x128xf32, #tpu.memory_space<vmem>>, vector<1x128xf32>
      %17 = vector.broadcast %16 : vector<1x128xf32> to vector<256x128xf32>
      %18 = arith.addf %15, %17 : vector<256x128xf32>
      %c0_16 = arith.constant 0 : index
      %c0_17 = arith.constant 0 : index
      %19 = vector.load %arg7[%c0_16, %c0_17] : memref<256x128xf32, #tpu.memory_space<vmem>>, vector<256x128xf32>
      tpu.vector_store %arg7[%c0_16, %c0_17], %18 {strides = array<i32>} : memref<256x128xf32, #tpu.memory_space<vmem>>, vector<256x128xf32>,
    } else {
    }
    return
  }
  func.func @transform_0(%arg0: i32, %arg1: i32, %arg2: i32) -> (i32, i32) {
    %c0_i32 = arith.constant 0 : i32
    return %arg0, %arg2 : i32, i32
  }
  func.func @transform_1(%arg0: i32, %arg1: i32, %arg2: i32) -> (i32, i32) {
    %c0_i32 = arith.constant 0 : i32
    return %arg2, %arg1 : i32, i32
  }
  func.func @transform_2(%arg0: i32, %arg1: i32, %arg2: i32) -> (i32, i32) {
    %c0_i32 = arith.constant 0 : i32
    %c0_i32_0 = arith.constant 0 : i32
    return %c0_i32, %arg1 : i32, i32
  }
  func.func @transform_3(%arg0: i32, %arg1: i32, %arg2: i32) -> (i32, i32) {
    %c0_i32 = arith.constant 0 : i32
    %c0_i32_0 = arith.constant 0 : i32
    return %c0_i32, %arg1 : i32, i32
  }
  func.func @transform_4(%arg0: i32, %arg1: i32, %arg2: i32) -> (i32, i32) {
    %c0_i32 = arith.constant 0 : i32
    return %arg0, %arg1 : i32, i32
  }
}

module attributes {stable_mosaic.version = 11 : i64} {
  func.func @_gemm_bn_kernel(%arg0: i32, %arg1: i32, %arg2: i32, %arg3: memref<256x72xf32, #tpu.memory_space<vmem>>, %arg4: memref<72x128xf32, #tpu.memory_space<vmem>>, %arg5: memref<1x128xf32, #tpu.memory_space<vmem>>, %arg6: memref<1x128xf32, #tpu.memory_space<vmem>>, %arg7: memref<256x128xf32, #tpu.memory_space<vmem>>, %arg8: memref<256x128xf32, #tpu.memory_space<vmem>>) attributes {dimension_semantics = [#tpu.dimension_semantics<parallel>, #tpu.dimension_semantics<parallel>, #tpu.dimension_semantics<arbitrary>], iteration_bounds = array<i64: 2, 1, 1>, scalar_prefetch = 0 : i64, scratch_operands = 1 : i64, tpu.core_type = #tpu.core_type<tc>, window_params = [{transform_indices = @transform_0, window_bounds = array<i64: 256, 72>}, {transform_indices = @transform_1, window_bounds = array<i64: 72, 128>}, {transform_indices = @transform_2, window_bounds = array<i64: 1, 128>}, {transform_indices = @transform_3, window_bounds = array<i64: 1, 128>}, {transform_indices = @transform_4, window_bounds = array<i64: 256, 128>}]} {
    %c0_i32 = arith.constant 0 : i32
    %0 = arith.cmpi eq, %arg2, %c0_i32 : i32
    %1 = arith.extui %0 : i1 to i32
    %c0_i32_0 = arith.constant 0 : i32
    %2 = arith.cmpi ne, %1, %c0_i32_0 : i32
    scf.if %2 {
      %cst_10 = arith.constant 0.000000e+00 : f32
      %12 = vector.broadcast %cst_10 : f32 to vector<256x128xf32>
      %c0_11 = arith.constant 0 : index
      %c0_12 = arith.constant 0 : index
      %13 = vector.load %arg8[%c0_11, %c0_12] : memref<256x128xf32, #tpu.memory_space<vmem>>, vector<256x128xf32>
      tpu.vector_store %arg8[%c0_11, %c0_12], %12 {strides = array<i32>} : memref<256x128xf32, #tpu.memory_space<vmem>>, vector<256x128xf32>,
    } else {
    }
    %c0 = arith.constant 0 : index
    %c0_1 = arith.constant 0 : index
    %3 = vector.load %arg8[%c0, %c0_1] : memref<256x128xf32, #tpu.memory_space<vmem>>, vector<256x128xf32>
    %c0_2 = arith.constant 0 : index
    %c0_3 = arith.constant 0 : index
    %4 = vector.load %arg3[%c0_2, %c0_3] : memref<256x72xf32, #tpu.memory_space<vmem>>, vector<256x72xf32>
    %c0_4 = arith.constant 0 : index
    %c0_5 = arith.constant 0 : index
    %5 = vector.load %arg4[%c0_4, %c0_5] : memref<72x128xf32, #tpu.memory_space<vmem>>, vector<72x128xf32>
    %cst = arith.constant dense<0.000000e+00> : vector<256x128xf32>
    %6 = tpu.matmul %4, %5, %cst {dimension_numbers = #tpu.dot_dimension_numbers<[1], [0], [0], [1], [0, 0, 1, 1], [], []>} : vector<256x72xf32>, vector<72x128xf32>, vector<256x128xf32> -> vector<256x128xf32>
    %7 = arith.addf %3, %6 : vector<256x128xf32>
    %c0_6 = arith.constant 0 : index
    %c0_7 = arith.constant 0 : index
    %8 = vector.load %arg8[%c0_6, %c0_7] : memref<256x128xf32, #tpu.memory_space<vmem>>, vector<256x128xf32>
    tpu.vector_store %arg8[%c0_6, %c0_7], %7 {strides = array<i32>} : memref<256x128xf32, #tpu.memory_space<vmem>>, vector<256x128xf32>,
    %c0_i32_8 = arith.constant 0 : i32
    %9 = arith.cmpi eq, %arg2, %c0_i32_8 : i32
    %10 = arith.extui %9 : i1 to i32
    %c0_i32_9 = arith.constant 0 : i32
    %11 = arith.cmpi ne, %10, %c0_i32_9 : i32
    scf.if %11 {
      %c0_10 = arith.constant 0 : index
      %c0_11 = arith.constant 0 : index
      %12 = vector.load %arg8[%c0_10, %c0_11] : memref<256x128xf32, #tpu.memory_space<vmem>>, vector<256x128xf32>
      %c0_12 = arith.constant 0 : index
      %c0_13 = arith.constant 0 : index
      %13 = vector.load %arg5[%c0_12, %c0_13] : memref<1x128xf32, #tpu.memory_space<vmem>>, vector<1x128xf32>
      %14 = vector.broadcast %13 : vector<1x128xf32> to vector<256x128xf32>
      %15 = arith.mulf %12, %14 : vector<256x128xf32>
      %c0_14 = arith.constant 0 : index
      %c0_15 = arith.constant 0 : index
      %16 = vector.load %arg6[%c0_14, %c0_15] : memref<1x128xf32, #tpu.memory_space<vmem>>, vector<1x128xf32>
      %17 = vector.broadcast %16 : vector<1x128xf32> to vector<256x128xf32>
      %18 = arith.addf %15, %17 : vector<256x128xf32>
      %c0_16 = arith.constant 0 : index
      %c0_17 = arith.constant 0 : index
      %19 = vector.load %arg7[%c0_16, %c0_17] : memref<256x128xf32, #tpu.memory_space<vmem>>, vector<256x128xf32>
      tpu.vector_store %arg7[%c0_16, %c0_17], %18 {strides = array<i32>} : memref<256x128xf32, #tpu.memory_space<vmem>>, vector<256x128xf32>,
    } else {
    }
    return
  }
  func.func @transform_0(%arg0: i32, %arg1: i32, %arg2: i32) -> (i32, i32) {
    %c0_i32 = arith.constant 0 : i32
    return %arg0, %arg2 : i32, i32
  }
  func.func @transform_1(%arg0: i32, %arg1: i32, %arg2: i32) -> (i32, i32) {
    %c0_i32 = arith.constant 0 : i32
    return %arg2, %arg1 : i32, i32
  }
  func.func @transform_2(%arg0: i32, %arg1: i32, %arg2: i32) -> (i32, i32) {
    %c0_i32 = arith.constant 0 : i32
    %c0_i32_0 = arith.constant 0 : i32
    return %c0_i32, %arg1 : i32, i32
  }
  func.func @transform_3(%arg0: i32, %arg1: i32, %arg2: i32) -> (i32, i32) {
    %c0_i32 = arith.constant 0 : i32
    %c0_i32_0 = arith.constant 0 : i32
    return %c0_i32, %arg1 : i32, i32
  }
  func.func @transform_4(%arg0: i32, %arg1: i32, %arg2: i32) -> (i32, i32) {
    %c0_i32 = arith.constant 0 : i32
    return %arg0, %arg1 : i32, i32
  }
}

module attributes {stable_mosaic.version = 11 : i64} {
  func.func @_gemm_bn_kernel(%arg0: i32, %arg1: i32, %arg2: i32, %arg3: memref<128x32xf32, #tpu.memory_space<vmem>>, %arg4: memref<32x128xf32, #tpu.memory_space<vmem>>, %arg5: memref<1x128xf32, #tpu.memory_space<vmem>>, %arg6: memref<1x128xf32, #tpu.memory_space<vmem>>, %arg7: memref<128x128xf32, #tpu.memory_space<vmem>>, %arg8: memref<128x128xf32, #tpu.memory_space<vmem>>) attributes {dimension_semantics = [#tpu.dimension_semantics<parallel>, #tpu.dimension_semantics<parallel>, #tpu.dimension_semantics<arbitrary>], iteration_bounds = array<i64: 1, 1, 1>, scalar_prefetch = 0 : i64, scratch_operands = 1 : i64, tpu.core_type = #tpu.core_type<tc>, window_params = [{transform_indices = @transform_0, window_bounds = array<i64: 128, 32>}, {transform_indices = @transform_1, window_bounds = array<i64: 32, 128>}, {transform_indices = @transform_2, window_bounds = array<i64: 1, 128>}, {transform_indices = @transform_3, window_bounds = array<i64: 1, 128>}, {transform_indices = @transform_4, window_bounds = array<i64: 128, 128>}]} {
    %c0_i32 = arith.constant 0 : i32
    %0 = arith.cmpi eq, %arg2, %c0_i32 : i32
    %1 = arith.extui %0 : i1 to i32
    %c0_i32_0 = arith.constant 0 : i32
    %2 = arith.cmpi ne, %1, %c0_i32_0 : i32
    scf.if %2 {
      %cst_10 = arith.constant 0.000000e+00 : f32
      %12 = vector.broadcast %cst_10 : f32 to vector<128x128xf32>
      %c0_11 = arith.constant 0 : index
      %c0_12 = arith.constant 0 : index
      %13 = vector.load %arg8[%c0_11, %c0_12] : memref<128x128xf32, #tpu.memory_space<vmem>>, vector<128x128xf32>
      tpu.vector_store %arg8[%c0_11, %c0_12], %12 {strides = array<i32>} : memref<128x128xf32, #tpu.memory_space<vmem>>, vector<128x128xf32>,
    } else {
    }
    %c0 = arith.constant 0 : index
    %c0_1 = arith.constant 0 : index
    %3 = vector.load %arg8[%c0, %c0_1] : memref<128x128xf32, #tpu.memory_space<vmem>>, vector<128x128xf32>
    %c0_2 = arith.constant 0 : index
    %c0_3 = arith.constant 0 : index
    %4 = vector.load %arg3[%c0_2, %c0_3] : memref<128x32xf32, #tpu.memory_space<vmem>>, vector<128x32xf32>
    %c0_4 = arith.constant 0 : index
    %c0_5 = arith.constant 0 : index
    %5 = vector.load %arg4[%c0_4, %c0_5] : memref<32x128xf32, #tpu.memory_space<vmem>>, vector<32x128xf32>
    %cst = arith.constant dense<0.000000e+00> : vector<128x128xf32>
    %6 = tpu.matmul %4, %5, %cst {dimension_numbers = #tpu.dot_dimension_numbers<[1], [0], [0], [1], [0, 0, 1, 1], [], []>} : vector<128x32xf32>, vector<32x128xf32>, vector<128x128xf32> -> vector<128x128xf32>
    %7 = arith.addf %3, %6 : vector<128x128xf32>
    %c0_6 = arith.constant 0 : index
    %c0_7 = arith.constant 0 : index
    %8 = vector.load %arg8[%c0_6, %c0_7] : memref<128x128xf32, #tpu.memory_space<vmem>>, vector<128x128xf32>
    tpu.vector_store %arg8[%c0_6, %c0_7], %7 {strides = array<i32>} : memref<128x128xf32, #tpu.memory_space<vmem>>, vector<128x128xf32>,
    %c0_i32_8 = arith.constant 0 : i32
    %9 = arith.cmpi eq, %arg2, %c0_i32_8 : i32
    %10 = arith.extui %9 : i1 to i32
    %c0_i32_9 = arith.constant 0 : i32
    %11 = arith.cmpi ne, %10, %c0_i32_9 : i32
    scf.if %11 {
      %c0_10 = arith.constant 0 : index
      %c0_11 = arith.constant 0 : index
      %12 = vector.load %arg8[%c0_10, %c0_11] : memref<128x128xf32, #tpu.memory_space<vmem>>, vector<128x128xf32>
      %c0_12 = arith.constant 0 : index
      %c0_13 = arith.constant 0 : index
      %13 = vector.load %arg5[%c0_12, %c0_13] : memref<1x128xf32, #tpu.memory_space<vmem>>, vector<1x128xf32>
      %14 = vector.broadcast %13 : vector<1x128xf32> to vector<128x128xf32>
      %15 = arith.mulf %12, %14 : vector<128x128xf32>
      %c0_14 = arith.constant 0 : index
      %c0_15 = arith.constant 0 : index
      %16 = vector.load %arg6[%c0_14, %c0_15] : memref<1x128xf32, #tpu.memory_space<vmem>>, vector<1x128xf32>
      %17 = vector.broadcast %16 : vector<1x128xf32> to vector<128x128xf32>
      %18 = arith.addf %15, %17 : vector<128x128xf32>
      %c0_16 = arith.constant 0 : index
      %c0_17 = arith.constant 0 : index
      %19 = vector.load %arg7[%c0_16, %c0_17] : memref<128x128xf32, #tpu.memory_space<vmem>>, vector<128x128xf32>
      tpu.vector_store %arg7[%c0_16, %c0_17], %18 {strides = array<i32>} : memref<128x128xf32, #tpu.memory_space<vmem>>, vector<128x128xf32>,
    } else {
    }
    return
  }
  func.func @transform_0(%arg0: i32, %arg1: i32, %arg2: i32) -> (i32, i32) {
    %c0_i32 = arith.constant 0 : i32
    return %arg0, %arg2 : i32, i32
  }
  func.func @transform_1(%arg0: i32, %arg1: i32, %arg2: i32) -> (i32, i32) {
    %c0_i32 = arith.constant 0 : i32
    return %arg2, %arg1 : i32, i32
  }
  func.func @transform_2(%arg0: i32, %arg1: i32, %arg2: i32) -> (i32, i32) {
    %c0_i32 = arith.constant 0 : i32
    %c0_i32_0 = arith.constant 0 : i32
    return %c0_i32, %arg1 : i32, i32
  }
  func.func @transform_3(%arg0: i32, %arg1: i32, %arg2: i32) -> (i32, i32) {
    %c0_i32 = arith.constant 0 : i32
    %c0_i32_0 = arith.constant 0 : i32
    return %c0_i32, %arg1 : i32, i32
  }
  func.func @transform_4(%arg0: i32, %arg1: i32, %arg2: i32) -> (i32, i32) {
    %c0_i32 = arith.constant 0 : i32
    return %arg0, %arg1 : i32, i32
  }
}

module attributes {stable_mosaic.version = 11 : i64} {
  func.func @_gemm_bn_kernel(%arg0: i32, %arg1: i32, %arg2: i32, %arg3: memref<128x400xf32, #tpu.memory_space<vmem>>, %arg4: memref<400x128xf32, #tpu.memory_space<vmem>>, %arg5: memref<1x128xf32, #tpu.memory_space<vmem>>, %arg6: memref<1x128xf32, #tpu.memory_space<vmem>>, %arg7: memref<128x128xf32, #tpu.memory_space<vmem>>, %arg8: memref<128x128xf32, #tpu.memory_space<vmem>>) attributes {dimension_semantics = [#tpu.dimension_semantics<parallel>, #tpu.dimension_semantics<parallel>, #tpu.dimension_semantics<arbitrary>], iteration_bounds = array<i64: 1, 1, 1>, scalar_prefetch = 0 : i64, scratch_operands = 1 : i64, tpu.core_type = #tpu.core_type<tc>, window_params = [{transform_indices = @transform_0, window_bounds = array<i64: 128, 400>}, {transform_indices = @transform_1, window_bounds = array<i64: 400, 128>}, {transform_indices = @transform_2, window_bounds = array<i64: 1, 128>}, {transform_indices = @transform_3, window_bounds = array<i64: 1, 128>}, {transform_indices = @transform_4, window_bounds = array<i64: 128, 128>}]} {
    %c0_i32 = arith.constant 0 : i32
    %0 = arith.cmpi eq, %arg2, %c0_i32 : i32
    %1 = arith.extui %0 : i1 to i32
    %c0_i32_0 = arith.constant 0 : i32
    %2 = arith.cmpi ne, %1, %c0_i32_0 : i32
    scf.if %2 {
      %cst_10 = arith.constant 0.000000e+00 : f32
      %12 = vector.broadcast %cst_10 : f32 to vector<128x128xf32>
      %c0_11 = arith.constant 0 : index
      %c0_12 = arith.constant 0 : index
      %13 = vector.load %arg8[%c0_11, %c0_12] : memref<128x128xf32, #tpu.memory_space<vmem>>, vector<128x128xf32>
      tpu.vector_store %arg8[%c0_11, %c0_12], %12 {strides = array<i32>} : memref<128x128xf32, #tpu.memory_space<vmem>>, vector<128x128xf32>,
    } else {
    }
    %c0 = arith.constant 0 : index
    %c0_1 = arith.constant 0 : index
    %3 = vector.load %arg8[%c0, %c0_1] : memref<128x128xf32, #tpu.memory_space<vmem>>, vector<128x128xf32>
    %c0_2 = arith.constant 0 : index
    %c0_3 = arith.constant 0 : index
    %4 = vector.load %arg3[%c0_2, %c0_3] : memref<128x400xf32, #tpu.memory_space<vmem>>, vector<128x400xf32>
    %c0_4 = arith.constant 0 : index
    %c0_5 = arith.constant 0 : index
    %5 = vector.load %arg4[%c0_4, %c0_5] : memref<400x128xf32, #tpu.memory_space<vmem>>, vector<400x128xf32>
    %cst = arith.constant dense<0.000000e+00> : vector<128x128xf32>
    %6 = tpu.matmul %4, %5, %cst {dimension_numbers = #tpu.dot_dimension_numbers<[1], [0], [0], [1], [0, 0, 1, 1], [], []>} : vector<128x400xf32>, vector<400x128xf32>, vector<128x128xf32> -> vector<128x128xf32>
    %7 = arith.addf %3, %6 : vector<128x128xf32>
    %c0_6 = arith.constant 0 : index
    %c0_7 = arith.constant 0 : index
    %8 = vector.load %arg8[%c0_6, %c0_7] : memref<128x128xf32, #tpu.memory_space<vmem>>, vector<128x128xf32>
    tpu.vector_store %arg8[%c0_6, %c0_7], %7 {strides = array<i32>} : memref<128x128xf32, #tpu.memory_space<vmem>>, vector<128x128xf32>,
    %c0_i32_8 = arith.constant 0 : i32
    %9 = arith.cmpi eq, %arg2, %c0_i32_8 : i32
    %10 = arith.extui %9 : i1 to i32
    %c0_i32_9 = arith.constant 0 : i32
    %11 = arith.cmpi ne, %10, %c0_i32_9 : i32
    scf.if %11 {
      %c0_10 = arith.constant 0 : index
      %c0_11 = arith.constant 0 : index
      %12 = vector.load %arg8[%c0_10, %c0_11] : memref<128x128xf32, #tpu.memory_space<vmem>>, vector<128x128xf32>
      %c0_12 = arith.constant 0 : index
      %c0_13 = arith.constant 0 : index
      %13 = vector.load %arg5[%c0_12, %c0_13] : memref<1x128xf32, #tpu.memory_space<vmem>>, vector<1x128xf32>
      %14 = vector.broadcast %13 : vector<1x128xf32> to vector<128x128xf32>
      %15 = arith.mulf %12, %14 : vector<128x128xf32>
      %c0_14 = arith.constant 0 : index
      %c0_15 = arith.constant 0 : index
      %16 = vector.load %arg6[%c0_14, %c0_15] : memref<1x128xf32, #tpu.memory_space<vmem>>, vector<1x128xf32>
      %17 = vector.broadcast %16 : vector<1x128xf32> to vector<128x128xf32>
      %18 = arith.addf %15, %17 : vector<128x128xf32>
      %c0_16 = arith.constant 0 : index
      %c0_17 = arith.constant 0 : index
      %19 = vector.load %arg7[%c0_16, %c0_17] : memref<128x128xf32, #tpu.memory_space<vmem>>, vector<128x128xf32>
      tpu.vector_store %arg7[%c0_16, %c0_17], %18 {strides = array<i32>} : memref<128x128xf32, #tpu.memory_space<vmem>>, vector<128x128xf32>,
    } else {
    }
    return
  }
  func.func @transform_0(%arg0: i32, %arg1: i32, %arg2: i32) -> (i32, i32) {
    %c0_i32 = arith.constant 0 : i32
    return %arg0, %arg2 : i32, i32
  }
  func.func @transform_1(%arg0: i32, %arg1: i32, %arg2: i32) -> (i32, i32) {
    %c0_i32 = arith.constant 0 : i32
    return %arg2, %arg1 : i32, i32
  }
  func.func @transform_2(%arg0: i32, %arg1: i32, %arg2: i32) -> (i32, i32) {
    %c0_i32 = arith.constant 0 : i32
    %c0_i32_0 = arith.constant 0 : i32
    return %c0_i32, %arg1 : i32, i32
  }
  func.func @transform_3(%arg0: i32, %arg1: i32, %arg2: i32) -> (i32, i32) {
    %c0_i32 = arith.constant 0 : i32
    %c0_i32_0 = arith.constant 0 : i32
    return %c0_i32, %arg1 : i32, i32
  }
  func.func @transform_4(%arg0: i32, %arg1: i32, %arg2: i32) -> (i32, i32) {
    %c0_i32 = arith.constant 0 : i32
    return %arg0, %arg1 : i32, i32
  }
}

module attributes {stable_mosaic.version = 11 : i64} {
  func.func @_gemm_bn_kernel(%arg0: i32, %arg1: i32, %arg2: i32, %arg3: memref<128x144xf32, #tpu.memory_space<vmem>>, %arg4: memref<144x128xf32, #tpu.memory_space<vmem>>, %arg5: memref<1x128xf32, #tpu.memory_space<vmem>>, %arg6: memref<1x128xf32, #tpu.memory_space<vmem>>, %arg7: memref<128x128xf32, #tpu.memory_space<vmem>>, %arg8: memref<128x128xf32, #tpu.memory_space<vmem>>) attributes {dimension_semantics = [#tpu.dimension_semantics<parallel>, #tpu.dimension_semantics<parallel>, #tpu.dimension_semantics<arbitrary>], iteration_bounds = array<i64: 1, 1, 1>, scalar_prefetch = 0 : i64, scratch_operands = 1 : i64, tpu.core_type = #tpu.core_type<tc>, window_params = [{transform_indices = @transform_0, window_bounds = array<i64: 128, 144>}, {transform_indices = @transform_1, window_bounds = array<i64: 144, 128>}, {transform_indices = @transform_2, window_bounds = array<i64: 1, 128>}, {transform_indices = @transform_3, window_bounds = array<i64: 1, 128>}, {transform_indices = @transform_4, window_bounds = array<i64: 128, 128>}]} {
    %c0_i32 = arith.constant 0 : i32
    %0 = arith.cmpi eq, %arg2, %c0_i32 : i32
    %1 = arith.extui %0 : i1 to i32
    %c0_i32_0 = arith.constant 0 : i32
    %2 = arith.cmpi ne, %1, %c0_i32_0 : i32
    scf.if %2 {
      %cst_10 = arith.constant 0.000000e+00 : f32
      %12 = vector.broadcast %cst_10 : f32 to vector<128x128xf32>
      %c0_11 = arith.constant 0 : index
      %c0_12 = arith.constant 0 : index
      %13 = vector.load %arg8[%c0_11, %c0_12] : memref<128x128xf32, #tpu.memory_space<vmem>>, vector<128x128xf32>
      tpu.vector_store %arg8[%c0_11, %c0_12], %12 {strides = array<i32>} : memref<128x128xf32, #tpu.memory_space<vmem>>, vector<128x128xf32>,
    } else {
    }
    %c0 = arith.constant 0 : index
    %c0_1 = arith.constant 0 : index
    %3 = vector.load %arg8[%c0, %c0_1] : memref<128x128xf32, #tpu.memory_space<vmem>>, vector<128x128xf32>
    %c0_2 = arith.constant 0 : index
    %c0_3 = arith.constant 0 : index
    %4 = vector.load %arg3[%c0_2, %c0_3] : memref<128x144xf32, #tpu.memory_space<vmem>>, vector<128x144xf32>
    %c0_4 = arith.constant 0 : index
    %c0_5 = arith.constant 0 : index
    %5 = vector.load %arg4[%c0_4, %c0_5] : memref<144x128xf32, #tpu.memory_space<vmem>>, vector<144x128xf32>
    %cst = arith.constant dense<0.000000e+00> : vector<128x128xf32>
    %6 = tpu.matmul %4, %5, %cst {dimension_numbers = #tpu.dot_dimension_numbers<[1], [0], [0], [1], [0, 0, 1, 1], [], []>} : vector<128x144xf32>, vector<144x128xf32>, vector<128x128xf32> -> vector<128x128xf32>
    %7 = arith.addf %3, %6 : vector<128x128xf32>
    %c0_6 = arith.constant 0 : index
    %c0_7 = arith.constant 0 : index
    %8 = vector.load %arg8[%c0_6, %c0_7] : memref<128x128xf32, #tpu.memory_space<vmem>>, vector<128x128xf32>
    tpu.vector_store %arg8[%c0_6, %c0_7], %7 {strides = array<i32>} : memref<128x128xf32, #tpu.memory_space<vmem>>, vector<128x128xf32>,
    %c0_i32_8 = arith.constant 0 : i32
    %9 = arith.cmpi eq, %arg2, %c0_i32_8 : i32
    %10 = arith.extui %9 : i1 to i32
    %c0_i32_9 = arith.constant 0 : i32
    %11 = arith.cmpi ne, %10, %c0_i32_9 : i32
    scf.if %11 {
      %c0_10 = arith.constant 0 : index
      %c0_11 = arith.constant 0 : index
      %12 = vector.load %arg8[%c0_10, %c0_11] : memref<128x128xf32, #tpu.memory_space<vmem>>, vector<128x128xf32>
      %c0_12 = arith.constant 0 : index
      %c0_13 = arith.constant 0 : index
      %13 = vector.load %arg5[%c0_12, %c0_13] : memref<1x128xf32, #tpu.memory_space<vmem>>, vector<1x128xf32>
      %14 = vector.broadcast %13 : vector<1x128xf32> to vector<128x128xf32>
      %15 = arith.mulf %12, %14 : vector<128x128xf32>
      %c0_14 = arith.constant 0 : index
      %c0_15 = arith.constant 0 : index
      %16 = vector.load %arg6[%c0_14, %c0_15] : memref<1x128xf32, #tpu.memory_space<vmem>>, vector<1x128xf32>
      %17 = vector.broadcast %16 : vector<1x128xf32> to vector<128x128xf32>
      %18 = arith.addf %15, %17 : vector<128x128xf32>
      %c0_16 = arith.constant 0 : index
      %c0_17 = arith.constant 0 : index
      %19 = vector.load %arg7[%c0_16, %c0_17] : memref<128x128xf32, #tpu.memory_space<vmem>>, vector<128x128xf32>
      tpu.vector_store %arg7[%c0_16, %c0_17], %18 {strides = array<i32>} : memref<128x128xf32, #tpu.memory_space<vmem>>, vector<128x128xf32>,
    } else {
    }
    return
  }
  func.func @transform_0(%arg0: i32, %arg1: i32, %arg2: i32) -> (i32, i32) {
    %c0_i32 = arith.constant 0 : i32
    return %arg0, %arg2 : i32, i32
  }
  func.func @transform_1(%arg0: i32, %arg1: i32, %arg2: i32) -> (i32, i32) {
    %c0_i32 = arith.constant 0 : i32
    return %arg2, %arg1 : i32, i32
  }
  func.func @transform_2(%arg0: i32, %arg1: i32, %arg2: i32) -> (i32, i32) {
    %c0_i32 = arith.constant 0 : i32
    %c0_i32_0 = arith.constant 0 : i32
    return %c0_i32, %arg1 : i32, i32
  }
  func.func @transform_3(%arg0: i32, %arg1: i32, %arg2: i32) -> (i32, i32) {
    %c0_i32 = arith.constant 0 : i32
    %c0_i32_0 = arith.constant 0 : i32
    return %c0_i32, %arg1 : i32, i32
  }
  func.func @transform_4(%arg0: i32, %arg1: i32, %arg2: i32) -> (i32, i32) {
    %c0_i32 = arith.constant 0 : i32
    return %arg0, %arg1 : i32, i32
  }
}

module attributes {stable_mosaic.version = 11 : i64} {
  func.func @_gap_fc_kernel(%arg0: memref<8x64x32xf32, #tpu.memory_space<vmem>>, %arg1: memref<32x128xf32, #tpu.memory_space<vmem>>, %arg2: memref<1x128xf32, #tpu.memory_space<vmem>>, %arg3: memref<8x128xf32, #tpu.memory_space<vmem>>) attributes {dimension_semantics = [], scalar_prefetch = 0 : i64, scratch_operands = 0 : i64, tpu.core_type = #tpu.core_type<tc>} {
    %c0 = arith.constant 0 : index
    %c0_0 = arith.constant 0 : index
    %c0_1 = arith.constant 0 : index
    %0 = vector.load %arg0[%c0, %c0_0, %c0_1] : memref<8x64x32xf32, #tpu.memory_space<vmem>>, vector<8x64x32xf32>
    %cst = arith.constant dense<0.000000e+00> : vector<8x32xf32>
    %1 = vector.multi_reduction <add>, %0, %cst [1] : vector<8x64x32xf32> to vector<8x32xf32>
    %cst_2 = arith.constant 1.562500e-02 : f32
    %2 = vector.broadcast %cst_2 : f32 to vector<8x32xf32>
    %3 = arith.mulf %1, %2 : vector<8x32xf32>
    %c0_3 = arith.constant 0 : index
    %c0_4 = arith.constant 0 : index
    %4 = vector.load %arg1[%c0_3, %c0_4] : memref<32x128xf32, #tpu.memory_space<vmem>>, vector<32x128xf32>
    %cst_5 = arith.constant dense<0.000000e+00> : vector<8x128xf32>
    %5 = tpu.matmul %3, %4, %cst_5 {dimension_numbers = #tpu.dot_dimension_numbers<[1], [0], [0], [1], [0, 0, 1, 1], [], []>} : vector<8x32xf32>, vector<32x128xf32>, vector<8x128xf32> -> vector<8x128xf32>
    %c0_6 = arith.constant 0 : index
    %c0_7 = arith.constant 0 : index
    %6 = vector.load %arg2[%c0_6, %c0_7] : memref<1x128xf32, #tpu.memory_space<vmem>>, vector<1x128xf32>
    %7 = vector.broadcast %6 : vector<1x128xf32> to vector<8x128xf32>
    %8 = arith.addf %5, %7 : vector<8x128xf32>
    %c0_8 = arith.constant 0 : index
    %c0_9 = arith.constant 0 : index
    %9 = vector.load %arg3[%c0_8, %c0_9] : memref<8x128xf32, #tpu.memory_space<vmem>>, vector<8x128xf32>
    tpu.vector_store %arg3[%c0_8, %c0_9], %8 {strides = array<i32>} : memref<8x128xf32, #tpu.memory_space<vmem>>, vector<8x128xf32>,
    return
  }
}

</mosaic_0001>

<bundles_post_ra>
// kernel: _lambda_.16
= control target key start
LH: loop header
LB: loop body
LE: loop exit
PB: predicated region body
PF: predicated region fallthrough
CT: control target
= control target key end

     0   :  { %s1078_s15 = smov 0   ;;  %s1080_s16 = smov 0   ;;  %s1304_s0 = inlined_call_operand.vmem [shape: f32[2048,27], index: 0, kind: input, shape index: {}]   ;;  %s1305_s1 = inlined_call_operand.vmem [shape: f32[27,128], index: 1, kind: input, shape index: {}]   ;;  %s1306_s2 = inlined_call_operand.vmem [shape: f32[1,128], index: 2, kind: input, shape index: {}]   ;;  %s1307_s3 = inlined_call_operand.vmem [shape: f32[1,128], index: 3, kind: input, shape index: {}]   ;;  %s1308_s4 = inlined_call_operand.vmem [shape: f32[2048,128], index: 4, kind: output, shape index: {}]  }
   0x1   :  { %s1082_s17 = smov 0  }
   0x2 LB: > { %s33_s18 = sadd.s32 1, %s1047_s16  ;;  %p951_p0 = scmp.ge.s32.totalorder %s1051_s17, 1  ;;  %s1051_s17 = sphi %s1082_s17, %s14_s17   ;;  %s1047_s16 = sphi %s1080_s16, %s1310_s16   ;;  %s1043_s15 = sphi %s1078_s15, %s1309_s15  }
   0x3   : > { %p35_p1 = scmp.ge.s32.totalorder %s33_s18, 8  ;;  %p221_p2 = scmp.lt.s32.totalorder %s1051_s17, 9 }
   0x5   : > { %s1312_s18 = smov (%p35_p1, %s33_s18), 0  ;;  %p222_p3 = pnand %p951_p0, %p221_p2 }
   0x6   : > { %s952_s23 = sshll.u32 (!%p222_p3), %s1043_s15, 5 }
   0x7   : > { %225 = sbr.rel (%p222_p3) target bundleno = 214 (0xd6), region = 36  ;;  %p268_p4 = scmp.lt.s32.totalorder (!%p222_p3), %s952_s23, 255 }
   0xc   : > { %v403_v0 = vld [vmem:[%s1305_s1 + $0x18] sm:$0x7]  ;;  %vm501_vm0 = vcmask 1042432   ;;  %v402_v1 = vld [vmem:[%s1305_s1 + $0x10] sm:$0xff]  ;;  %v401_v2 = vld [vmem:[%s1305_s1 + $0x8] sm:$0xff]  ;;  %s1314_s23 = smov (!%p268_p4, %s952_s23), 255 }
   0xd   : > { %992 = vmatpush.msk.msra.mxu2 %vm501_vm0, %v403_v0  ;;  %993 = vmatpush.msk.msra.mxu3 %vm501_vm0, %v403_v0  ;;  %v400_v3 = vld [vmem:[%s1305_s1] sm:$0xff]  ;;  %s953_s28 = sshll.u32 %s1314_s23, 3  ;;  %vm404_vm1 = vcmask 220160  }
   0xe   : > { %956 = vmatpush.msk.msra.mxu0 %vm501_vm0, %v403_v0  ;;  %991 = vmatpush.msk.msra.mxu1 %vm501_vm0, %v403_v0  ;;  %s1116_s5 = scalar_lea.vmem %s1304_s0, %s953_s28  ;;  %v1185_v36 = vld [vmem:[%s1306_s2] ss:$0 sm:$0xff]  ;;  %s1199_s12 = scalar_lea.vmem %s1308_s4, %s953_s28 }
   0xf   : > { %995 = vmatpush.msra.mxu2 %v402_v1  ;;  %996 = vmatpush.msra.mxu3 %v402_v1  ;;  %v384_v4 = vld [vmem:[%s1116_s5 + $0x80] sm:$0xff]  ;;  %v385_v8 = vld [vmem:[%s1116_s5 + $0x88] sm:$0xff]  ;;  %v386_v12 = vld [vmem:[%s1116_s5 + $0x90] sm:$0xff] }
  0x10   : > { %518 = vmatpush.msra.mxu0 %v402_v1  ;;  %994 = vmatpush.msra.mxu1 %v402_v1  ;;  %v392_v5 = vld [vmem:[%s1116_s5 + $0xc0] sm:$0xff]  ;;  %v393_v9 = vld [vmem:[%s1116_s5 + $0xc8] sm:$0xff]  ;;  %v394_v13 = vld [vmem:[%s1116_s5 + $0xd0] sm:$0xff] }
  0x11   : > { %998 = vmatpush.msra.mxu2 %v401_v2  ;;  %999 = vmatpush.msra.mxu3 %v401_v2  ;;  %v368_v6 = vld [vmem:[%s1116_s5] sm:$0xff]  ;;  %v369_v10 = vld [vmem:[%s1116_s5 + $0x8] sm:$0xff]  ;;  %v370_v14 = vld [vmem:[%s1116_s5 + $0x10] sm:$0xff] }
  0x12   : > { %519 = vmatpush.msra.mxu0 %v401_v2  ;;  %997 = vmatpush.msra.mxu1 %v401_v2  ;;  %v376_v7 = vld [vmem:[%s1116_s5 + $0x40] sm:$0xff]  ;;  %v377_v11 = vld [vmem:[%s1116_s5 + $0x48] sm:$0xff]  ;;  %v378_v15 = vld [vmem:[%s1116_s5 + $0x50] sm:$0xff] }
  0x13   : > { %1001 = vmatpush.msra.mxu2 %v400_v3  ;;  %1002 = vmatpush.msra.mxu3 %v400_v3  ;;  %v387_v16 = vld [vmem:[%s1116_s5 + $0x98] sm:$0xff]  ;;  %v388_v20 = vld [vmem:[%s1116_s5 + $0xa0] sm:$0xff]  ;;  %v389_v24 = vld [vmem:[%s1116_s5 + $0xa8] sm:$0xff] }
  0x14   : > { %973 = vmatmul.msk.f32.vlgmr.msra.gmra.mxu2 %vm404_vm1, %v384_v4  ;;  %981 = vmatmul.msk.f32.vlgmr.msra.gmra.mxu3 %vm404_vm1, %v392_v5  ;;  %v395_v17 = vld [vmem:[%s1116_s5 + $0xd8] sm:$0xff]  ;;  %v396_v21 = vld [vmem:[%s1116_s5 + $0xe0] sm:$0xff]  ;;  %v397_v25 = vld [vmem:[%s1116_s5 + $0xe8] sm:$0xff] }
  0x15   : > { %520 = vmatpush.msra.mxu0 %v400_v3  ;;  %1000 = vmatpush.msra.mxu1 %v400_v3  ;;  %v371_v18 = vld [vmem:[%s1116_s5 + $0x18] sm:$0xff]  ;;  %v372_v22 = vld [vmem:[%s1116_s5 + $0x20] sm:$0xff]  ;;  %v373_v26 = vld [vmem:[%s1116_s5 + $0x28] sm:$0xff] }
  0x16   : > { %957 = vmatmul.msk.f32.vlgmr.msra.gmra.mxu0 %vm404_vm1, %v368_v6  ;;  %965 = vmatmul.msk.f32.vlgmr.msra.gmra.mxu1 %vm404_vm1, %v376_v7  ;;  %v379_v19 = vld [vmem:[%s1116_s5 + $0x58] sm:$0xff]  ;;  %v380_v23 = vld [vmem:[%s1116_s5 + $0x60] sm:$0xff]  ;;  %v381_v27 = vld [vmem:[%s1116_s5 + $0x68] sm:$0xff] }
  0x17   : > { %v390_v28 = vld [vmem:[%s1116_s5 + $0xb0] sm:$0xff]  ;;  %v391_v32 = vld [vmem:[%s1116_s5 + $0xb8] sm:$0xff]  ;;  %v1190_v37 = vld [vmem:[%s1307_s3] ss:$0 sm:$0xff] }
  0x18   : > { %v398_v29 = vld [vmem:[%s1116_s5 + $0xf0] sm:$0xff]  ;;  %v399_v33 = vld [vmem:[%s1116_s5 + $0xf8] sm:$0xff] }
  0x19   : > { %v374_v30 = vld [vmem:[%s1116_s5 + $0x30] sm:$0xff]  ;;  %v375_v34 = vld [vmem:[%s1116_s5 + $0x38] sm:$0xff] }
  0x1a   : > { %v382_v31 = vld [vmem:[%s1116_s5 + $0x70] sm:$0xff]  ;;  %v383_v35 = vld [vmem:[%s1116_s5 + $0x78] sm:$0xff] }
  0x1c   : > { %974 = vmatmul.msk.f32.gmra.mxu2 %vm404_vm1, %v385_v8  ;;  %982 = vmatmul.msk.f32.gmra.mxu3 %vm404_vm1, %v393_v9 }
  0x1e   : > { %958 = vmatmul.msk.f32.gmra.mxu0 %vm404_vm1, %v369_v10  ;;  %966 = vmatmul.msk.f32.gmra.mxu1 %vm404_vm1, %v377_v11 }
  0x24   : > { %975 = vmatmul.msk.f32.gmra.mxu2 %vm404_vm1, %v386_v12  ;;  %983 = vmatmul.msk.f32.gmra.mxu3 %vm404_vm1, %v394_v13 }
  0x26   : > { %959 = vmatmul.msk.f32.gmra.mxu0 %vm404_vm1, %v370_v14  ;;  %967 = vmatmul.msk.f32.gmra.mxu1 %vm404_vm1, %v378_v15 }
  0x2c   : > { %976 = vmatmul.msk.f32.gmra.mxu2 %vm404_vm1, %v387_v16  ;;  %984 = vmatmul.msk.f32.gmra.mxu3 %vm404_vm1, %v395_v17 }
  0x2e   : > { %960 = vmatmul.msk.f32.gmra.mxu0 %vm404_vm1, %v371_v18  ;;  %968 = vmatmul.msk.f32.gmra.mxu1 %vm404_vm1, %v379_v19 }
  0x34   : > { %977 = vmatmul.msk.f32.gmra.mxu2 %vm404_vm1, %v388_v20  ;;  %985 = vmatmul.msk.f32.gmra.mxu3 %vm404_vm1, %v396_v21 }
  0x36   : > { %961 = vmatmul.msk.f32.gmra.mxu0 %vm404_vm1, %v372_v22  ;;  %969 = vmatmul.msk.f32.gmra.mxu1 %vm404_vm1, %v380_v23 }
  0x3c   : > { %978 = vmatmul.msk.f32.gmra.mxu2 %vm404_vm1, %v389_v24  ;;  %986 = vmatmul.msk.f32.gmra.mxu3 %vm404_vm1, %v397_v25 }
  0x3e   : > { %962 = vmatmul.msk.f32.gmra.mxu0 %vm404_vm1, %v373_v26  ;;  %970 = vmatmul.msk.f32.gmra.mxu1 %vm404_vm1, %v381_v27 }
  0x44   : > { %979 = vmatmul.msk.f32.gmra.mxu2 %vm404_vm1, %v390_v28  ;;  %987 = vmatmul.msk.f32.gmra.mxu3 %vm404_vm1, %v398_v29 }
  0x46   : > { %963 = vmatmul.msk.f32.gmra.mxu0 %vm404_vm1, %v374_v30  ;;  %971 = vmatmul.msk.f32.gmra.mxu1 %vm404_vm1, %v382_v31 }
  0x4c   : > { %980 = vmatmul.msk.f32.gmra.mxu2 %vm404_vm1, %v391_v32  ;;  %988 = vmatmul.msk.f32.gmra.mxu3 %vm404_vm1, %v399_v33 }
  0x4e   : > { %964 = vmatmul.msk.f32.gmra.mxu0 %vm404_vm1, %v375_v34  ;;  %972 = vmatmul.msk.f32.gmra.mxu1 %vm404_vm1, %v383_v35 }
  0x93   : > { %v522_v38 = vpop.f32.mrf.mxu0  ;;  %v546_v39 = vpop.f32.mrf.mxu1 }
  0x94   : > { %v721_v40 = vmul.f32 %v1185_v36, %v522_v38  ;;  %v729_v41 = vmul.f32 %v1185_v36, %v546_v39 }
  0x96   : > { %v757_v42 = vadd.f32 %v1190_v37, %v721_v40  ;;  %v765_v43 = vadd.f32 %v1190_v37, %v729_v41 }
  0x97   : > { %v570_v44 = vpop.f32.mrf.mxu2  ;;  %v594_v45 = vpop.f32.mrf.mxu3 }
  0x98   : > { %789 = vst [vmem:[%s1199_s12] sm:$0xff] %v757_v42  ;;  %v737_v46 = vmul.f32 %v1185_v36, %v570_v44  ;;  %v745_v47 = vmul.f32 %v1185_v36, %v594_v45 }
  0x99   : > { %797 = vst [vmem:[%s1199_s12 + $0x40] sm:$0xff] %v765_v43 }
  0x9a   : > { %v773_v48 = vadd.f32 %v1190_v37, %v737_v46  ;;  %v781_v49 = vadd.f32 %v1190_v37, %v745_v47 }
  0x9b   : > { %v525_v50 = vpop.f32.mrf.mxu0  ;;  %v549_v51 = vpop.f32.mrf.mxu1 }
  0x9c   : > { %805 = vst [vmem:[%s1199_s12 + $0x80] sm:$0xff] %v773_v48  ;;  %v722_v52 = vmul.f32 %v1185_v36, %v525_v50  ;;  %v730_v53 = vmul.f32 %v1185_v36, %v549_v51 }
  0x9d   : > { %813 = vst [vmem:[%s1199_s12 + $0xc0] sm:$0xff] %v781_v49 }
  0x9e   : > { %v758_v54 = vadd.f32 %v1190_v37, %v722_v52  ;;  %v766_v55 = vadd.f32 %v1190_v37, %v730_v53 }
  0x9f   : > { %v573_v56 = vpop.f32.mrf.mxu2  ;;  %v597_v57 = vpop.f32.mrf.mxu3 }
  0xa0   : > { %790 = vst [vmem:[%s1199_s12 + $0x8] sm:$0xff] %v758_v54  ;;  %v738_v58 = vmul.f32 %v1185_v36, %v573_v56  ;;  %v746_v59 = vmul.f32 %v1185_v36, %v597_v57 }
  0xa1   : > { %798 = vst [vmem:[%s1199_s12 + $0x48] sm:$0xff] %v766_v55 }
  0xa2   : > { %v774_v60 = vadd.f32 %v1190_v37, %v738_v58  ;;  %v782_v61 = vadd.f32 %v1190_v37, %v746_v59 }
  0xa3   : > { %v528_v62 = vpop.f32.mrf.mxu0  ;;  %v552_v63 = vpop.f32.mrf.mxu1 }
  0xa4   : > { %806 = vst [vmem:[%s1199_s12 + $0x88] sm:$0xff] %v774_v60  ;;  %v723_v0 = vmul.f32 %v1185_v36, %v528_v62  ;;  %v731_v1 = vmul.f32 %v1185_v36, %v552_v63 }
  0xa5   : > { %814 = vst [vmem:[%s1199_s12 + $0xc8] sm:$0xff] %v782_v61 }
  0xa6   : > { %v759_v2 = vadd.f32 %v1190_v37, %v723_v0  ;;  %v767_v3 = vadd.f32 %v1190_v37, %v731_v1 }
  0xa7   : > { %v576_v4 = vpop.f32.mrf.mxu2  ;;  %v600_v5 = vpop.f32.mrf.mxu3 }
  0xa8   : > { %791 = vst [vmem:[%s1199_s12 + $0x10] sm:$0xff] %v759_v2  ;;  %v739_v6 = vmul.f32 %v1185_v36, %v576_v4  ;;  %v747_v7 = vmul.f32 %v1185_v36, %v600_v5 }
  0xa9   : > { %799 = vst [vmem:[%s1199_s12 + $0x50] sm:$0xff] %v767_v3 }
  0xaa   : > { %v775_v8 = vadd.f32 %v1190_v37, %v739_v6  ;;  %v783_v9 = vadd.f32 %v1190_v37, %v747_v7 }
  0xab   : > { %v531_v10 = vpop.f32.mrf.mxu0  ;;  %v555_v11 = vpop.f32.mrf.mxu1 }
  0xac   : > { %807 = vst [vmem:[%s1199_s12 + $0x90] sm:$0xff] %v775_v8  ;;  %v724_v12 = vmul.f32 %v1185_v36, %v531_v10  ;;  %v732_v13 = vmul.f32 %v1185_v36, %v555_v11 }
  0xad   : > { %815 = vst [vmem:[%s1199_s12 + $0xd0] sm:$0xff] %v783_v9 }
  0xae   : > { %v760_v14 = vadd.f32 %v1190_v37, %v724_v12  ;;  %v768_v15 = vadd.f32 %v1190_v37, %v732_v13 }
  0xaf   : > { %v579_v16 = vpop.f32.mrf.mxu2  ;;  %v603_v17 = vpop.f32.mrf.mxu3 }
  0xb0   : > { %792 = vst [vmem:[%s1199_s12 + $0x18] sm:$0xff] %v760_v14  ;;  %v740_v18 = vmul.f32 %v1185_v36, %v579_v16  ;;  %v748_v19 = vmul.f32 %v1185_v36, %v603_v17 }
  0xb1   : > { %800 = vst [vmem:[%s1199_s12 + $0x58] sm:$0xff] %v768_v15 }
  0xb2   : > { %v776_v20 = vadd.f32 %v1190_v37, %v740_v18  ;;  %v784_v21 = vadd.f32 %v1190_v37, %v748_v19 }
  0xb3   : > { %v534_v22 = vpop.f32.mrf.mxu0  ;;  %v558_v23 = vpop.f32.mrf.mxu1 }
  0xb4   : > { %808 = vst [vmem:[%s1199_s12 + $0x98] sm:$0xff] %v776_v20  ;;  %v725_v24 = vmul.f32 %v1185_v36, %v534_v22  ;;  %v733_v25 = vmul.f32 %v1185_v36, %v558_v23 }
  0xb5   : > { %816 = vst [vmem:[%s1199_s12 + $0xd8] sm:$0xff] %v784_v21 }
  0xb6   : > { %v761_v26 = vadd.f32 %v1190_v37, %v725_v24  ;;  %v769_v27 = vadd.f32 %v1190_v37, %v733_v25 }
  0xb7   : > { %v582_v28 = vpop.f32.mrf.mxu2  ;;  %v606_v29 = vpop.f32.mrf.mxu3 }
  0xb8   : > { %793 = vst [vmem:[%s1199_s12 + $0x20] sm:$0xff] %v761_v26  ;;  %v741_v30 = vmul.f32 %v1185_v36, %v582_v28  ;;  %v749_v31 = vmul.f32 %v1185_v36, %v606_v29 }
  0xb9   : > { %801 = vst [vmem:[%s1199_s12 + $0x60] sm:$0xff] %v769_v27 }
  0xba   : > { %v777_v32 = vadd.f32 %v1190_v37, %v741_v30  ;;  %v785_v33 = vadd.f32 %v1190_v37, %v749_v31 }
  0xbb   : > { %v537_v34 = vpop.f32.mrf.mxu0  ;;  %v561_v35 = vpop.f32.mrf.mxu1 }
  0xbc   : > { %809 = vst [vmem:[%s1199_s12 + $0xa0] sm:$0xff] %v777_v32  ;;  %v726_v38 = vmul.f32 %v1185_v36, %v537_v34  ;;  %v734_v39 = vmul.f32 %v1185_v36, %v561_v35 }
  0xbd   : > { %817 = vst [vmem:[%s1199_s12 + $0xe0] sm:$0xff] %v785_v33 }
  0xbe   : > { %v762_v40 = vadd.f32 %v1190_v37, %v726_v38  ;;  %v770_v41 = vadd.f32 %v1190_v37, %v734_v39 }
  0xbf   : > { %v585_v42 = vpop.f32.mrf.mxu2  ;;  %v609_v43 = vpop.f32.mrf.mxu3 }
  0xc0   : > { %794 = vst [vmem:[%s1199_s12 + $0x28] sm:$0xff] %v762_v40  ;;  %v742_v44 = vmul.f32 %v1185_v36, %v585_v42  ;;  %v750_v45 = vmul.f32 %v1185_v36, %v609_v43 }
  0xc1   : > { %802 = vst [vmem:[%s1199_s12 + $0x68] sm:$0xff] %v770_v41 }
  0xc2   : > { %v778_v46 = vadd.f32 %v1190_v37, %v742_v44  ;;  %v786_v47 = vadd.f32 %v1190_v37, %v750_v45 }
  0xc3   : > { %v540_v48 = vpop.f32.mrf.mxu0  ;;  %v564_v49 = vpop.f32.mrf.mxu1 }
  0xc4   : > { %810 = vst [vmem:[%s1199_s12 + $0xa8] sm:$0xff] %v778_v46  ;;  %v727_v50 = vmul.f32 %v1185_v36, %v540_v48  ;;  %v735_v51 = vmul.f32 %v1185_v36, %v564_v49 }
  0xc5   : > { %818 = vst [vmem:[%s1199_s12 + $0xe8] sm:$0xff] %v786_v47 }
  0xc6   : > { %v763_v52 = vadd.f32 %v1190_v37, %v727_v50  ;;  %v771_v53 = vadd.f32 %v1190_v37, %v735_v51 }
  0xc7   : > { %v588_v54 = vpop.f32.mrf.mxu2  ;;  %v612_v55 = vpop.f32.mrf.mxu3 }
  0xc8   : > { %795 = vst [vmem:[%s1199_s12 + $0x30] sm:$0xff] %v763_v52  ;;  %v743_v56 = vmul.f32 %v1185_v36, %v588_v54  ;;  %v751_v57 = vmul.f32 %v1185_v36, %v612_v55 }
  0xc9   : > { %803 = vst [vmem:[%s1199_s12 + $0x70] sm:$0xff] %v771_v53 }
  0xca   : > { %v779_v58 = vadd.f32 %v1190_v37, %v743_v56  ;;  %v787_v59 = vadd.f32 %v1190_v37, %v751_v57 }
  0xcb   : > { %v543_v60 = vpop.f32.mrf.mxu0  ;;  %v567_v61 = vpop.f32.mrf.mxu1 }
  0xcc   : > { %811 = vst [vmem:[%s1199_s12 + $0xb0] sm:$0xff] %v779_v58  ;;  %v728_v62 = vmul.f32 %v1185_v36, %v543_v60  ;;  %v736_v63 = vmul.f32 %v1185_v36, %v567_v61 }
  0xcd   : > { %819 = vst [vmem:[%s1199_s12 + $0xf0] sm:$0xff] %v787_v59 }
  0xce   : > { %v764_v0 = vadd.f32 %v1190_v37, %v728_v62  ;;  %v772_v1 = vadd.f32 %v1190_v37, %v736_v63 }
  0xcf   : > { %v591_v2 = vpop.f32.mrf.mxu2  ;;  %v615_v3 = vpop.f32.mrf.mxu3 }
  0xd0   : > { %796 = vst [vmem:[%s1199_s12 + $0x38] sm:$0xff] %v764_v0  ;;  %v744_v4 = vmul.f32 %v1185_v36, %v591_v2  ;;  %v752_v5 = vmul.f32 %v1185_v36, %v615_v3 }
  0xd1   : > { %804 = vst [vmem:[%s1199_s12 + $0x78] sm:$0xff] %v772_v1 }
  0xd2   : > { %v780_v6 = vadd.f32 %v1190_v37, %v744_v4  ;;  %v788_v7 = vadd.f32 %v1190_v37, %v752_v5 }
  0xd4   : > { %812 = vst [vmem:[%s1199_s12 + $0xb8] sm:$0xff] %v780_v6 }
  0xd5   : > { %820 = vst [vmem:[%s1199_s12 + $0xf8] sm:$0xff] %v788_v7 }
  0xd6 PF: > { %s14_s17 = sadd.s32 1, %s1051_s17   ;;  %s1309_s15 = smov %s1047_s16 }
  0xd7   : > { %p11_p5 = scmp.ge.s32.totalorder %s14_s17, 10   ;;  %s1310_s16 = smov %s1312_s18 }
  0xd9   :  { %13 = sbr.rel (!%p11_p5) target bundleno = 2 (0x2), region = 83 }

// kernel: _lambda_.20
= control target key start
LH: loop header
LB: loop body
LE: loop exit
PB: predicated region body
PF: predicated region fallthrough
CT: control target
= control target key end

     0   :  { %s1070_s15 = smov 0   ;;  %s1072_s16 = smov 0   ;;  %s1290_s0 = inlined_call_operand.vmem [shape: f32[2048,12], index: 0, kind: input, shape index: {}]   ;;  %s1291_s1 = inlined_call_operand.vmem [shape: f32[12,128], index: 1, kind: input, shape index: {}]   ;;  %s1292_s2 = inlined_call_operand.vmem [shape: f32[1,128], index: 2, kind: input, shape index: {}]   ;;  %s1293_s3 = inlined_call_operand.vmem [shape: f32[1,128], index: 3, kind: input, shape index: {}]   ;;  %s1294_s4 = inlined_call_operand.vmem [shape: f32[2048,128], index: 4, kind: output, shape index: {}]  }
   0x1   :  { %s1074_s17 = smov 0  }
   0x2 LB: > { %s33_s18 = sadd.s32 1, %s1039_s16  ;;  %p949_p0 = scmp.ge.s32.totalorder %s1043_s17, 1  ;;  %s1043_s17 = sphi %s1074_s17, %s14_s17   ;;  %s1039_s16 = sphi %s1072_s16, %s1296_s16   ;;  %s1035_s15 = sphi %s1070_s15, %s1295_s15  }
   0x3   : > { %p35_p1 = scmp.ge.s32.totalorder %s33_s18, 8  ;;  %p221_p2 = scmp.lt.s32.totalorder %s1043_s17, 9 }
   0x5   : > { %s1298_s18 = smov (%p35_p1, %s33_s18), 0  ;;  %p222_p3 = pnand %p949_p0, %p221_p2 }
   0x6   : > { %s950_s23 = sshll.u32 (!%p222_p3), %s1035_s15, 5 }
   0x7   : > { %225 = sbr.rel (%p222_p3) target bundleno = 211 (0xd3), region = 36  ;;  %p268_p4 = scmp.lt.s32.totalorder (!%p222_p3), %s950_s23, 255 }
   0xc   : > { %v401_v0 = vld [vmem:[%s1291_s1 + $0x8] sm:$0xf]  ;;  %vm499_vm0 = vcmask 1043456   ;;  %v400_v1 = vld [vmem:[%s1291_s1] sm:$0xff]  ;;  %s1300_s23 = smov (!%p268_p4, %s950_s23), 255  ;;  %vm402_vm1 = vcmask 97280  }
   0xd   : > { %990 = vmatpush.msk.msra.mxu2 %vm499_vm0, %v401_v0  ;;  %991 = vmatpush.msk.msra.mxu3 %vm499_vm0, %v401_v0  ;;  %s951_s24 = sshll.u32 %s1300_s23, 3  ;;  %v1171_v34 = vld [vmem:[%s1292_s2] ss:$0 sm:$0xff] }
   0xe   : > { %954 = vmatpush.msk.msra.mxu0 %vm499_vm0, %v401_v0  ;;  %989 = vmatpush.msk.msra.mxu1 %vm499_vm0, %v401_v0  ;;  %s1102_s27 = scalar_lea.vmem %s1290_s0, %s951_s24  ;;  %v1176_v35 = vld [vmem:[%s1293_s3] ss:$0 sm:$0xff]  ;;  %s1185_s8 = scalar_lea.vmem %s1294_s4, %s951_s24 }
   0xf   : > { %993 = vmatpush.msra.mxu2 %v400_v1  ;;  %994 = vmatpush.msra.mxu3 %v400_v1  ;;  %v384_v2 = vld [vmem:[%s1102_s27 + $0x80] sm:$0xff]  ;;  %v385_v6 = vld [vmem:[%s1102_s27 + $0x88] sm:$0xff]  ;;  %v386_v10 = vld [vmem:[%s1102_s27 + $0x90] sm:$0xff] }
  0x10   : > { %518 = vmatpush.msra.mxu0 %v400_v1  ;;  %992 = vmatpush.msra.mxu1 %v400_v1  ;;  %v392_v3 = vld [vmem:[%s1102_s27 + $0xc0] sm:$0xff]  ;;  %v393_v7 = vld [vmem:[%s1102_s27 + $0xc8] sm:$0xff]  ;;  %v394_v11 = vld [vmem:[%s1102_s27 + $0xd0] sm:$0xff] }
  0x11   : > { %v368_v4 = vld [vmem:[%s1102_s27] sm:$0xff]  ;;  %971 = vmatmul.msk.f32.vlgmr.msra.gmra.mxu2 %vm402_vm1, %v384_v2  ;;  %979 = vmatmul.msk.f32.vlgmr.msra.gmra.mxu3 %vm402_vm1, %v392_v3  ;;  %v369_v8 = vld [vmem:[%s1102_s27 + $0x8] sm:$0xff]  ;;  %v370_v12 = vld [vmem:[%s1102_s27 + $0x10] sm:$0xff] }
  0x12   : > { %v376_v5 = vld [vmem:[%s1102_s27 + $0x40] sm:$0xff]  ;;  %955 = vmatmul.msk.f32.vlgmr.msra.gmra.mxu0 %vm402_vm1, %v368_v4  ;;  %v377_v9 = vld [vmem:[%s1102_s27 + $0x48] sm:$0xff]  ;;  %v378_v13 = vld [vmem:[%s1102_s27 + $0x50] sm:$0xff] }
  0x13   : > { %963 = vmatmul.msk.f32.vlgmr.msra.gmra.mxu1 %vm402_vm1, %v376_v5  ;;  %v387_v14 = vld [vmem:[%s1102_s27 + $0x98] sm:$0xff]  ;;  %v388_v18 = vld [vmem:[%s1102_s27 + $0xa0] sm:$0xff]  ;;  %v389_v22 = vld [vmem:[%s1102_s27 + $0xa8] sm:$0xff] }
  0x14   : > { %v395_v15 = vld [vmem:[%s1102_s27 + $0xd8] sm:$0xff]  ;;  %v396_v19 = vld [vmem:[%s1102_s27 + $0xe0] sm:$0xff]  ;;  %v397_v23 = vld [vmem:[%s1102_s27 + $0xe8] sm:$0xff] }
  0x15   : > { %v371_v16 = vld [vmem:[%s1102_s27 + $0x18] sm:$0xff]  ;;  %v372_v20 = vld [vmem:[%s1102_s27 + $0x20] sm:$0xff]  ;;  %v373_v24 = vld [vmem:[%s1102_s27 + $0x28] sm:$0xff] }
  0x16   : > { %v379_v17 = vld [vmem:[%s1102_s27 + $0x58] sm:$0xff]  ;;  %v380_v21 = vld [vmem:[%s1102_s27 + $0x60] sm:$0xff]  ;;  %v381_v25 = vld [vmem:[%s1102_s27 + $0x68] sm:$0xff] }
  0x17   : > { %v390_v26 = vld [vmem:[%s1102_s27 + $0xb0] sm:$0xff]  ;;  %v391_v30 = vld [vmem:[%s1102_s27 + $0xb8] sm:$0xff] }
  0x18   : > { %v398_v27 = vld [vmem:[%s1102_s27 + $0xf0] sm:$0xff]  ;;  %v399_v31 = vld [vmem:[%s1102_s27 + $0xf8] sm:$0xff] }
  0x19   : > { %972 = vmatmul.msk.f32.gmra.mxu2 %vm402_vm1, %v385_v6  ;;  %980 = vmatmul.msk.f32.gmra.mxu3 %vm402_vm1, %v393_v7  ;;  %v374_v28 = vld [vmem:[%s1102_s27 + $0x30] sm:$0xff]  ;;  %v375_v32 = vld [vmem:[%s1102_s27 + $0x38] sm:$0xff] }
  0x1a   : > { %956 = vmatmul.msk.f32.gmra.mxu0 %vm402_vm1, %v369_v8  ;;  %v382_v29 = vld [vmem:[%s1102_s27 + $0x70] sm:$0xff]  ;;  %v383_v33 = vld [vmem:[%s1102_s27 + $0x78] sm:$0xff] }
  0x1b   : > { %964 = vmatmul.msk.f32.gmra.mxu1 %vm402_vm1, %v377_v9 }
  0x21   : > { %973 = vmatmul.msk.f32.gmra.mxu2 %vm402_vm1, %v386_v10  ;;  %981 = vmatmul.msk.f32.gmra.mxu3 %vm402_vm1, %v394_v11 }
  0x22   : > { %957 = vmatmul.msk.f32.gmra.mxu0 %vm402_vm1, %v370_v12 }
  0x23   : > { %965 = vmatmul.msk.f32.gmra.mxu1 %vm402_vm1, %v378_v13 }
  0x29   : > { %974 = vmatmul.msk.f32.gmra.mxu2 %vm402_vm1, %v387_v14  ;;  %982 = vmatmul.msk.f32.gmra.mxu3 %vm402_vm1, %v395_v15 }
  0x2a   : > { %958 = vmatmul.msk.f32.gmra.mxu0 %vm402_vm1, %v371_v16 }
  0x2b   : > { %966 = vmatmul.msk.f32.gmra.mxu1 %vm402_vm1, %v379_v17 }
  0x31   : > { %975 = vmatmul.msk.f32.gmra.mxu2 %vm402_vm1, %v388_v18  ;;  %983 = vmatmul.msk.f32.gmra.mxu3 %vm402_vm1, %v396_v19 }
  0x32   : > { %959 = vmatmul.msk.f32.gmra.mxu0 %vm402_vm1, %v372_v20 }
  0x33   : > { %967 = vmatmul.msk.f32.gmra.mxu1 %vm402_vm1, %v380_v21 }
  0x39   : > { %976 = vmatmul.msk.f32.gmra.mxu2 %vm402_vm1, %v389_v22  ;;  %984 = vmatmul.msk.f32.gmra.mxu3 %vm402_vm1, %v397_v23 }
  0x3a   : > { %960 = vmatmul.msk.f32.gmra.mxu0 %vm402_vm1, %v373_v24 }
  0x3b   : > { %968 = vmatmul.msk.f32.gmra.mxu1 %vm402_vm1, %v381_v25 }
  0x41   : > { %977 = vmatmul.msk.f32.gmra.mxu2 %vm402_vm1, %v390_v26  ;;  %985 = vmatmul.msk.f32.gmra.mxu3 %vm402_vm1, %v398_v27 }
  0x42   : > { %961 = vmatmul.msk.f32.gmra.mxu0 %vm402_vm1, %v374_v28 }
  0x43   : > { %969 = vmatmul.msk.f32.gmra.mxu1 %vm402_vm1, %v382_v29 }
  0x49   : > { %978 = vmatmul.msk.f32.gmra.mxu2 %vm402_vm1, %v391_v30  ;;  %986 = vmatmul.msk.f32.gmra.mxu3 %vm402_vm1, %v399_v31 }
  0x4a   : > { %962 = vmatmul.msk.f32.gmra.mxu0 %vm402_vm1, %v375_v32 }
  0x4b   : > { %970 = vmatmul.msk.f32.gmra.mxu1 %vm402_vm1, %v383_v33 }
  0x8f   : > { %v520_v36 = vpop.f32.mrf.mxu0 }
  0x90   : > { %v544_v37 = vpop.f32.mrf.mxu1  ;;  %v719_v38 = vmul.f32 %v1171_v34, %v520_v36 }
  0x91   : > { %v727_v39 = vmul.f32 %v1171_v34, %v544_v37 }
  0x92   : > { %v755_v40 = vadd.f32 %v1176_v35, %v719_v38 }
  0x93   : > { %v763_v41 = vadd.f32 %v1176_v35, %v727_v39 }
  0x94   : > { %787 = vst [vmem:[%s1185_s8] sm:$0xff] %v755_v40  ;;  %v568_v42 = vpop.f32.mrf.mxu2  ;;  %v592_v43 = vpop.f32.mrf.mxu3 }
  0x95   : > { %795 = vst [vmem:[%s1185_s8 + $0x40] sm:$0xff] %v763_v41  ;;  %v735_v44 = vmul.f32 %v1171_v34, %v568_v42  ;;  %v743_v45 = vmul.f32 %v1171_v34, %v592_v43 }
  0x97   : > { %v771_v46 = vadd.f32 %v1176_v35, %v735_v44  ;;  %v779_v47 = vadd.f32 %v1176_v35, %v743_v45  ;;  %v523_v48 = vpop.f32.mrf.mxu0 }
  0x98   : > { %v547_v49 = vpop.f32.mrf.mxu1  ;;  %v720_v50 = vmul.f32 %v1171_v34, %v523_v48 }
  0x99   : > { %v728_v51 = vmul.f32 %v1171_v34, %v547_v49  ;;  %803 = vst [vmem:[%s1185_s8 + $0x80] sm:$0xff] %v771_v46 }
  0x9a   : > { %811 = vst [vmem:[%s1185_s8 + $0xc0] sm:$0xff] %v779_v47  ;;  %v756_v52 = vadd.f32 %v1176_v35, %v720_v50 }
  0x9b   : > { %v764_v53 = vadd.f32 %v1176_v35, %v728_v51 }
  0x9c   : > { %788 = vst [vmem:[%s1185_s8 + $0x8] sm:$0xff] %v756_v52  ;;  %v571_v54 = vpop.f32.mrf.mxu2  ;;  %v595_v55 = vpop.f32.mrf.mxu3 }
  0x9d   : > { %796 = vst [vmem:[%s1185_s8 + $0x48] sm:$0xff] %v764_v53  ;;  %v736_v56 = vmul.f32 %v1171_v34, %v571_v54  ;;  %v744_v57 = vmul.f32 %v1171_v34, %v595_v55 }
  0x9f   : > { %v772_v58 = vadd.f32 %v1176_v35, %v736_v56  ;;  %v780_v59 = vadd.f32 %v1176_v35, %v744_v57  ;;  %v526_v60 = vpop.f32.mrf.mxu0 }
  0xa0   : > { %v550_v61 = vpop.f32.mrf.mxu1  ;;  %v721_v62 = vmul.f32 %v1171_v34, %v526_v60 }
  0xa1   : > { %v729_v63 = vmul.f32 %v1171_v34, %v550_v61  ;;  %804 = vst [vmem:[%s1185_s8 + $0x88] sm:$0xff] %v772_v58 }
  0xa2   : > { %812 = vst [vmem:[%s1185_s8 + $0xc8] sm:$0xff] %v780_v59  ;;  %v757_v0 = vadd.f32 %v1176_v35, %v721_v62 }
  0xa3   : > { %v765_v1 = vadd.f32 %v1176_v35, %v729_v63 }
  0xa4   : > { %789 = vst [vmem:[%s1185_s8 + $0x10] sm:$0xff] %v757_v0  ;;  %v574_v2 = vpop.f32.mrf.mxu2  ;;  %v598_v3 = vpop.f32.mrf.mxu3 }
  0xa5   : > { %797 = vst [vmem:[%s1185_s8 + $0x50] sm:$0xff] %v765_v1  ;;  %v737_v4 = vmul.f32 %v1171_v34, %v574_v2  ;;  %v745_v5 = vmul.f32 %v1171_v34, %v598_v3 }
  0xa7   : > { %v773_v6 = vadd.f32 %v1176_v35, %v737_v4  ;;  %v781_v7 = vadd.f32 %v1176_v35, %v745_v5  ;;  %v529_v8 = vpop.f32.mrf.mxu0 }
  0xa8   : > { %v553_v9 = vpop.f32.mrf.mxu1  ;;  %v722_v10 = vmul.f32 %v1171_v34, %v529_v8 }
  0xa9   : > { %v730_v11 = vmul.f32 %v1171_v34, %v553_v9  ;;  %805 = vst [vmem:[%s1185_s8 + $0x90] sm:$0xff] %v773_v6 }
  0xaa   : > { %813 = vst [vmem:[%s1185_s8 + $0xd0] sm:$0xff] %v781_v7  ;;  %v758_v12 = vadd.f32 %v1176_v35, %v722_v10 }
  0xab   : > { %v766_v13 = vadd.f32 %v1176_v35, %v730_v11 }
  0xac   : > { %790 = vst [vmem:[%s1185_s8 + $0x18] sm:$0xff] %v758_v12  ;;  %v577_v14 = vpop.f32.mrf.mxu2  ;;  %v601_v15 = vpop.f32.mrf.mxu3 }
  0xad   : > { %798 = vst [vmem:[%s1185_s8 + $0x58] sm:$0xff] %v766_v13  ;;  %v738_v16 = vmul.f32 %v1171_v34, %v577_v14  ;;  %v746_v17 = vmul.f32 %v1171_v34, %v601_v15 }
  0xaf   : > { %v774_v18 = vadd.f32 %v1176_v35, %v738_v16  ;;  %v782_v19 = vadd.f32 %v1176_v35, %v746_v17  ;;  %v532_v20 = vpop.f32.mrf.mxu0 }
  0xb0   : > { %v556_v21 = vpop.f32.mrf.mxu1  ;;  %v723_v22 = vmul.f32 %v1171_v34, %v532_v20 }
  0xb1   : > { %v731_v23 = vmul.f32 %v1171_v34, %v556_v21  ;;  %806 = vst [vmem:[%s1185_s8 + $0x98] sm:$0xff] %v774_v18 }
  0xb2   : > { %814 = vst [vmem:[%s1185_s8 + $0xd8] sm:$0xff] %v782_v19  ;;  %v759_v24 = vadd.f32 %v1176_v35, %v723_v22 }
  0xb3   : > { %v767_v25 = vadd.f32 %v1176_v35, %v731_v23 }
  0xb4   : > { %791 = vst [vmem:[%s1185_s8 + $0x20] sm:$0xff] %v759_v24  ;;  %v580_v26 = vpop.f32.mrf.mxu2  ;;  %v604_v27 = vpop.f32.mrf.mxu3 }
  0xb5   : > { %799 = vst [vmem:[%s1185_s8 + $0x60] sm:$0xff] %v767_v25  ;;  %v739_v28 = vmul.f32 %v1171_v34, %v580_v26  ;;  %v747_v29 = vmul.f32 %v1171_v34, %v604_v27 }
  0xb7   : > { %v775_v30 = vadd.f32 %v1176_v35, %v739_v28  ;;  %v783_v31 = vadd.f32 %v1176_v35, %v747_v29  ;;  %v535_v32 = vpop.f32.mrf.mxu0 }
  0xb8   : > { %v559_v33 = vpop.f32.mrf.mxu1  ;;  %v724_v36 = vmul.f32 %v1171_v34, %v535_v32 }
  0xb9   : > { %v732_v37 = vmul.f32 %v1171_v34, %v559_v33  ;;  %807 = vst [vmem:[%s1185_s8 + $0xa0] sm:$0xff] %v775_v30 }
  0xba   : > { %815 = vst [vmem:[%s1185_s8 + $0xe0] sm:$0xff] %v783_v31  ;;  %v760_v38 = vadd.f32 %v1176_v35, %v724_v36 }
  0xbb   : > { %v768_v39 = vadd.f32 %v1176_v35, %v732_v37 }
  0xbc   : > { %792 = vst [vmem:[%s1185_s8 + $0x28] sm:$0xff] %v760_v38  ;;  %v583_v40 = vpop.f32.mrf.mxu2  ;;  %v607_v41 = vpop.f32.mrf.mxu3 }
  0xbd   : > { %800 = vst [vmem:[%s1185_s8 + $0x68] sm:$0xff] %v768_v39  ;;  %v740_v42 = vmul.f32 %v1171_v34, %v583_v40  ;;  %v748_v43 = vmul.f32 %v1171_v34, %v607_v41 }
  0xbf   : > { %v776_v44 = vadd.f32 %v1176_v35, %v740_v42  ;;  %v784_v45 = vadd.f32 %v1176_v35, %v748_v43  ;;  %v538_v46 = vpop.f32.mrf.mxu0 }
  0xc0   : > { %v562_v47 = vpop.f32.mrf.mxu1  ;;  %v725_v48 = vmul.f32 %v1171_v34, %v538_v46 }
  0xc1   : > { %v733_v49 = vmul.f32 %v1171_v34, %v562_v47  ;;  %808 = vst [vmem:[%s1185_s8 + $0xa8] sm:$0xff] %v776_v44 }
  0xc2   : > { %816 = vst [vmem:[%s1185_s8 + $0xe8] sm:$0xff] %v784_v45  ;;  %v761_v50 = vadd.f32 %v1176_v35, %v725_v48 }
  0xc3   : > { %v769_v51 = vadd.f32 %v1176_v35, %v733_v49 }
  0xc4   : > { %793 = vst [vmem:[%s1185_s8 + $0x30] sm:$0xff] %v761_v50  ;;  %v586_v52 = vpop.f32.mrf.mxu2  ;;  %v610_v53 = vpop.f32.mrf.mxu3 }
  0xc5   : > { %801 = vst [vmem:[%s1185_s8 + $0x70] sm:$0xff] %v769_v51  ;;  %v741_v54 = vmul.f32 %v1171_v34, %v586_v52  ;;  %v749_v55 = vmul.f32 %v1171_v34, %v610_v53 }
  0xc7   : > { %v777_v56 = vadd.f32 %v1176_v35, %v741_v54  ;;  %v785_v57 = vadd.f32 %v1176_v35, %v749_v55  ;;  %v541_v58 = vpop.f32.mrf.mxu0 }
  0xc8   : > { %v565_v59 = vpop.f32.mrf.mxu1  ;;  %v726_v60 = vmul.f32 %v1171_v34, %v541_v58 }
  0xc9   : > { %v734_v61 = vmul.f32 %v1171_v34, %v565_v59  ;;  %809 = vst [vmem:[%s1185_s8 + $0xb0] sm:$0xff] %v777_v56 }
  0xca   : > { %817 = vst [vmem:[%s1185_s8 + $0xf0] sm:$0xff] %v785_v57  ;;  %v762_v62 = vadd.f32 %v1176_v35, %v726_v60 }
  0xcb   : > { %v770_v63 = vadd.f32 %v1176_v35, %v734_v61 }
  0xcc   : > { %794 = vst [vmem:[%s1185_s8 + $0x38] sm:$0xff] %v762_v62  ;;  %v589_v0 = vpop.f32.mrf.mxu2  ;;  %v613_v1 = vpop.f32.mrf.mxu3 }
  0xcd   : > { %802 = vst [vmem:[%s1185_s8 + $0x78] sm:$0xff] %v770_v63  ;;  %v742_v2 = vmul.f32 %v1171_v34, %v589_v0  ;;  %v750_v3 = vmul.f32 %v1171_v34, %v613_v1 }
  0xcf   : > { %v778_v4 = vadd.f32 %v1176_v35, %v742_v2  ;;  %v786_v5 = vadd.f32 %v1176_v35, %v750_v3 }
  0xd1   : > { %810 = vst [vmem:[%s1185_s8 + $0xb8] sm:$0xff] %v778_v4 }
  0xd2   : > { %818 = vst [vmem:[%s1185_s8 + $0xf8] sm:$0xff] %v786_v5 }
  0xd3 PF: > { %s14_s17 = sadd.s32 1, %s1043_s17   ;;  %s1295_s15 = smov %s1039_s16 }
  0xd4   : > { %p11_p5 = scmp.ge.s32.totalorder %s14_s17, 10   ;;  %s1296_s16 = smov %s1298_s18 }
  0xd6   :  { %13 = sbr.rel (!%p11_p5) target bundleno = 2 (0x2), region = 83 }

// kernel: _lambda_.19
= control target key start
LH: loop header
LB: loop body
LE: loop exit
PB: predicated region body
PF: predicated region fallthrough
CT: control target
= control target key end

     0   :  { %s1082_s15 = smov 0   ;;  %s1084_s16 = smov 0   ;;  %s1311_s0 = inlined_call_operand.vmem [shape: f32[2048,36], index: 0, kind: input, shape index: {}]   ;;  %s1312_s1 = inlined_call_operand.vmem [shape: f32[36,128], index: 1, kind: input, shape index: {}]   ;;  %s1313_s2 = inlined_call_operand.vmem [shape: f32[1,128], index: 2, kind: input, shape index: {}]   ;;  %s1314_s3 = inlined_call_operand.vmem [shape: f32[1,128], index: 3, kind: input, shape index: {}]   ;;  %s1315_s4 = inlined_call_operand.vmem [shape: f32[2048,128], index: 4, kind: output, shape index: {}]  }
   0x1   :  { %s1086_s17 = smov 0  }
   0x2 LB: > { %s33_s18 = sadd.s32 1, %s1051_s16  ;;  %p952_p0 = scmp.ge.s32.totalorder %s1055_s17, 1  ;;  %s1055_s17 = sphi %s1086_s17, %s14_s17   ;;  %s1051_s16 = sphi %s1084_s16, %s1317_s16   ;;  %s1047_s15 = sphi %s1082_s15, %s1316_s15  }
   0x3   : > { %p35_p1 = scmp.ge.s32.totalorder %s33_s18, 8  ;;  %p221_p2 = scmp.lt.s32.totalorder %s1055_s17, 9 }
   0x5   : > { %s1319_s18 = smov (%p35_p1, %s33_s18), 0  ;;  %p222_p3 = pnand %p952_p0, %p221_p2 }
   0x6   : > { %s953_s23 = sshll.u32 (!%p222_p3), %s1047_s15, 5 }
   0x7   : > { %225 = sbr.rel (%p222_p3) target bundleno = 216 (0xd8), region = 36  ;;  %p268_p4 = scmp.lt.s32.totalorder (!%p222_p3), %s953_s23, 255 }
   0xc   : > { %v404_v0 = vld [vmem:[%s1312_s1 + $0x20] sm:$0xf]  ;;  %vm502_vm0 = vcmask 1043456   ;;  %v403_v1 = vld [vmem:[%s1312_s1 + $0x18] sm:$0xff]  ;;  %v402_v2 = vld [vmem:[%s1312_s1 + $0x10] sm:$0xff]  ;;  %s1321_s23 = smov (!%p268_p4, %s953_s23), 255 }
   0xd   : > { %993 = vmatpush.msk.msra.mxu2 %vm502_vm0, %v404_v0  ;;  %994 = vmatpush.msk.msra.mxu3 %vm502_vm0, %v404_v0  ;;  %v401_v3 = vld [vmem:[%s1312_s1 + $0x8] sm:$0xff]  ;;  %s954_s28 = sshll.u32 %s1321_s23, 3  ;;  %v400_v4 = vld [vmem:[%s1312_s1] sm:$0xff]  ;;  %vm405_vm1 = vcmask 293888  }
   0xe   : > { %957 = vmatpush.msk.msra.mxu0 %vm502_vm0, %v404_v0  ;;  %992 = vmatpush.msk.msra.mxu1 %vm502_vm0, %v404_v0  ;;  %s1123_s7 = scalar_lea.vmem %s1311_s0, %s954_s28  ;;  %v1192_v37 = vld [vmem:[%s1313_s2] ss:$0 sm:$0xff]  ;;  %s1206_s14 = scalar_lea.vmem %s1315_s4, %s954_s28 }
   0xf   : > { %996 = vmatpush.msra.mxu2 %v403_v1  ;;  %997 = vmatpush.msra.mxu3 %v403_v1  ;;  %v384_v5 = vld [vmem:[%s1123_s7 + $0x80] sm:$0xff]  ;;  %v385_v9 = vld [vmem:[%s1123_s7 + $0x88] sm:$0xff]  ;;  %v386_v13 = vld [vmem:[%s1123_s7 + $0x90] sm:$0xff] }
  0x10   : > { %518 = vmatpush.msra.mxu0 %v403_v1  ;;  %995 = vmatpush.msra.mxu1 %v403_v1  ;;  %v392_v6 = vld [vmem:[%s1123_s7 + $0xc0] sm:$0xff]  ;;  %v393_v10 = vld [vmem:[%s1123_s7 + $0xc8] sm:$0xff]  ;;  %v394_v14 = vld [vmem:[%s1123_s7 + $0xd0] sm:$0xff] }
  0x11   : > { %999 = vmatpush.msra.mxu2 %v402_v2  ;;  %1000 = vmatpush.msra.mxu3 %v402_v2  ;;  %v368_v7 = vld [vmem:[%s1123_s7] sm:$0xff]  ;;  %v369_v11 = vld [vmem:[%s1123_s7 + $0x8] sm:$0xff]  ;;  %v370_v15 = vld [vmem:[%s1123_s7 + $0x10] sm:$0xff] }
  0x12   : > { %519 = vmatpush.msra.mxu0 %v402_v2  ;;  %998 = vmatpush.msra.mxu1 %v402_v2  ;;  %v376_v8 = vld [vmem:[%s1123_s7 + $0x40] sm:$0xff]  ;;  %v377_v12 = vld [vmem:[%s1123_s7 + $0x48] sm:$0xff]  ;;  %v378_v16 = vld [vmem:[%s1123_s7 + $0x50] sm:$0xff] }
  0x13   : > { %1002 = vmatpush.msra.mxu2 %v401_v3  ;;  %1003 = vmatpush.msra.mxu3 %v401_v3  ;;  %v387_v17 = vld [vmem:[%s1123_s7 + $0x98] sm:$0xff]  ;;  %v388_v21 = vld [vmem:[%s1123_s7 + $0xa0] sm:$0xff]  ;;  %v389_v25 = vld [vmem:[%s1123_s7 + $0xa8] sm:$0xff] }
  0x14   : > { %520 = vmatpush.msra.mxu0 %v401_v3  ;;  %1001 = vmatpush.msra.mxu1 %v401_v3  ;;  %v395_v18 = vld [vmem:[%s1123_s7 + $0xd8] sm:$0xff]  ;;  %v396_v22 = vld [vmem:[%s1123_s7 + $0xe0] sm:$0xff]  ;;  %v397_v26 = vld [vmem:[%s1123_s7 + $0xe8] sm:$0xff] }
  0x15   : > { %1005 = vmatpush.msra.mxu2 %v400_v4  ;;  %1006 = vmatpush.msra.mxu3 %v400_v4  ;;  %v371_v19 = vld [vmem:[%s1123_s7 + $0x18] sm:$0xff]  ;;  %v372_v23 = vld [vmem:[%s1123_s7 + $0x20] sm:$0xff]  ;;  %v373_v27 = vld [vmem:[%s1123_s7 + $0x28] sm:$0xff] }
  0x16   : > { %974 = vmatmul.msk.f32.vlgmr.msra.gmra.mxu2 %vm405_vm1, %v384_v5  ;;  %982 = vmatmul.msk.f32.vlgmr.msra.gmra.mxu3 %vm405_vm1, %v392_v6  ;;  %v379_v20 = vld [vmem:[%s1123_s7 + $0x58] sm:$0xff]  ;;  %v380_v24 = vld [vmem:[%s1123_s7 + $0x60] sm:$0xff]  ;;  %v381_v28 = vld [vmem:[%s1123_s7 + $0x68] sm:$0xff] }
  0x17   : > { %521 = vmatpush.msra.mxu0 %v400_v4  ;;  %1004 = vmatpush.msra.mxu1 %v400_v4  ;;  %v390_v29 = vld [vmem:[%s1123_s7 + $0xb0] sm:$0xff]  ;;  %v391_v33 = vld [vmem:[%s1123_s7 + $0xb8] sm:$0xff]  ;;  %v1197_v38 = vld [vmem:[%s1314_s3] ss:$0 sm:$0xff] }
  0x18   : > { %958 = vmatmul.msk.f32.vlgmr.msra.gmra.mxu0 %vm405_vm1, %v368_v7  ;;  %966 = vmatmul.msk.f32.vlgmr.msra.gmra.mxu1 %vm405_vm1, %v376_v8  ;;  %v398_v30 = vld [vmem:[%s1123_s7 + $0xf0] sm:$0xff]  ;;  %v399_v34 = vld [vmem:[%s1123_s7 + $0xf8] sm:$0xff] }
  0x19   : > { %v374_v31 = vld [vmem:[%s1123_s7 + $0x30] sm:$0xff]  ;;  %v375_v35 = vld [vmem:[%s1123_s7 + $0x38] sm:$0xff] }
  0x1a   : > { %v382_v32 = vld [vmem:[%s1123_s7 + $0x70] sm:$0xff]  ;;  %v383_v36 = vld [vmem:[%s1123_s7 + $0x78] sm:$0xff] }
  0x1e   : > { %975 = vmatmul.msk.f32.gmra.mxu2 %vm405_vm1, %v385_v9  ;;  %983 = vmatmul.msk.f32.gmra.mxu3 %vm405_vm1, %v393_v10 }
  0x20   : > { %959 = vmatmul.msk.f32.gmra.mxu0 %vm405_vm1, %v369_v11  ;;  %967 = vmatmul.msk.f32.gmra.mxu1 %vm405_vm1, %v377_v12 }
  0x26   : > { %976 = vmatmul.msk.f32.gmra.mxu2 %vm405_vm1, %v386_v13  ;;  %984 = vmatmul.msk.f32.gmra.mxu3 %vm405_vm1, %v394_v14 }
  0x28   : > { %960 = vmatmul.msk.f32.gmra.mxu0 %vm405_vm1, %v370_v15  ;;  %968 = vmatmul.msk.f32.gmra.mxu1 %vm405_vm1, %v378_v16 }
  0x2e   : > { %977 = vmatmul.msk.f32.gmra.mxu2 %vm405_vm1, %v387_v17  ;;  %985 = vmatmul.msk.f32.gmra.mxu3 %vm405_vm1, %v395_v18 }
  0x30   : > { %961 = vmatmul.msk.f32.gmra.mxu0 %vm405_vm1, %v371_v19  ;;  %969 = vmatmul.msk.f32.gmra.mxu1 %vm405_vm1, %v379_v20 }
  0x36   : > { %978 = vmatmul.msk.f32.gmra.mxu2 %vm405_vm1, %v388_v21  ;;  %986 = vmatmul.msk.f32.gmra.mxu3 %vm405_vm1, %v396_v22 }
  0x38   : > { %962 = vmatmul.msk.f32.gmra.mxu0 %vm405_vm1, %v372_v23  ;;  %970 = vmatmul.msk.f32.gmra.mxu1 %vm405_vm1, %v380_v24 }
  0x3e   : > { %979 = vmatmul.msk.f32.gmra.mxu2 %vm405_vm1, %v389_v25  ;;  %987 = vmatmul.msk.f32.gmra.mxu3 %vm405_vm1, %v397_v26 }
  0x40   : > { %963 = vmatmul.msk.f32.gmra.mxu0 %vm405_vm1, %v373_v27  ;;  %971 = vmatmul.msk.f32.gmra.mxu1 %vm405_vm1, %v381_v28 }
  0x46   : > { %980 = vmatmul.msk.f32.gmra.mxu2 %vm405_vm1, %v390_v29  ;;  %988 = vmatmul.msk.f32.gmra.mxu3 %vm405_vm1, %v398_v30 }
  0x48   : > { %964 = vmatmul.msk.f32.gmra.mxu0 %vm405_vm1, %v374_v31  ;;  %972 = vmatmul.msk.f32.gmra.mxu1 %vm405_vm1, %v382_v32 }
  0x4e   : > { %981 = vmatmul.msk.f32.gmra.mxu2 %vm405_vm1, %v391_v33  ;;  %989 = vmatmul.msk.f32.gmra.mxu3 %vm405_vm1, %v399_v34 }
  0x50   : > { %965 = vmatmul.msk.f32.gmra.mxu0 %vm405_vm1, %v375_v35  ;;  %973 = vmatmul.msk.f32.gmra.mxu1 %vm405_vm1, %v383_v36 }
  0x95   : > { %v523_v39 = vpop.f32.mrf.mxu0  ;;  %v547_v40 = vpop.f32.mrf.mxu1 }
  0x96   : > { %v722_v41 = vmul.f32 %v1192_v37, %v523_v39  ;;  %v730_v42 = vmul.f32 %v1192_v37, %v547_v40 }
  0x98   : > { %v758_v43 = vadd.f32 %v1197_v38, %v722_v41  ;;  %v766_v44 = vadd.f32 %v1197_v38, %v730_v42 }
  0x99   : > { %v571_v45 = vpop.f32.mrf.mxu2  ;;  %v595_v46 = vpop.f32.mrf.mxu3 }
  0x9a   : > { %790 = vst [vmem:[%s1206_s14] sm:$0xff] %v758_v43  ;;  %v738_v47 = vmul.f32 %v1192_v37, %v571_v45  ;;  %v746_v48 = vmul.f32 %v1192_v37, %v595_v46 }
  0x9b   : > { %798 = vst [vmem:[%s1206_s14 + $0x40] sm:$0xff] %v766_v44 }
  0x9c   : > { %v774_v49 = vadd.f32 %v1197_v38, %v738_v47  ;;  %v782_v50 = vadd.f32 %v1197_v38, %v746_v48 }
  0x9d   : > { %v526_v51 = vpop.f32.mrf.mxu0  ;;  %v550_v52 = vpop.f32.mrf.mxu1 }
  0x9e   : > { %806 = vst [vmem:[%s1206_s14 + $0x80] sm:$0xff] %v774_v49  ;;  %v723_v53 = vmul.f32 %v1192_v37, %v526_v51  ;;  %v731_v54 = vmul.f32 %v1192_v37, %v550_v52 }
  0x9f   : > { %814 = vst [vmem:[%s1206_s14 + $0xc0] sm:$0xff] %v782_v50 }
  0xa0   : > { %v759_v55 = vadd.f32 %v1197_v38, %v723_v53  ;;  %v767_v56 = vadd.f32 %v1197_v38, %v731_v54 }
  0xa1   : > { %v574_v57 = vpop.f32.mrf.mxu2  ;;  %v598_v58 = vpop.f32.mrf.mxu3 }
  0xa2   : > { %791 = vst [vmem:[%s1206_s14 + $0x8] sm:$0xff] %v759_v55  ;;  %v739_v59 = vmul.f32 %v1192_v37, %v574_v57  ;;  %v747_v60 = vmul.f32 %v1192_v37, %v598_v58 }
  0xa3   : > { %799 = vst [vmem:[%s1206_s14 + $0x48] sm:$0xff] %v767_v56 }
  0xa4   : > { %v775_v61 = vadd.f32 %v1197_v38, %v739_v59  ;;  %v783_v62 = vadd.f32 %v1197_v38, %v747_v60 }
  0xa5   : > { %v529_v63 = vpop.f32.mrf.mxu0  ;;  %v553_v0 = vpop.f32.mrf.mxu1 }
  0xa6   : > { %807 = vst [vmem:[%s1206_s14 + $0x88] sm:$0xff] %v775_v61  ;;  %v724_v1 = vmul.f32 %v1192_v37, %v529_v63  ;;  %v732_v2 = vmul.f32 %v1192_v37, %v553_v0 }
  0xa7   : > { %815 = vst [vmem:[%s1206_s14 + $0xc8] sm:$0xff] %v783_v62 }
  0xa8   : > { %v760_v3 = vadd.f32 %v1197_v38, %v724_v1  ;;  %v768_v4 = vadd.f32 %v1197_v38, %v732_v2 }
  0xa9   : > { %v577_v5 = vpop.f32.mrf.mxu2  ;;  %v601_v6 = vpop.f32.mrf.mxu3 }
  0xaa   : > { %792 = vst [vmem:[%s1206_s14 + $0x10] sm:$0xff] %v760_v3  ;;  %v740_v7 = vmul.f32 %v1192_v37, %v577_v5  ;;  %v748_v8 = vmul.f32 %v1192_v37, %v601_v6 }
  0xab   : > { %800 = vst [vmem:[%s1206_s14 + $0x50] sm:$0xff] %v768_v4 }
  0xac   : > { %v776_v9 = vadd.f32 %v1197_v38, %v740_v7  ;;  %v784_v10 = vadd.f32 %v1197_v38, %v748_v8 }
  0xad   : > { %v532_v11 = vpop.f32.mrf.mxu0  ;;  %v556_v12 = vpop.f32.mrf.mxu1 }
  0xae   : > { %808 = vst [vmem:[%s1206_s14 + $0x90] sm:$0xff] %v776_v9  ;;  %v725_v13 = vmul.f32 %v1192_v37, %v532_v11  ;;  %v733_v14 = vmul.f32 %v1192_v37, %v556_v12 }
  0xaf   : > { %816 = vst [vmem:[%s1206_s14 + $0xd0] sm:$0xff] %v784_v10 }
  0xb0   : > { %v761_v15 = vadd.f32 %v1197_v38, %v725_v13  ;;  %v769_v16 = vadd.f32 %v1197_v38, %v733_v14 }
  0xb1   : > { %v580_v17 = vpop.f32.mrf.mxu2  ;;  %v604_v18 = vpop.f32.mrf.mxu3 }
  0xb2   : > { %793 = vst [vmem:[%s1206_s14 + $0x18] sm:$0xff] %v761_v15  ;;  %v741_v19 = vmul.f32 %v1192_v37, %v580_v17  ;;  %v749_v20 = vmul.f32 %v1192_v37, %v604_v18 }
  0xb3   : > { %801 = vst [vmem:[%s1206_s14 + $0x58] sm:$0xff] %v769_v16 }
  0xb4   : > { %v777_v21 = vadd.f32 %v1197_v38, %v741_v19  ;;  %v785_v22 = vadd.f32 %v1197_v38, %v749_v20 }
  0xb5   : > { %v535_v23 = vpop.f32.mrf.mxu0  ;;  %v559_v24 = vpop.f32.mrf.mxu1 }
  0xb6   : > { %809 = vst [vmem:[%s1206_s14 + $0x98] sm:$0xff] %v777_v21  ;;  %v726_v25 = vmul.f32 %v1192_v37, %v535_v23  ;;  %v734_v26 = vmul.f32 %v1192_v37, %v559_v24 }
  0xb7   : > { %817 = vst [vmem:[%s1206_s14 + $0xd8] sm:$0xff] %v785_v22 }
  0xb8   : > { %v762_v27 = vadd.f32 %v1197_v38, %v726_v25  ;;  %v770_v28 = vadd.f32 %v1197_v38, %v734_v26 }
  0xb9   : > { %v583_v29 = vpop.f32.mrf.mxu2  ;;  %v607_v30 = vpop.f32.mrf.mxu3 }
  0xba   : > { %794 = vst [vmem:[%s1206_s14 + $0x20] sm:$0xff] %v762_v27  ;;  %v742_v31 = vmul.f32 %v1192_v37, %v583_v29  ;;  %v750_v32 = vmul.f32 %v1192_v37, %v607_v30 }
  0xbb   : > { %802 = vst [vmem:[%s1206_s14 + $0x60] sm:$0xff] %v770_v28 }
  0xbc   : > { %v778_v33 = vadd.f32 %v1197_v38, %v742_v31  ;;  %v786_v34 = vadd.f32 %v1197_v38, %v750_v32 }
  0xbd   : > { %v538_v35 = vpop.f32.mrf.mxu0  ;;  %v562_v36 = vpop.f32.mrf.mxu1 }
  0xbe   : > { %810 = vst [vmem:[%s1206_s14 + $0xa0] sm:$0xff] %v778_v33  ;;  %v727_v39 = vmul.f32 %v1192_v37, %v538_v35  ;;  %v735_v40 = vmul.f32 %v1192_v37, %v562_v36 }
  0xbf   : > { %818 = vst [vmem:[%s1206_s14 + $0xe0] sm:$0xff] %v786_v34 }
  0xc0   : > { %v763_v41 = vadd.f32 %v1197_v38, %v727_v39  ;;  %v771_v42 = vadd.f32 %v1197_v38, %v735_v40 }
  0xc1   : > { %v586_v43 = vpop.f32.mrf.mxu2  ;;  %v610_v44 = vpop.f32.mrf.mxu3 }
  0xc2   : > { %795 = vst [vmem:[%s1206_s14 + $0x28] sm:$0xff] %v763_v41  ;;  %v743_v45 = vmul.f32 %v1192_v37, %v586_v43  ;;  %v751_v46 = vmul.f32 %v1192_v37, %v610_v44 }
  0xc3   : > { %803 = vst [vmem:[%s1206_s14 + $0x68] sm:$0xff] %v771_v42 }
  0xc4   : > { %v779_v47 = vadd.f32 %v1197_v38, %v743_v45  ;;  %v787_v48 = vadd.f32 %v1197_v38, %v751_v46 }
  0xc5   : > { %v541_v49 = vpop.f32.mrf.mxu0  ;;  %v565_v50 = vpop.f32.mrf.mxu1 }
  0xc6   : > { %811 = vst [vmem:[%s1206_s14 + $0xa8] sm:$0xff] %v779_v47  ;;  %v728_v51 = vmul.f32 %v1192_v37, %v541_v49  ;;  %v736_v52 = vmul.f32 %v1192_v37, %v565_v50 }
  0xc7   : > { %819 = vst [vmem:[%s1206_s14 + $0xe8] sm:$0xff] %v787_v48 }
  0xc8   : > { %v764_v53 = vadd.f32 %v1197_v38, %v728_v51  ;;  %v772_v54 = vadd.f32 %v1197_v38, %v736_v52 }
  0xc9   : > { %v589_v55 = vpop.f32.mrf.mxu2  ;;  %v613_v56 = vpop.f32.mrf.mxu3 }
  0xca   : > { %796 = vst [vmem:[%s1206_s14 + $0x30] sm:$0xff] %v764_v53  ;;  %v744_v57 = vmul.f32 %v1192_v37, %v589_v55  ;;  %v752_v58 = vmul.f32 %v1192_v37, %v613_v56 }
  0xcb   : > { %804 = vst [vmem:[%s1206_s14 + $0x70] sm:$0xff] %v772_v54 }
  0xcc   : > { %v780_v59 = vadd.f32 %v1197_v38, %v744_v57  ;;  %v788_v60 = vadd.f32 %v1197_v38, %v752_v58 }
  0xcd   : > { %v544_v61 = vpop.f32.mrf.mxu0  ;;  %v568_v62 = vpop.f32.mrf.mxu1 }
  0xce   : > { %812 = vst [vmem:[%s1206_s14 + $0xb0] sm:$0xff] %v780_v59  ;;  %v729_v63 = vmul.f32 %v1192_v37, %v544_v61  ;;  %v737_v0 = vmul.f32 %v1192_v37, %v568_v62 }
  0xcf   : > { %820 = vst [vmem:[%s1206_s14 + $0xf0] sm:$0xff] %v788_v60 }
  0xd0   : > { %v765_v1 = vadd.f32 %v1197_v38, %v729_v63  ;;  %v773_v2 = vadd.f32 %v1197_v38, %v737_v0 }
  0xd1   : > { %v592_v3 = vpop.f32.mrf.mxu2  ;;  %v616_v4 = vpop.f32.mrf.mxu3 }
  0xd2   : > { %797 = vst [vmem:[%s1206_s14 + $0x38] sm:$0xff] %v765_v1  ;;  %v745_v5 = vmul.f32 %v1192_v37, %v592_v3  ;;  %v753_v6 = vmul.f32 %v1192_v37, %v616_v4 }
  0xd3   : > { %805 = vst [vmem:[%s1206_s14 + $0x78] sm:$0xff] %v773_v2 }
  0xd4   : > { %v781_v7 = vadd.f32 %v1197_v38, %v745_v5  ;;  %v789_v8 = vadd.f32 %v1197_v38, %v753_v6 }
  0xd6   : > { %813 = vst [vmem:[%s1206_s14 + $0xb8] sm:$0xff] %v781_v7 }
  0xd7   : > { %821 = vst [vmem:[%s1206_s14 + $0xf8] sm:$0xff] %v789_v8 }
  0xd8 PF: > { %s14_s17 = sadd.s32 1, %s1055_s17   ;;  %s1316_s15 = smov %s1051_s16 }
  0xd9   : > { %p11_p5 = scmp.ge.s32.totalorder %s14_s17, 10   ;;  %s1317_s16 = smov %s1319_s18 }
  0xdb   :  { %13 = sbr.rel (!%p11_p5) target bundleno = 2 (0x2), region = 83 }

// kernel: _lambda_.21
= control target key start
LH: loop header
LB: loop body
LE: loop exit
PB: predicated region body
PF: predicated region fallthrough
CT: control target
= control target key end

     0   :  { %s1265_s15 = smov 0   ;;  %s1267_s16 = smov 0   ;;  %s1592_s0 = inlined_call_operand.vmem [shape: f32[512,200], index: 0, kind: input, shape index: {}]   ;;  %s1593_s1 = inlined_call_operand.vmem [shape: f32[200,128], index: 1, kind: input, shape index: {}]   ;;  %s1594_s2 = inlined_call_operand.vmem [shape: f32[1,128], index: 2, kind: input, shape index: {}]   ;;  %s1595_s3 = inlined_call_operand.vmem [shape: f32[1,128], index: 3, kind: input, shape index: {}]   ;;  %s1596_s4 = inlined_call_operand.vmem [shape: f32[512,128], index: 4, kind: output, shape index: {}]  }
   0x1   :  { %s1269_s17 = smov 0  }
   0x2 LB: > { %s33_s18 = sadd.s32 1, %s1234_s16  ;;  %p1124_p0 = scmp.ge.s32.totalorder %s1238_s17, 1  ;;  %s1238_s17 = sphi %s1269_s17, %s14_s17   ;;  %s1234_s16 = sphi %s1267_s16, %s1598_s16   ;;  %s1230_s15 = sphi %s1265_s15, %s1597_s15  }
   0x3   : > { %p35_p1 = scmp.ge.s32.totalorder %s33_s18, 2  ;;  %p224_p2 = scmp.lt.s32.totalorder %s1238_s17, 3 }
   0x5   : > { %s1600_s18 = smov (%p35_p1, %s33_s18), 0  ;;  %p225_p3 = pnand %p1124_p0, %p224_p2 }
   0x6   : > { %s1125_s25 = sshll.u32 (!%p225_p3), %s1230_s15, 5 }
   0x7   : > { %228 = sbr.rel (%p225_p3) target bundleno = 311 (0x137), region = 36  ;;  %p274_p4 = scmp.lt.s32.totalorder (!%p225_p3), %s1125_s25, 63 }
   0xc   : > { %v455_v0 = vld [vmem:[%s1593_s1 + $0x78] sm:$0xff]  ;;  %v464_v1 = vld [vmem:[%s1593_s1 + $0xc0] sm:$0xff]  ;;  %v454_v2 = vld [vmem:[%s1593_s1 + $0x70] sm:$0xff]  ;;  %s1602_s25 = smov (!%p274_p4, %s1125_s25), 63  ;;  %vm465_vm0 = vcmask 588800  }
   0xd   : > { %1165 = vmatpush.msra.mxu2 %v455_v0  ;;  %682 = vmatpush.msra.mxu1 %v464_v1  ;;  %v463_v3 = vld [vmem:[%s1593_s1 + $0xb8] sm:$0xff]  ;;  %v453_v4 = vld [vmem:[%s1593_s1 + $0x68] sm:$0xff]  ;;  %v462_v5 = vld [vmem:[%s1593_s1 + $0xb0] sm:$0xff]  ;;  %s1164_s21 = sshll.u32 %s1602_s25, 4  ;;  %s1129_s6 = sshll.u32 %s1602_s25, 3 }
   0xe   : > { %562 = vmatpush.msra.mxu0 %v455_v0  ;;  %1181 = vmatpush.msra.mxu3 %v464_v1  ;;  %v452_v6 = vld [vmem:[%s1593_s1 + $0x60] sm:$0xff]  ;;  %v461_v7 = vld [vmem:[%s1593_s1 + $0xa8] sm:$0xff]  ;;  %v451_v8 = vld [vmem:[%s1593_s1 + $0x58] sm:$0xff]  ;;  %s1340_s7 = scalar_lea.vmem %s1592_s0, %s1164_s21  ;;  %s1480_s11 = scalar_lea.vmem %s1596_s4, %s1129_s6 }
   0xf   : > { %1166 = vmatpush.msra.mxu2 %v454_v2  ;;  %683 = vmatpush.msra.mxu1 %v463_v3  ;;  %v460_v9 = vld [vmem:[%s1593_s1 + $0xa0] sm:$0xff]  ;;  %v450_v10 = vld [vmem:[%s1593_s1 + $0x50] sm:$0xff]  ;;  %v459_v11 = vld [vmem:[%s1593_s1 + $0x98] sm:$0xff] }
  0x10   : > { %563 = vmatpush.msra.mxu0 %v454_v2  ;;  %1182 = vmatpush.msra.mxu3 %v463_v3  ;;  %v449_v12 = vld [vmem:[%s1593_s1 + $0x48] sm:$0xff]  ;;  %v458_v13 = vld [vmem:[%s1593_s1 + $0x90] sm:$0xff]  ;;  %v448_v14 = vld [vmem:[%s1593_s1 + $0x40] sm:$0xff] }
  0x11   : > { %1167 = vmatpush.msra.mxu2 %v453_v4  ;;  %684 = vmatpush.msra.mxu1 %v462_v5  ;;  %v457_v15 = vld [vmem:[%s1593_s1 + $0x88] sm:$0xff]  ;;  %v447_v16 = vld [vmem:[%s1593_s1 + $0x38] sm:$0xff]  ;;  %v456_v17 = vld [vmem:[%s1593_s1 + $0x80] sm:$0xff] }
  0x12   : > { %564 = vmatpush.msra.mxu0 %v453_v4  ;;  %1183 = vmatpush.msra.mxu3 %v462_v5  ;;  %v377_v18 = vld [vmem:[%s1340_s7 + $0x8] sm:$0xff]  ;;  %v446_v19 = vld [vmem:[%s1593_s1 + $0x30] sm:$0xff]  ;;  %v411_v20 = vld [vmem:[%s1340_s7 + $0x118] sm:$0xff] }
  0x13   : > { %1168 = vmatpush.msra.mxu2 %v452_v6  ;;  %685 = vmatpush.msra.mxu1 %v461_v7  ;;  %v445_v21 = vld [vmem:[%s1593_s1 + $0x28] sm:$0xff]  ;;  %v444_v22 = vld [vmem:[%s1593_s1 + $0x20] sm:$0xff]  ;;  %v443_v23 = vld [vmem:[%s1593_s1 + $0x18] sm:$0xff] }
  0x14   : > { %565 = vmatpush.msra.mxu0 %v452_v6  ;;  %1184 = vmatpush.msra.mxu3 %v461_v7  ;;  %v379_v24 = vld [vmem:[%s1340_s7 + $0x18] sm:$0xff]  ;;  %v442_v25 = vld [vmem:[%s1593_s1 + $0x10] sm:$0xff]  ;;  %v413_v26 = vld [vmem:[%s1340_s7 + $0x128] sm:$0xff] }
  0x15   : > { %1169 = vmatpush.msra.mxu2 %v451_v8  ;;  %686 = vmatpush.msra.mxu1 %v460_v9  ;;  %v441_v27 = vld [vmem:[%s1593_s1 + $0x8] sm:$0xff]  ;;  %v440_v28 = vld [vmem:[%s1593_s1] sm:$0xff]  ;;  %v406_v29 = vld [vmem:[%s1340_s7 + $0xf0] sm:$0xff] }
  0x16   : > { %566 = vmatpush.msra.mxu0 %v451_v8  ;;  %1185 = vmatpush.msra.mxu3 %v460_v9  ;;  %v376_v30 = vld [vmem:[%s1340_s7] sm:$0xff]  ;;  %v381_v31 = vld [vmem:[%s1340_s7 + $0x28] sm:$0xff]  ;;  %v415_v32 = vld [vmem:[%s1340_s7 + $0x138] sm:$0xff] }
  0x17   : > { %1170 = vmatpush.msra.mxu2 %v450_v10  ;;  %687 = vmatpush.msra.mxu1 %v459_v11  ;;  %v408_v33 = vld [vmem:[%s1340_s7 + $0x100] sm:$0xff]  ;;  %v378_v34 = vld [vmem:[%s1340_s7 + $0x10] sm:$0xff]  ;;  %v383_v35 = vld [vmem:[%s1340_s7 + $0x38] sm:$0xff] }
  0x18   : > { %567 = vmatpush.msra.mxu0 %v450_v10  ;;  %1186 = vmatpush.msra.mxu3 %v459_v11  ;;  %v417_v36 = vld [vmem:[%s1340_s7 + $0x148] sm:$0xff]  ;;  %v410_v37 = vld [vmem:[%s1340_s7 + $0x110] sm:$0xff]  ;;  %v380_v38 = vld [vmem:[%s1340_s7 + $0x20] sm:$0xff] }
  0x19   : > { %1171 = vmatpush.msra.mxu2 %v449_v12  ;;  %688 = vmatpush.msra.mxu1 %v458_v13  ;;  %v385_v39 = vld [vmem:[%s1340_s7 + $0x48] sm:$0xff]  ;;  %v419_v40 = vld [vmem:[%s1340_s7 + $0x158] sm:$0xff]  ;;  %v412_v41 = vld [vmem:[%s1340_s7 + $0x120] sm:$0xff] }
  0x1a   : > { %568 = vmatpush.msra.mxu0 %v449_v12  ;;  %1187 = vmatpush.msra.mxu3 %v458_v13  ;;  %v382_v42 = vld [vmem:[%s1340_s7 + $0x30] sm:$0xff]  ;;  %v387_v43 = vld [vmem:[%s1340_s7 + $0x58] sm:$0xff]  ;;  %v421_v44 = vld [vmem:[%s1340_s7 + $0x168] sm:$0xff] }
  0x1b   : > { %1172 = vmatpush.msra.mxu2 %v448_v14  ;;  %689 = vmatpush.msra.mxu1 %v457_v15  ;;  %v414_v45 = vld [vmem:[%s1340_s7 + $0x130] sm:$0xff]  ;;  %v384_v46 = vld [vmem:[%s1340_s7 + $0x40] sm:$0xff]  ;;  %v389_v47 = vld [vmem:[%s1340_s7 + $0x68] sm:$0xff] }
  0x1c   : > { %569 = vmatpush.msra.mxu0 %v448_v14  ;;  %1188 = vmatpush.msra.mxu3 %v457_v15  ;;  %v423_v48 = vld [vmem:[%s1340_s7 + $0x178] sm:$0xff]  ;;  %v416_v49 = vld [vmem:[%s1340_s7 + $0x140] sm:$0xff]  ;;  %v386_v50 = vld [vmem:[%s1340_s7 + $0x50] sm:$0xff] }
  0x1d   : > { %1173 = vmatpush.msra.mxu2 %v447_v16  ;;  %690 = vmatpush.msra.mxu1 %v456_v17  ;;  %v391_v51 = vld [vmem:[%s1340_s7 + $0x78] sm:$0xff]  ;;  %v425_v52 = vld [vmem:[%s1340_s7 + $0x188] sm:$0xff]  ;;  %v418_v53 = vld [vmem:[%s1340_s7 + $0x150] sm:$0xff] }
  0x1e   : > { %1130 = vmatmul.msk.f32.vlgmr.msra.gmra.mxu1 %vm465_vm0, %v377_v18  ;;  %570 = vmatpush.msra.mxu0 %v447_v16  ;;  %v388_v54 = vld [vmem:[%s1340_s7 + $0x60] sm:$0xff]  ;;  %v393_v55 = vld [vmem:[%s1340_s7 + $0x88] sm:$0xff]  ;;  %v427_v56 = vld [vmem:[%s1340_s7 + $0x198] sm:$0xff] }
  0x1f   : > { %1174 = vmatpush.msra.mxu2 %v446_v19  ;;  %1189 = vmatpush.msra.mxu3 %v456_v17  ;;  %v420_v57 = vld [vmem:[%s1340_s7 + $0x160] sm:$0xff]  ;;  %v390_v58 = vld [vmem:[%s1340_s7 + $0x70] sm:$0xff]  ;;  %v395_v59 = vld [vmem:[%s1340_s7 + $0x98] sm:$0xff] }
  0x20   : > { %571 = vmatpush.msra.mxu0 %v446_v19  ;;  %1147 = vmatmul.msk.f32.vlgmr.msra.gmra.mxu3 %vm465_vm0, %v411_v20  ;;  %v429_v60 = vld [vmem:[%s1340_s7 + $0x1a8] sm:$0xff]  ;;  %v422_v61 = vld [vmem:[%s1340_s7 + $0x170] sm:$0xff]  ;;  %v392_v62 = vld [vmem:[%s1340_s7 + $0x80] sm:$0xff] }
  0x21   : > { %1175 = vmatpush.msra.mxu2 %v445_v21  ;;  %v397_v63 = vld [vmem:[%s1340_s7 + $0xa8] sm:$0xff]  ;;  %v431_v0 = vld [vmem:[%s1340_s7 + $0x1b8] sm:$0xff]  ;;  %v424_v1 = vld [vmem:[%s1340_s7 + $0x180] sm:$0xff] }
  0x22   : > { %572 = vmatpush.msra.mxu0 %v445_v21  ;;  %v394_v2 = vld [vmem:[%s1340_s7 + $0x90] sm:$0xff]  ;;  %v399_v3 = vld [vmem:[%s1340_s7 + $0xb8] sm:$0xff]  ;;  %v433_v4 = vld [vmem:[%s1340_s7 + $0x1c8] sm:$0xff] }
  0x23   : > { %1176 = vmatpush.msra.mxu2 %v444_v22  ;;  %v426_v5 = vld [vmem:[%s1340_s7 + $0x190] sm:$0xff]  ;;  %v396_v6 = vld [vmem:[%s1340_s7 + $0xa0] sm:$0xff]  ;;  %v401_v7 = vld [vmem:[%s1340_s7 + $0xc8] sm:$0xff] }
  0x24   : > { %573 = vmatpush.msra.mxu0 %v444_v22  ;;  %v435_v8 = vld [vmem:[%s1340_s7 + $0x1d8] sm:$0xff]  ;;  %v428_v9 = vld [vmem:[%s1340_s7 + $0x1a0] sm:$0xff]  ;;  %v398_v10 = vld [vmem:[%s1340_s7 + $0xb0] sm:$0xff] }
  0x25   : > { %1177 = vmatpush.msra.mxu2 %v443_v23  ;;  %v403_v11 = vld [vmem:[%s1340_s7 + $0xd8] sm:$0xff]  ;;  %v437_v12 = vld [vmem:[%s1340_s7 + $0x1e8] sm:$0xff]  ;;  %v430_v13 = vld [vmem:[%s1340_s7 + $0x1b0] sm:$0xff] }
  0x26   : > { %1131 = vmatmul.msk.f32.gmra.mxu1 %vm465_vm0, %v379_v24  ;;  %574 = vmatpush.msra.mxu0 %v443_v23  ;;  %v400_v14 = vld [vmem:[%s1340_s7 + $0xc0] sm:$0xff]  ;;  %v405_v15 = vld [vmem:[%s1340_s7 + $0xe8] sm:$0xff]  ;;  %v439_v16 = vld [vmem:[%s1340_s7 + $0x1f8] sm:$0xff] }
  0x27   : > { %1178 = vmatpush.msra.mxu2 %v442_v25  ;;  %v432_v17 = vld [vmem:[%s1340_s7 + $0x1c0] sm:$0xff]  ;;  %v402_v18 = vld [vmem:[%s1340_s7 + $0xd0] sm:$0xff]  ;;  %v407_v19 = vld [vmem:[%s1340_s7 + $0xf8] sm:$0xff] }
  0x28   : > { %575 = vmatpush.msra.mxu0 %v442_v25  ;;  %1148 = vmatmul.msk.f32.gmra.mxu3 %vm465_vm0, %v413_v26  ;;  %v434_v20 = vld [vmem:[%s1340_s7 + $0x1d0] sm:$0xff]  ;;  %v404_v21 = vld [vmem:[%s1340_s7 + $0xe0] sm:$0xff]  ;;  %v409_v23 = vld [vmem:[%s1340_s7 + $0x108] sm:$0xff] }
  0x29   : > { %1179 = vmatpush.msra.mxu2 %v441_v27  ;;  %v436_v24 = vld [vmem:[%s1340_s7 + $0x1e0] sm:$0xff] }
  0x2a   : > { %576 = vmatpush.msra.mxu0 %v441_v27  ;;  %v438_v27 = vld [vmem:[%s1340_s7 + $0x1f0] sm:$0xff] }
  0x2b   : > { %1180 = vmatpush.msra.mxu2 %v440_v28 }
  0x2c   : > { %623 = vmatmul.f32.vlgmr.msra.gmra.mxu2 %v406_v29  ;;  %577 = vmatpush.msra.mxu0 %v440_v28  ;;  %v1468_v28 = vld [vmem:[%s1594_s2] ss:$0 sm:$0xff] }
  0x2d   : > { %578 = vmatmul.f32.vlgmr.msra.gmra.mxu0 %v376_v30 }
  0x2e   : > { %1132 = vmatmul.msk.f32.gmra.mxu1 %vm465_vm0, %v381_v31 }
  0x30   : > { %1149 = vmatmul.msk.f32.gmra.mxu3 %vm465_vm0, %v415_v32  ;;  %v1474_v32 = vld [vmem:[%s1595_s3] ss:$0 sm:$0xff] }
  0x34   : > { %626 = vmatmul.f32.gmra.mxu2 %v408_v33 }
  0x35   : > { %581 = vmatmul.f32.gmra.mxu0 %v378_v34 }
  0x36   : > { %1133 = vmatmul.msk.f32.gmra.mxu1 %vm465_vm0, %v383_v35 }
  0x38   : > { %1150 = vmatmul.msk.f32.gmra.mxu3 %vm465_vm0, %v417_v36 }
  0x3c   : > { %629 = vmatmul.f32.gmra.mxu2 %v410_v37 }
  0x3d   : > { %584 = vmatmul.f32.gmra.mxu0 %v380_v38 }
  0x3e   : > { %1134 = vmatmul.msk.f32.gmra.mxu1 %vm465_vm0, %v385_v39 }
  0x40   : > { %1151 = vmatmul.msk.f32.gmra.mxu3 %vm465_vm0, %v419_v40 }
  0x44   : > { %632 = vmatmul.f32.gmra.mxu2 %v412_v41 }
  0x45   : > { %587 = vmatmul.f32.gmra.mxu0 %v382_v42 }
  0x46   : > { %1135 = vmatmul.msk.f32.gmra.mxu1 %vm465_vm0, %v387_v43 }
  0x48   : > { %1152 = vmatmul.msk.f32.gmra.mxu3 %vm465_vm0, %v421_v44 }
  0x4c   : > { %635 = vmatmul.f32.gmra.mxu2 %v414_v45 }
  0x4d   : > { %590 = vmatmul.f32.gmra.mxu0 %v384_v46 }
  0x4e   : > { %1136 = vmatmul.msk.f32.gmra.mxu1 %vm465_vm0, %v389_v47 }
  0x50   : > { %1153 = vmatmul.msk.f32.gmra.mxu3 %vm465_vm0, %v423_v48 }
  0x54   : > { %638 = vmatmul.f32.gmra.mxu2 %v416_v49 }
  0x55   : > { %593 = vmatmul.f32.gmra.mxu0 %v386_v50 }
  0x56   : > { %1137 = vmatmul.msk.f32.gmra.mxu1 %vm465_vm0, %v391_v51 }
  0x58   : > { %1154 = vmatmul.msk.f32.gmra.mxu3 %vm465_vm0, %v425_v52 }
  0x5c   : > { %641 = vmatmul.f32.gmra.mxu2 %v418_v53 }
  0x5d   : > { %596 = vmatmul.f32.gmra.mxu0 %v388_v54 }
  0x5e   : > { %1138 = vmatmul.msk.f32.gmra.mxu1 %vm465_vm0, %v393_v55 }
  0x60   : > { %1155 = vmatmul.msk.f32.gmra.mxu3 %vm465_vm0, %v427_v56 }
  0x64   : > { %644 = vmatmul.f32.gmra.mxu2 %v420_v57 }
  0x65   : > { %599 = vmatmul.f32.gmra.mxu0 %v390_v58 }
  0x66   : > { %1139 = vmatmul.msk.f32.gmra.mxu1 %vm465_vm0, %v395_v59 }
  0x68   : > { %1156 = vmatmul.msk.f32.gmra.mxu3 %vm465_vm0, %v429_v60 }
  0x6c   : > { %647 = vmatmul.f32.gmra.mxu2 %v422_v61 }
  0x6d   : > { %602 = vmatmul.f32.gmra.mxu0 %v392_v62 }
  0x6e   : > { %1140 = vmatmul.msk.f32.gmra.mxu1 %vm465_vm0, %v397_v63 }
  0x70   : > { %1157 = vmatmul.msk.f32.gmra.mxu3 %vm465_vm0, %v431_v0 }
  0x74   : > { %650 = vmatmul.f32.gmra.mxu2 %v424_v1 }
  0x75   : > { %605 = vmatmul.f32.gmra.mxu0 %v394_v2 }
  0x76   : > { %1141 = vmatmul.msk.f32.gmra.mxu1 %vm465_vm0, %v399_v3 }
  0x78   : > { %1158 = vmatmul.msk.f32.gmra.mxu3 %vm465_vm0, %v433_v4 }
  0x7c   : > { %653 = vmatmul.f32.gmra.mxu2 %v426_v5 }
  0x7d   : > { %608 = vmatmul.f32.gmra.mxu0 %v396_v6 }
  0x7e   : > { %1142 = vmatmul.msk.f32.gmra.mxu1 %vm465_vm0, %v401_v7 }
  0x80   : > { %1159 = vmatmul.msk.f32.gmra.mxu3 %vm465_vm0, %v435_v8 }
  0x84   : > { %656 = vmatmul.f32.gmra.mxu2 %v428_v9 }
  0x85   : > { %611 = vmatmul.f32.gmra.mxu0 %v398_v10 }
  0x86   : > { %1143 = vmatmul.msk.f32.gmra.mxu1 %vm465_vm0, %v403_v11 }
  0x88   : > { %1160 = vmatmul.msk.f32.gmra.mxu3 %vm465_vm0, %v437_v12 }
  0x8c   : > { %659 = vmatmul.f32.gmra.mxu2 %v430_v13 }
  0x8d   : > { %614 = vmatmul.f32.gmra.mxu0 %v400_v14 }
  0x8e   : > { %1144 = vmatmul.msk.f32.gmra.mxu1 %vm465_vm0, %v405_v15 }
  0x90   : > { %1161 = vmatmul.msk.f32.gmra.mxu3 %vm465_vm0, %v439_v16 }
  0x94   : > { %662 = vmatmul.f32.gmra.mxu2 %v432_v17 }
  0x95   : > { %617 = vmatmul.f32.gmra.mxu0 %v402_v18 }
  0x96   : > { %1145 = vmatmul.msk.f32.gmra.mxu1 %vm465_vm0, %v407_v19 }
  0x9b   : > { %v692_v22 = vpop.f32.mrf.mxu1 }
  0x9c   : > { %665 = vmatmul.f32.gmra.mxu2 %v434_v20 }
  0x9d   : > { %620 = vmatmul.f32.gmra.mxu0 %v404_v21 }
  0x9e   : > { %1146 = vmatmul.msk.f32.gmra.mxu1 %vm465_vm0, %v409_v23 }
  0xa3   : > { %v695_v25 = vpop.f32.mrf.mxu1  ;;  %v743_v26 = vpop.f32.mrf.mxu3 }
  0xa4   : > { %668 = vmatmul.f32.gmra.mxu2 %v436_v24 }
  0xaa   : > { %v579_v29 = vpop.f32.mrf.mxu0 }
  0xab   : > { %v698_v30 = vpop.f32.mrf.mxu1  ;;  %v693_v31 = vadd.f32 %v692_v22, %v579_v29  ;;  %v746_v33 = vpop.f32.mrf.mxu3 }
  0xac   : > { %671 = vmatmul.f32.gmra.mxu2 %v438_v27 }
  0xad   : > { %v891_v34 = vmul.f32 %v1468_v28, %v693_v31 }
  0xaf   : > { %v927_v35 = vadd.f32 %v1474_v32, %v891_v34  ;;  %v1483_v36 = vpop.f32.mrf.mxu2 }
  0xb1   : > { %959 = vst [vmem:[%s1480_s11] sm:$0xff] %v927_v35 }
  0xb2   : > { %v582_v37 = vpop.f32.mrf.mxu0 }
  0xb3   : > { %v701_v38 = vpop.f32.mrf.mxu1  ;;  %v696_v39 = vadd.f32 %v695_v25, %v582_v37  ;;  %v749_v41 = vpop.f32.mrf.mxu3 }
  0xb5   : > { %v892_v40 = vmul.f32 %v1468_v28, %v696_v39 }
  0xb7   : > { %v928_v42 = vadd.f32 %v1474_v32, %v892_v40  ;;  %v1488_v43 = vpop.f32.mrf.mxu2 }
  0xb9   : > { %960 = vst [vmem:[%s1480_s11 + $0x8] sm:$0xff] %v928_v42 }
  0xba   : > { %v585_v44 = vpop.f32.mrf.mxu0 }
  0xbb   : > { %v704_v45 = vpop.f32.mrf.mxu1  ;;  %v699_v46 = vadd.f32 %v698_v30, %v585_v44  ;;  %v752_v50 = vpop.f32.mrf.mxu3 }
  0xbd   : > { %v893_v47 = vmul.f32 %v1468_v28, %v699_v46 }
  0xbf   : > { %v929_v48 = vadd.f32 %v1474_v32, %v893_v47  ;;  %v630_v49 = vpop.f32.mrf.mxu2 }
  0xc0   : > { %v744_v51 = vadd.f32 %v743_v26, %v630_v49 }
  0xc1   : > { %961 = vst [vmem:[%s1480_s11 + $0x10] sm:$0xff] %v929_v48 }
  0xc2   : > { %v908_v52 = vmul.f32 %v1468_v28, %v744_v51  ;;  %v588_v53 = vpop.f32.mrf.mxu0 }
  0xc3   : > { %v707_v54 = vpop.f32.mrf.mxu1  ;;  %v702_v55 = vadd.f32 %v701_v38, %v588_v53  ;;  %v755_v61 = vpop.f32.mrf.mxu3 }
  0xc4   : > { %v944_v56 = vadd.f32 %v1474_v32, %v908_v52 }
  0xc5   : > { %v894_v57 = vmul.f32 %v1468_v28, %v702_v55 }
  0xc6   : > { %976 = vst [vmem:[%s1480_s11 + $0x88] sm:$0xff] %v944_v56 }
  0xc7   : > { %v930_v58 = vadd.f32 %v1474_v32, %v894_v57  ;;  %v633_v59 = vpop.f32.mrf.mxu2 }
  0xc8   : > { %v747_v60 = vadd.f32 %v746_v33, %v633_v59 }
  0xc9   : > { %962 = vst [vmem:[%s1480_s11 + $0x18] sm:$0xff] %v930_v58 }
  0xca   : > { %v909_v62 = vmul.f32 %v1468_v28, %v747_v60  ;;  %v591_v63 = vpop.f32.mrf.mxu0 }
  0xcb   : > { %v710_v0 = vpop.f32.mrf.mxu1  ;;  %v705_v1 = vadd.f32 %v704_v45, %v591_v63  ;;  %v758_v11 = vpop.f32.mrf.mxu3 }
  0xcc   : > { %v945_v2 = vadd.f32 %v1474_v32, %v909_v62 }
  0xcd   : > { %v895_v3 = vmul.f32 %v1468_v28, %v705_v1 }
  0xce   : > { %977 = vst [vmem:[%s1480_s11 + $0x90] sm:$0xff] %v945_v2 }
  0xcf   : > { %v931_v4 = vadd.f32 %v1474_v32, %v895_v3  ;;  %v636_v5 = vpop.f32.mrf.mxu2 }
  0xd0   : > { %v750_v6 = vadd.f32 %v749_v41, %v636_v5 }
  0xd1   : > { %963 = vst [vmem:[%s1480_s11 + $0x20] sm:$0xff] %v931_v4 }
  0xd2   : > { %v910_v7 = vmul.f32 %v1468_v28, %v750_v6  ;;  %v594_v8 = vpop.f32.mrf.mxu0 }
  0xd3   : > { %v713_v9 = vpop.f32.mrf.mxu1  ;;  %v708_v10 = vadd.f32 %v707_v54, %v594_v8  ;;  %v761_v23 = vpop.f32.mrf.mxu3 }
  0xd4   : > { %v946_v12 = vadd.f32 %v1474_v32, %v910_v7 }
  0xd5   : > { %v896_v13 = vmul.f32 %v1468_v28, %v708_v10 }
  0xd6   : > { %978 = vst [vmem:[%s1480_s11 + $0x98] sm:$0xff] %v946_v12 }
  0xd7   : > { %v932_v14 = vadd.f32 %v1474_v32, %v896_v13  ;;  %v639_v15 = vpop.f32.mrf.mxu2 }
  0xd8   : > { %v753_v16 = vadd.f32 %v752_v50, %v639_v15 }
  0xd9   : > { %964 = vst [vmem:[%s1480_s11 + $0x28] sm:$0xff] %v932_v14 }
  0xda   : > { %v911_v17 = vmul.f32 %v1468_v28, %v753_v16  ;;  %v597_v18 = vpop.f32.mrf.mxu0 }
  0xdb   : > { %v716_v19 = vpop.f32.mrf.mxu1  ;;  %v711_v20 = vadd.f32 %v710_v0, %v597_v18  ;;  %v764_v38 = vpop.f32.mrf.mxu3 }
  0xdc   : > { %v947_v21 = vadd.f32 %v1474_v32, %v911_v17 }
  0xdd   : > { %v897_v22 = vmul.f32 %v1468_v28, %v711_v20 }
  0xde   : > { %979 = vst [vmem:[%s1480_s11 + $0xa0] sm:$0xff] %v947_v21 }
  0xdf   : > { %v933_v24 = vadd.f32 %v1474_v32, %v897_v22  ;;  %v642_v25 = vpop.f32.mrf.mxu2 }
  0xe0   : > { %v756_v26 = vadd.f32 %v755_v61, %v642_v25 }
  0xe1   : > { %965 = vst [vmem:[%s1480_s11 + $0x30] sm:$0xff] %v933_v24 }
  0xe2   : > { %v912_v27 = vmul.f32 %v1468_v28, %v756_v26  ;;  %v600_v29 = vpop.f32.mrf.mxu0 }
  0xe3   : > { %v719_v30 = vpop.f32.mrf.mxu1  ;;  %v714_v31 = vadd.f32 %v713_v9, %v600_v29  ;;  %v767_v50 = vpop.f32.mrf.mxu3 }
  0xe4   : > { %v948_v33 = vadd.f32 %v1474_v32, %v912_v27 }
  0xe5   : > { %v898_v34 = vmul.f32 %v1468_v28, %v714_v31 }
  0xe6   : > { %980 = vst [vmem:[%s1480_s11 + $0xa8] sm:$0xff] %v948_v33 }
  0xe7   : > { %v934_v35 = vadd.f32 %v1474_v32, %v898_v34  ;;  %v645_v37 = vpop.f32.mrf.mxu2 }
  0xe8   : > { %v759_v39 = vadd.f32 %v758_v11, %v645_v37 }
  0xe9   : > { %966 = vst [vmem:[%s1480_s11 + $0x38] sm:$0xff] %v934_v35 }
  0xea   : > { %v913_v40 = vmul.f32 %v1468_v28, %v759_v39  ;;  %v603_v41 = vpop.f32.mrf.mxu0 }
  0xeb   : > { %v722_v42 = vpop.f32.mrf.mxu1  ;;  %v717_v44 = vadd.f32 %v716_v19, %v603_v41  ;;  %v770_v0 = vpop.f32.mrf.mxu3 }
  0xec   : > { %v949_v45 = vadd.f32 %v1474_v32, %v913_v40 }
  0xed   : > { %v899_v46 = vmul.f32 %v1468_v28, %v717_v44 }
  0xee   : > { %981 = vst [vmem:[%s1480_s11 + $0xb0] sm:$0xff] %v949_v45 }
  0xef   : > { %v935_v47 = vadd.f32 %v1474_v32, %v899_v46  ;;  %v648_v48 = vpop.f32.mrf.mxu2 }
  0xf0   : > { %v762_v49 = vadd.f32 %v761_v23, %v648_v48 }
  0xf1   : > { %967 = vst [vmem:[%s1480_s11 + $0x40] sm:$0xff] %v935_v47 }
  0xf2   : > { %v914_v51 = vmul.f32 %v1468_v28, %v762_v49  ;;  %v606_v52 = vpop.f32.mrf.mxu0 }
  0xf3   : > { %v725_v53 = vpop.f32.mrf.mxu1  ;;  %v720_v54 = vadd.f32 %v719_v30, %v606_v52  ;;  %v773_v12 = vpop.f32.mrf.mxu3 }
  0xf4   : > { %v950_v55 = vadd.f32 %v1474_v32, %v914_v51 }
  0xf5   : > { %v900_v56 = vmul.f32 %v1468_v28, %v720_v54 }
  0xf6   : > { %982 = vst [vmem:[%s1480_s11 + $0xb8] sm:$0xff] %v950_v55 }
  0xf7   : > { %v936_v57 = vadd.f32 %v1474_v32, %v900_v56  ;;  %v651_v58 = vpop.f32.mrf.mxu2 }
  0xf8   : > { %v765_v59 = vadd.f32 %v764_v38, %v651_v58 }
  0xf9   : > { %968 = vst [vmem:[%s1480_s11 + $0x48] sm:$0xff] %v936_v57 }
  0xfa   : > { %v915_v60 = vmul.f32 %v1468_v28, %v765_v59  ;;  %v609_v61 = vpop.f32.mrf.mxu0 }
  0xfb   : > { %v728_v62 = vpop.f32.mrf.mxu1  ;;  %v723_v63 = vadd.f32 %v722_v42, %v609_v61  ;;  %v776_v24 = vpop.f32.mrf.mxu3 }
  0xfc   : > { %v951_v1 = vadd.f32 %v1474_v32, %v915_v60 }
  0xfd   : > { %v901_v2 = vmul.f32 %v1468_v28, %v723_v63 }
  0xfe   : > { %983 = vst [vmem:[%s1480_s11 + $0xc0] sm:$0xff] %v951_v1 }
  0xff   : > { %v937_v3 = vadd.f32 %v1474_v32, %v901_v2  ;;  %v654_v4 = vpop.f32.mrf.mxu2 }
 0x100   : > { %v768_v5 = vadd.f32 %v767_v50, %v654_v4 }
 0x101   : > { %969 = vst [vmem:[%s1480_s11 + $0x50] sm:$0xff] %v937_v3 }
 0x102   : > { %v916_v6 = vmul.f32 %v1468_v28, %v768_v5  ;;  %v612_v7 = vpop.f32.mrf.mxu0 }
 0x103   : > { %v731_v8 = vpop.f32.mrf.mxu1  ;;  %v726_v9 = vadd.f32 %v725_v53, %v612_v7  ;;  %v779_v41 = vpop.f32.mrf.mxu3 }
 0x104   : > { %v952_v10 = vadd.f32 %v1474_v32, %v916_v6 }
 0x105   : > { %v902_v11 = vmul.f32 %v1468_v28, %v726_v9 }
 0x106   : > { %984 = vst [vmem:[%s1480_s11 + $0xc8] sm:$0xff] %v952_v10 }
 0x107   : > { %v938_v13 = vadd.f32 %v1474_v32, %v902_v11  ;;  %v657_v14 = vpop.f32.mrf.mxu2 }
 0x108   : > { %v771_v15 = vadd.f32 %v770_v0, %v657_v14 }
 0x109   : > { %970 = vst [vmem:[%s1480_s11 + $0x58] sm:$0xff] %v938_v13 }
 0x10a   : > { %v917_v16 = vmul.f32 %v1468_v28, %v771_v15  ;;  %v615_v17 = vpop.f32.mrf.mxu0 }
 0x10b   : > { %v734_v18 = vpop.f32.mrf.mxu1  ;;  %v729_v19 = vadd.f32 %v728_v62, %v615_v17  ;;  %v782_v55 = vpop.f32.mrf.mxu3 }
 0x10c   : > { %v953_v20 = vadd.f32 %v1474_v32, %v917_v16 }
 0x10d   : > { %v903_v21 = vmul.f32 %v1468_v28, %v729_v19 }
 0x10e   : > { %985 = vst [vmem:[%s1480_s11 + $0xd0] sm:$0xff] %v953_v20 }
 0x10f   : > { %v939_v22 = vadd.f32 %v1474_v32, %v903_v21  ;;  %v660_v23 = vpop.f32.mrf.mxu2 }
 0x110   : > { %v774_v25 = vadd.f32 %v773_v12, %v660_v23 }
 0x111   : > { %971 = vst [vmem:[%s1480_s11 + $0x60] sm:$0xff] %v939_v22 }
 0x112   : > { %v918_v26 = vmul.f32 %v1468_v28, %v774_v25  ;;  %v618_v27 = vpop.f32.mrf.mxu0 }
 0x113   : > { %v737_v29 = vpop.f32.mrf.mxu1  ;;  %v732_v30 = vadd.f32 %v731_v8, %v618_v27  ;;  %v785_v60 = vpop.f32.mrf.mxu3 }
 0x114   : > { %v954_v31 = vadd.f32 %v1474_v32, %v918_v26  ;;  %v738_v33 = vadd.f32 %v737_v29, %v1483_v36 }
 0x115   : > { %v904_v34 = vmul.f32 %v1468_v28, %v732_v30 }
 0x116   : > { %986 = vst [vmem:[%s1480_s11 + $0xd8] sm:$0xff] %v954_v31  ;;  %v906_v35 = vmul.f32 %v1468_v28, %v738_v33 }
 0x117   : > { %v940_v37 = vadd.f32 %v1474_v32, %v904_v34  ;;  %v663_v38 = vpop.f32.mrf.mxu2 }
 0x118   : > { %v942_v39 = vadd.f32 %v1474_v32, %v906_v35  ;;  %v777_v40 = vadd.f32 %v776_v24, %v663_v38 }
 0x119   : > { %972 = vst [vmem:[%s1480_s11 + $0x68] sm:$0xff] %v940_v37 }
 0x11a   : > { %974 = vst [vmem:[%s1480_s11 + $0x78] sm:$0xff] %v942_v39  ;;  %v919_v42 = vmul.f32 %v1468_v28, %v777_v40  ;;  %v621_v36 = vpop.f32.mrf.mxu0 }
 0x11b   : > { %v740_v44 = vpop.f32.mrf.mxu1  ;;  %v735_v45 = vadd.f32 %v734_v18, %v621_v36 }
 0x11c   : > { %v955_v46 = vadd.f32 %v1474_v32, %v919_v42  ;;  %v741_v47 = vadd.f32 %v740_v44, %v1488_v43 }
 0x11d   : > { %v905_v48 = vmul.f32 %v1468_v28, %v735_v45 }
 0x11e   : > { %987 = vst [vmem:[%s1480_s11 + $0xe0] sm:$0xff] %v955_v46  ;;  %v907_v49 = vmul.f32 %v1468_v28, %v741_v47 }
 0x11f   : > { %v941_v50 = vadd.f32 %v1474_v32, %v905_v48  ;;  %v666_v51 = vpop.f32.mrf.mxu2 }
 0x120   : > { %v943_v52 = vadd.f32 %v1474_v32, %v907_v49  ;;  %v780_v53 = vadd.f32 %v779_v41, %v666_v51 }
 0x121   : > { %973 = vst [vmem:[%s1480_s11 + $0x70] sm:$0xff] %v941_v50 }
 0x122   : > { %975 = vst [vmem:[%s1480_s11 + $0x80] sm:$0xff] %v943_v52  ;;  %v920_v54 = vmul.f32 %v1468_v28, %v780_v53 }
 0x124   : > { %v956_v43 = vadd.f32 %v1474_v32, %v920_v54 }
 0x126   : > { %988 = vst [vmem:[%s1480_s11 + $0xe8] sm:$0xff] %v956_v43 }
 0x127   : > { %v669_v56 = vpop.f32.mrf.mxu2 }
 0x128   : > { %v783_v57 = vadd.f32 %v782_v55, %v669_v56 }
 0x12a   : > { %v921_v58 = vmul.f32 %v1468_v28, %v783_v57 }
 0x12c   : > { %v957_v59 = vadd.f32 %v1474_v32, %v921_v58 }
 0x12e   : > { %989 = vst [vmem:[%s1480_s11 + $0xf0] sm:$0xff] %v957_v59 }
 0x12f   : > { %v672_v61 = vpop.f32.mrf.mxu2 }
 0x130   : > { %v786_v62 = vadd.f32 %v785_v60, %v672_v61 }
 0x132   : > { %v922_v63 = vmul.f32 %v1468_v28, %v786_v62 }
 0x134   : > { %v958_v0 = vadd.f32 %v1474_v32, %v922_v63 }
 0x136   : > { %990 = vst [vmem:[%s1480_s11 + $0xf8] sm:$0xff] %v958_v0 }
 0x137 PF: > { %s14_s17 = sadd.s32 1, %s1238_s17   ;;  %s1597_s15 = smov %s1234_s16 }
 0x138   : > { %p11_p5 = scmp.ge.s32.totalorder %s14_s17, 4   ;;  %s1598_s16 = smov %s1600_s18 }
 0x13a   :  { %13 = sbr.rel (!%p11_p5) target bundleno = 2 (0x2), region = 83 }

// kernel: _lambda_.22
= control target key start
LH: loop header
LB: loop body
LE: loop exit
PB: predicated region body
PF: predicated region fallthrough
CT: control target
= control target key end

     0   :  { %s1065_s15 = smov 0   ;;  %s1067_s16 = smov 0   ;;  %s1285_s0 = inlined_call_operand.vmem [shape: f32[512,16], index: 0, kind: input, shape index: {}]   ;;  %s1286_s1 = inlined_call_operand.vmem [shape: f32[16,128], index: 1, kind: input, shape index: {}]   ;;  %s1287_s2 = inlined_call_operand.vmem [shape: f32[1,128], index: 2, kind: input, shape index: {}]   ;;  %s1288_s3 = inlined_call_operand.vmem [shape: f32[1,128], index: 3, kind: input, shape index: {}]   ;;  %s1289_s4 = inlined_call_operand.vmem [shape: f32[512,128], index: 4, kind: output, shape index: {}]  }
   0x1   :  { %s1069_s17 = smov 0  }
   0x2 LB: > { %s33_s18 = sadd.s32 1, %s1034_s16  ;;  %p945_p0 = scmp.ge.s32.totalorder %s1038_s17, 1  ;;  %s1038_s17 = sphi %s1069_s17, %s14_s17   ;;  %s1034_s16 = sphi %s1067_s16, %s1291_s16   ;;  %s1030_s15 = sphi %s1065_s15, %s1290_s15  }
   0x3   : > { %p35_p1 = scmp.ge.s32.totalorder %s33_s18, 2  ;;  %p221_p2 = scmp.lt.s32.totalorder %s1038_s17, 3 }
   0x5   : > { %s1293_s18 = smov (%p35_p1, %s33_s18), 0  ;;  %p222_p3 = pnand %p945_p0, %p221_p2 }
   0x6   : > { %s946_s23 = sshll.u32 (!%p222_p3), %s1030_s15, 5 }
   0x7   : > { %225 = sbr.rel (%p222_p3) target bundleno = 211 (0xd3), region = 36  ;;  %p268_p4 = scmp.lt.s32.totalorder (!%p222_p3), %s946_s23, 63 }
   0xc   : > { %v401_v0 = vld [vmem:[%s1286_s1 + $0x8] sm:$0xff]  ;;  %v400_v1 = vld [vmem:[%s1286_s1] sm:$0xff]  ;;  %s1295_s23 = smov (!%p268_p4, %s946_s23), 63  ;;  %vm402_vm0 = vcmask 130048  }
   0xd   : > { %985 = vmatpush.msra.mxu2 %v401_v0  ;;  %986 = vmatpush.msra.mxu3 %v401_v0  ;;  %s947_s24 = sshll.u32 %s1295_s23, 3  ;;  %v1166_v34 = vld [vmem:[%s1287_s2] ss:$0 sm:$0xff] }
   0xe   : > { %513 = vmatpush.msra.mxu0 %v401_v0  ;;  %984 = vmatpush.msra.mxu1 %v401_v0  ;;  %s1097_s27 = scalar_lea.vmem %s1285_s0, %s947_s24  ;;  %v1171_v35 = vld [vmem:[%s1288_s3] ss:$0 sm:$0xff]  ;;  %s1180_s8 = scalar_lea.vmem %s1289_s4, %s947_s24 }
   0xf   : > { %988 = vmatpush.msra.mxu2 %v400_v1  ;;  %989 = vmatpush.msra.mxu3 %v400_v1  ;;  %v384_v2 = vld [vmem:[%s1097_s27 + $0x80] sm:$0xff]  ;;  %v385_v6 = vld [vmem:[%s1097_s27 + $0x88] sm:$0xff]  ;;  %v386_v10 = vld [vmem:[%s1097_s27 + $0x90] sm:$0xff] }
  0x10   : > { %514 = vmatpush.msra.mxu0 %v400_v1  ;;  %987 = vmatpush.msra.mxu1 %v400_v1  ;;  %v392_v3 = vld [vmem:[%s1097_s27 + $0xc0] sm:$0xff]  ;;  %v393_v7 = vld [vmem:[%s1097_s27 + $0xc8] sm:$0xff]  ;;  %v394_v11 = vld [vmem:[%s1097_s27 + $0xd0] sm:$0xff] }
  0x11   : > { %v368_v4 = vld [vmem:[%s1097_s27] sm:$0xff]  ;;  %966 = vmatmul.msk.f32.vlgmr.msra.gmra.mxu2 %vm402_vm0, %v384_v2  ;;  %974 = vmatmul.msk.f32.vlgmr.msra.gmra.mxu3 %vm402_vm0, %v392_v3  ;;  %v369_v8 = vld [vmem:[%s1097_s27 + $0x8] sm:$0xff]  ;;  %v370_v12 = vld [vmem:[%s1097_s27 + $0x10] sm:$0xff] }
  0x12   : > { %v376_v5 = vld [vmem:[%s1097_s27 + $0x40] sm:$0xff]  ;;  %950 = vmatmul.msk.f32.vlgmr.msra.gmra.mxu0 %vm402_vm0, %v368_v4  ;;  %v377_v9 = vld [vmem:[%s1097_s27 + $0x48] sm:$0xff]  ;;  %v378_v13 = vld [vmem:[%s1097_s27 + $0x50] sm:$0xff] }
  0x13   : > { %958 = vmatmul.msk.f32.vlgmr.msra.gmra.mxu1 %vm402_vm0, %v376_v5  ;;  %v387_v14 = vld [vmem:[%s1097_s27 + $0x98] sm:$0xff]  ;;  %v388_v18 = vld [vmem:[%s1097_s27 + $0xa0] sm:$0xff]  ;;  %v389_v22 = vld [vmem:[%s1097_s27 + $0xa8] sm:$0xff] }
  0x14   : > { %v395_v15 = vld [vmem:[%s1097_s27 + $0xd8] sm:$0xff]  ;;  %v396_v19 = vld [vmem:[%s1097_s27 + $0xe0] sm:$0xff]  ;;  %v397_v23 = vld [vmem:[%s1097_s27 + $0xe8] sm:$0xff] }
  0x15   : > { %v371_v16 = vld [vmem:[%s1097_s27 + $0x18] sm:$0xff]  ;;  %v372_v20 = vld [vmem:[%s1097_s27 + $0x20] sm:$0xff]  ;;  %v373_v24 = vld [vmem:[%s1097_s27 + $0x28] sm:$0xff] }
  0x16   : > { %v379_v17 = vld [vmem:[%s1097_s27 + $0x58] sm:$0xff]  ;;  %v380_v21 = vld [vmem:[%s1097_s27 + $0x60] sm:$0xff]  ;;  %v381_v25 = vld [vmem:[%s1097_s27 + $0x68] sm:$0xff] }
  0x17   : > { %v390_v26 = vld [vmem:[%s1097_s27 + $0xb0] sm:$0xff]  ;;  %v391_v30 = vld [vmem:[%s1097_s27 + $0xb8] sm:$0xff] }
  0x18   : > { %v398_v27 = vld [vmem:[%s1097_s27 + $0xf0] sm:$0xff]  ;;  %v399_v31 = vld [vmem:[%s1097_s27 + $0xf8] sm:$0xff] }
  0x19   : > { %967 = vmatmul.msk.f32.gmra.mxu2 %vm402_vm0, %v385_v6  ;;  %975 = vmatmul.msk.f32.gmra.mxu3 %vm402_vm0, %v393_v7  ;;  %v374_v28 = vld [vmem:[%s1097_s27 + $0x30] sm:$0xff]  ;;  %v375_v32 = vld [vmem:[%s1097_s27 + $0x38] sm:$0xff] }
  0x1a   : > { %951 = vmatmul.msk.f32.gmra.mxu0 %vm402_vm0, %v369_v8  ;;  %v382_v29 = vld [vmem:[%s1097_s27 + $0x70] sm:$0xff]  ;;  %v383_v33 = vld [vmem:[%s1097_s27 + $0x78] sm:$0xff] }
  0x1b   : > { %959 = vmatmul.msk.f32.gmra.mxu1 %vm402_vm0, %v377_v9 }
  0x21   : > { %968 = vmatmul.msk.f32.gmra.mxu2 %vm402_vm0, %v386_v10  ;;  %976 = vmatmul.msk.f32.gmra.mxu3 %vm402_vm0, %v394_v11 }
  0x22   : > { %952 = vmatmul.msk.f32.gmra.mxu0 %vm402_vm0, %v370_v12 }
  0x23   : > { %960 = vmatmul.msk.f32.gmra.mxu1 %vm402_vm0, %v378_v13 }
  0x29   : > { %969 = vmatmul.msk.f32.gmra.mxu2 %vm402_vm0, %v387_v14  ;;  %977 = vmatmul.msk.f32.gmra.mxu3 %vm402_vm0, %v395_v15 }
  0x2a   : > { %953 = vmatmul.msk.f32.gmra.mxu0 %vm402_vm0, %v371_v16 }
  0x2b   : > { %961 = vmatmul.msk.f32.gmra.mxu1 %vm402_vm0, %v379_v17 }
  0x31   : > { %970 = vmatmul.msk.f32.gmra.mxu2 %vm402_vm0, %v388_v18  ;;  %978 = vmatmul.msk.f32.gmra.mxu3 %vm402_vm0, %v396_v19 }
  0x32   : > { %954 = vmatmul.msk.f32.gmra.mxu0 %vm402_vm0, %v372_v20 }
  0x33   : > { %962 = vmatmul.msk.f32.gmra.mxu1 %vm402_vm0, %v380_v21 }
  0x39   : > { %971 = vmatmul.msk.f32.gmra.mxu2 %vm402_vm0, %v389_v22  ;;  %979 = vmatmul.msk.f32.gmra.mxu3 %vm402_vm0, %v397_v23 }
  0x3a   : > { %955 = vmatmul.msk.f32.gmra.mxu0 %vm402_vm0, %v373_v24 }
  0x3b   : > { %963 = vmatmul.msk.f32.gmra.mxu1 %vm402_vm0, %v381_v25 }
  0x41   : > { %972 = vmatmul.msk.f32.gmra.mxu2 %vm402_vm0, %v390_v26  ;;  %980 = vmatmul.msk.f32.gmra.mxu3 %vm402_vm0, %v398_v27 }
  0x42   : > { %956 = vmatmul.msk.f32.gmra.mxu0 %vm402_vm0, %v374_v28 }
  0x43   : > { %964 = vmatmul.msk.f32.gmra.mxu1 %vm402_vm0, %v382_v29 }
  0x49   : > { %973 = vmatmul.msk.f32.gmra.mxu2 %vm402_vm0, %v391_v30  ;;  %981 = vmatmul.msk.f32.gmra.mxu3 %vm402_vm0, %v399_v31 }
  0x4a   : > { %957 = vmatmul.msk.f32.gmra.mxu0 %vm402_vm0, %v375_v32 }
  0x4b   : > { %965 = vmatmul.msk.f32.gmra.mxu1 %vm402_vm0, %v383_v33 }
  0x8f   : > { %v516_v36 = vpop.f32.mrf.mxu0 }
  0x90   : > { %v540_v37 = vpop.f32.mrf.mxu1  ;;  %v715_v38 = vmul.f32 %v1166_v34, %v516_v36 }
  0x91   : > { %v723_v39 = vmul.f32 %v1166_v34, %v540_v37 }
  0x92   : > { %v751_v40 = vadd.f32 %v1171_v35, %v715_v38 }
  0x93   : > { %v759_v41 = vadd.f32 %v1171_v35, %v723_v39 }
  0x94   : > { %783 = vst [vmem:[%s1180_s8] sm:$0xff] %v751_v40  ;;  %v564_v42 = vpop.f32.mrf.mxu2  ;;  %v588_v43 = vpop.f32.mrf.mxu3 }
  0x95   : > { %791 = vst [vmem:[%s1180_s8 + $0x40] sm:$0xff] %v759_v41  ;;  %v731_v44 = vmul.f32 %v1166_v34, %v564_v42  ;;  %v739_v45 = vmul.f32 %v1166_v34, %v588_v43 }
  0x97   : > { %v767_v46 = vadd.f32 %v1171_v35, %v731_v44  ;;  %v775_v47 = vadd.f32 %v1171_v35, %v739_v45  ;;  %v519_v48 = vpop.f32.mrf.mxu0 }
  0x98   : > { %v543_v49 = vpop.f32.mrf.mxu1  ;;  %v716_v50 = vmul.f32 %v1166_v34, %v519_v48 }
  0x99   : > { %v724_v51 = vmul.f32 %v1166_v34, %v543_v49  ;;  %799 = vst [vmem:[%s1180_s8 + $0x80] sm:$0xff] %v767_v46 }
  0x9a   : > { %807 = vst [vmem:[%s1180_s8 + $0xc0] sm:$0xff] %v775_v47  ;;  %v752_v52 = vadd.f32 %v1171_v35, %v716_v50 }
  0x9b   : > { %v760_v53 = vadd.f32 %v1171_v35, %v724_v51 }
  0x9c   : > { %784 = vst [vmem:[%s1180_s8 + $0x8] sm:$0xff] %v752_v52  ;;  %v567_v54 = vpop.f32.mrf.mxu2  ;;  %v591_v55 = vpop.f32.mrf.mxu3 }
  0x9d   : > { %792 = vst [vmem:[%s1180_s8 + $0x48] sm:$0xff] %v760_v53  ;;  %v732_v56 = vmul.f32 %v1166_v34, %v567_v54  ;;  %v740_v57 = vmul.f32 %v1166_v34, %v591_v55 }
  0x9f   : > { %v768_v58 = vadd.f32 %v1171_v35, %v732_v56  ;;  %v776_v59 = vadd.f32 %v1171_v35, %v740_v57  ;;  %v522_v60 = vpop.f32.mrf.mxu0 }
  0xa0   : > { %v546_v61 = vpop.f32.mrf.mxu1  ;;  %v717_v62 = vmul.f32 %v1166_v34, %v522_v60 }
  0xa1   : > { %v725_v63 = vmul.f32 %v1166_v34, %v546_v61  ;;  %800 = vst [vmem:[%s1180_s8 + $0x88] sm:$0xff] %v768_v58 }
  0xa2   : > { %808 = vst [vmem:[%s1180_s8 + $0xc8] sm:$0xff] %v776_v59  ;;  %v753_v0 = vadd.f32 %v1171_v35, %v717_v62 }
  0xa3   : > { %v761_v1 = vadd.f32 %v1171_v35, %v725_v63 }
  0xa4   : > { %785 = vst [vmem:[%s1180_s8 + $0x10] sm:$0xff] %v753_v0  ;;  %v570_v2 = vpop.f32.mrf.mxu2  ;;  %v594_v3 = vpop.f32.mrf.mxu3 }
  0xa5   : > { %793 = vst [vmem:[%s1180_s8 + $0x50] sm:$0xff] %v761_v1  ;;  %v733_v4 = vmul.f32 %v1166_v34, %v570_v2  ;;  %v741_v5 = vmul.f32 %v1166_v34, %v594_v3 }
  0xa7   : > { %v769_v6 = vadd.f32 %v1171_v35, %v733_v4  ;;  %v777_v7 = vadd.f32 %v1171_v35, %v741_v5  ;;  %v525_v8 = vpop.f32.mrf.mxu0 }
  0xa8   : > { %v549_v9 = vpop.f32.mrf.mxu1  ;;  %v718_v10 = vmul.f32 %v1166_v34, %v525_v8 }
  0xa9   : > { %v726_v11 = vmul.f32 %v1166_v34, %v549_v9  ;;  %801 = vst [vmem:[%s1180_s8 + $0x90] sm:$0xff] %v769_v6 }
  0xaa   : > { %809 = vst [vmem:[%s1180_s8 + $0xd0] sm:$0xff] %v777_v7  ;;  %v754_v12 = vadd.f32 %v1171_v35, %v718_v10 }
  0xab   : > { %v762_v13 = vadd.f32 %v1171_v35, %v726_v11 }
  0xac   : > { %786 = vst [vmem:[%s1180_s8 + $0x18] sm:$0xff] %v754_v12  ;;  %v573_v14 = vpop.f32.mrf.mxu2  ;;  %v597_v15 = vpop.f32.mrf.mxu3 }
  0xad   : > { %794 = vst [vmem:[%s1180_s8 + $0x58] sm:$0xff] %v762_v13  ;;  %v734_v16 = vmul.f32 %v1166_v34, %v573_v14  ;;  %v742_v17 = vmul.f32 %v1166_v34, %v597_v15 }
  0xaf   : > { %v770_v18 = vadd.f32 %v1171_v35, %v734_v16  ;;  %v778_v19 = vadd.f32 %v1171_v35, %v742_v17  ;;  %v528_v20 = vpop.f32.mrf.mxu0 }
  0xb0   : > { %v552_v21 = vpop.f32.mrf.mxu1  ;;  %v719_v22 = vmul.f32 %v1166_v34, %v528_v20 }
  0xb1   : > { %v727_v23 = vmul.f32 %v1166_v34, %v552_v21  ;;  %802 = vst [vmem:[%s1180_s8 + $0x98] sm:$0xff] %v770_v18 }
  0xb2   : > { %810 = vst [vmem:[%s1180_s8 + $0xd8] sm:$0xff] %v778_v19  ;;  %v755_v24 = vadd.f32 %v1171_v35, %v719_v22 }
  0xb3   : > { %v763_v25 = vadd.f32 %v1171_v35, %v727_v23 }
  0xb4   : > { %787 = vst [vmem:[%s1180_s8 + $0x20] sm:$0xff] %v755_v24  ;;  %v576_v26 = vpop.f32.mrf.mxu2  ;;  %v600_v27 = vpop.f32.mrf.mxu3 }
  0xb5   : > { %795 = vst [vmem:[%s1180_s8 + $0x60] sm:$0xff] %v763_v25  ;;  %v735_v28 = vmul.f32 %v1166_v34, %v576_v26  ;;  %v743_v29 = vmul.f32 %v1166_v34, %v600_v27 }
  0xb7   : > { %v771_v30 = vadd.f32 %v1171_v35, %v735_v28  ;;  %v779_v31 = vadd.f32 %v1171_v35, %v743_v29  ;;  %v531_v32 = vpop.f32.mrf.mxu0 }
  0xb8   : > { %v555_v33 = vpop.f32.mrf.mxu1  ;;  %v720_v36 = vmul.f32 %v1166_v34, %v531_v32 }
  0xb9   : > { %v728_v37 = vmul.f32 %v1166_v34, %v555_v33  ;;  %803 = vst [vmem:[%s1180_s8 + $0xa0] sm:$0xff] %v771_v30 }
  0xba   : > { %811 = vst [vmem:[%s1180_s8 + $0xe0] sm:$0xff] %v779_v31  ;;  %v756_v38 = vadd.f32 %v1171_v35, %v720_v36 }
  0xbb   : > { %v764_v39 = vadd.f32 %v1171_v35, %v728_v37 }
  0xbc   : > { %788 = vst [vmem:[%s1180_s8 + $0x28] sm:$0xff] %v756_v38  ;;  %v579_v40 = vpop.f32.mrf.mxu2  ;;  %v603_v41 = vpop.f32.mrf.mxu3 }
  0xbd   : > { %796 = vst [vmem:[%s1180_s8 + $0x68] sm:$0xff] %v764_v39  ;;  %v736_v42 = vmul.f32 %v1166_v34, %v579_v40  ;;  %v744_v43 = vmul.f32 %v1166_v34, %v603_v41 }
  0xbf   : > { %v772_v44 = vadd.f32 %v1171_v35, %v736_v42  ;;  %v780_v45 = vadd.f32 %v1171_v35, %v744_v43  ;;  %v534_v46 = vpop.f32.mrf.mxu0 }
  0xc0   : > { %v558_v47 = vpop.f32.mrf.mxu1  ;;  %v721_v48 = vmul.f32 %v1166_v34, %v534_v46 }
  0xc1   : > { %v729_v49 = vmul.f32 %v1166_v34, %v558_v47  ;;  %804 = vst [vmem:[%s1180_s8 + $0xa8] sm:$0xff] %v772_v44 }
  0xc2   : > { %812 = vst [vmem:[%s1180_s8 + $0xe8] sm:$0xff] %v780_v45  ;;  %v757_v50 = vadd.f32 %v1171_v35, %v721_v48 }
  0xc3   : > { %v765_v51 = vadd.f32 %v1171_v35, %v729_v49 }
  0xc4   : > { %789 = vst [vmem:[%s1180_s8 + $0x30] sm:$0xff] %v757_v50  ;;  %v582_v52 = vpop.f32.mrf.mxu2  ;;  %v606_v53 = vpop.f32.mrf.mxu3 }
  0xc5   : > { %797 = vst [vmem:[%s1180_s8 + $0x70] sm:$0xff] %v765_v51  ;;  %v737_v54 = vmul.f32 %v1166_v34, %v582_v52  ;;  %v745_v55 = vmul.f32 %v1166_v34, %v606_v53 }
  0xc7   : > { %v773_v56 = vadd.f32 %v1171_v35, %v737_v54  ;;  %v781_v57 = vadd.f32 %v1171_v35, %v745_v55  ;;  %v537_v58 = vpop.f32.mrf.mxu0 }
  0xc8   : > { %v561_v59 = vpop.f32.mrf.mxu1  ;;  %v722_v60 = vmul.f32 %v1166_v34, %v537_v58 }
  0xc9   : > { %v730_v61 = vmul.f32 %v1166_v34, %v561_v59  ;;  %805 = vst [vmem:[%s1180_s8 + $0xb0] sm:$0xff] %v773_v56 }
  0xca   : > { %813 = vst [vmem:[%s1180_s8 + $0xf0] sm:$0xff] %v781_v57  ;;  %v758_v62 = vadd.f32 %v1171_v35, %v722_v60 }
  0xcb   : > { %v766_v63 = vadd.f32 %v1171_v35, %v730_v61 }
  0xcc   : > { %790 = vst [vmem:[%s1180_s8 + $0x38] sm:$0xff] %v758_v62  ;;  %v585_v0 = vpop.f32.mrf.mxu2  ;;  %v609_v1 = vpop.f32.mrf.mxu3 }
  0xcd   : > { %798 = vst [vmem:[%s1180_s8 + $0x78] sm:$0xff] %v766_v63  ;;  %v738_v2 = vmul.f32 %v1166_v34, %v585_v0  ;;  %v746_v3 = vmul.f32 %v1166_v34, %v609_v1 }
  0xcf   : > { %v774_v4 = vadd.f32 %v1171_v35, %v738_v2  ;;  %v782_v5 = vadd.f32 %v1171_v35, %v746_v3 }
  0xd1   : > { %806 = vst [vmem:[%s1180_s8 + $0xb8] sm:$0xff] %v774_v4 }
  0xd2   : > { %814 = vst [vmem:[%s1180_s8 + $0xf8] sm:$0xff] %v782_v5 }
  0xd3 PF: > { %s14_s17 = sadd.s32 1, %s1038_s17   ;;  %s1290_s15 = smov %s1034_s16 }
  0xd4   : > { %p11_p5 = scmp.ge.s32.totalorder %s14_s17, 4   ;;  %s1291_s16 = smov %s1293_s18 }
  0xd6   :  { %13 = sbr.rel (!%p11_p5) target bundleno = 2 (0x2), region = 83 }

// kernel: _lambda_.25
= control target key start
LH: loop header
LB: loop body
LE: loop exit
PB: predicated region body
PF: predicated region fallthrough
CT: control target
= control target key end

     0   :  { %s1093_s15 = smov 0   ;;  %s1095_s16 = smov 0   ;;  %s1334_s0 = inlined_call_operand.vmem [shape: f32[512,72], index: 0, kind: input, shape index: {}]   ;;  %s1335_s1 = inlined_call_operand.vmem [shape: f32[72,128], index: 1, kind: input, shape index: {}]   ;;  %s1336_s2 = inlined_call_operand.vmem [shape: f32[1,128], index: 2, kind: input, shape index: {}]   ;;  %s1337_s3 = inlined_call_operand.vmem [shape: f32[1,128], index: 3, kind: input, shape index: {}]   ;;  %s1338_s4 = inlined_call_operand.vmem [shape: f32[512,128], index: 4, kind: output, shape index: {}]  }
   0x1   :  { %s1097_s17 = smov 0  }
   0x2 LB: > { %s33_s18 = sadd.s32 1, %s1062_s16  ;;  %p952_p0 = scmp.ge.s32.totalorder %s1066_s17, 1  ;;  %s1066_s17 = sphi %s1097_s17, %s14_s17   ;;  %s1062_s16 = sphi %s1095_s16, %s1340_s16   ;;  %s1058_s15 = sphi %s1093_s15, %s1339_s15  }
   0x3   : > { %p35_p1 = scmp.ge.s32.totalorder %s33_s18, 2  ;;  %p221_p2 = scmp.lt.s32.totalorder %s1066_s17, 3 }
   0x5   : > { %s1342_s18 = smov (%p35_p1, %s33_s18), 0  ;;  %p222_p3 = pnand %p952_p0, %p221_p2 }
   0x6   : > { %s953_s23 = sshll.u32 (!%p222_p3), %s1058_s15, 5 }
   0x7   : > { %225 = sbr.rel (%p222_p3) target bundleno = 224 (0xe0), region = 36  ;;  %p268_p4 = scmp.lt.s32.totalorder (!%p222_p3), %s953_s23, 63 }
   0xc   : > { %v408_v0 = vld [vmem:[%s1335_s1 + $0x40] sm:$0xff]  ;;  %v407_v1 = vld [vmem:[%s1335_s1 + $0x38] sm:$0xff]  ;;  %v406_v2 = vld [vmem:[%s1335_s1 + $0x30] sm:$0xff]  ;;  %s1344_s23 = smov (!%p268_p4, %s953_s23), 63  ;;  %vm409_vm0 = vcmask 588800  }
   0xd   : > { %992 = vmatpush.msra.mxu2 %v408_v0  ;;  %993 = vmatpush.msra.mxu3 %v408_v0  ;;  %v405_v3 = vld [vmem:[%s1335_s1 + $0x28] sm:$0xff]  ;;  %v404_v4 = vld [vmem:[%s1335_s1 + $0x20] sm:$0xff]  ;;  %v403_v5 = vld [vmem:[%s1335_s1 + $0x18] sm:$0xff]  ;;  %s954_s6 = sshll.u32 %s1344_s23, 3 }
   0xe   : > { %513 = vmatpush.msra.mxu0 %v408_v0  ;;  %991 = vmatpush.msra.mxu1 %v408_v0  ;;  %v402_v6 = vld [vmem:[%s1335_s1 + $0x10] sm:$0xff]  ;;  %v401_v7 = vld [vmem:[%s1335_s1 + $0x8] sm:$0xff]  ;;  %s1143_s13 = scalar_lea.vmem %s1334_s0, %s954_s6  ;;  %v400_v8 = vld [vmem:[%s1335_s1] sm:$0xff]  ;;  %s1229_s26 = scalar_lea.vmem %s1338_s4, %s954_s6 }
   0xf   : > { %995 = vmatpush.msra.mxu2 %v407_v1  ;;  %996 = vmatpush.msra.mxu3 %v407_v1  ;;  %v384_v9 = vld [vmem:[%s1143_s13 + $0x80] sm:$0xff]  ;;  %v385_v13 = vld [vmem:[%s1143_s13 + $0x88] sm:$0xff]  ;;  %v386_v17 = vld [vmem:[%s1143_s13 + $0x90] sm:$0xff] }
  0x10   : > { %514 = vmatpush.msra.mxu0 %v407_v1  ;;  %994 = vmatpush.msra.mxu1 %v407_v1  ;;  %v392_v10 = vld [vmem:[%s1143_s13 + $0xc0] sm:$0xff]  ;;  %v393_v14 = vld [vmem:[%s1143_s13 + $0xc8] sm:$0xff]  ;;  %v394_v18 = vld [vmem:[%s1143_s13 + $0xd0] sm:$0xff] }
  0x11   : > { %998 = vmatpush.msra.mxu2 %v406_v2  ;;  %999 = vmatpush.msra.mxu3 %v406_v2  ;;  %v368_v11 = vld [vmem:[%s1143_s13] sm:$0xff]  ;;  %v369_v15 = vld [vmem:[%s1143_s13 + $0x8] sm:$0xff]  ;;  %v370_v19 = vld [vmem:[%s1143_s13 + $0x10] sm:$0xff] }
  0x12   : > { %515 = vmatpush.msra.mxu0 %v406_v2  ;;  %997 = vmatpush.msra.mxu1 %v406_v2  ;;  %v376_v12 = vld [vmem:[%s1143_s13 + $0x40] sm:$0xff]  ;;  %v377_v16 = vld [vmem:[%s1143_s13 + $0x48] sm:$0xff]  ;;  %v378_v20 = vld [vmem:[%s1143_s13 + $0x50] sm:$0xff] }
  0x13   : > { %1001 = vmatpush.msra.mxu2 %v405_v3  ;;  %1002 = vmatpush.msra.mxu3 %v405_v3  ;;  %v387_v21 = vld [vmem:[%s1143_s13 + $0x98] sm:$0xff]  ;;  %v388_v25 = vld [vmem:[%s1143_s13 + $0xa0] sm:$0xff]  ;;  %v389_v29 = vld [vmem:[%s1143_s13 + $0xa8] sm:$0xff] }
  0x14   : > { %516 = vmatpush.msra.mxu0 %v405_v3  ;;  %1000 = vmatpush.msra.mxu1 %v405_v3  ;;  %v395_v22 = vld [vmem:[%s1143_s13 + $0xd8] sm:$0xff]  ;;  %v396_v26 = vld [vmem:[%s1143_s13 + $0xe0] sm:$0xff]  ;;  %v397_v30 = vld [vmem:[%s1143_s13 + $0xe8] sm:$0xff] }
  0x15   : > { %1004 = vmatpush.msra.mxu2 %v404_v4  ;;  %1005 = vmatpush.msra.mxu3 %v404_v4  ;;  %v371_v23 = vld [vmem:[%s1143_s13 + $0x18] sm:$0xff]  ;;  %v372_v27 = vld [vmem:[%s1143_s13 + $0x20] sm:$0xff]  ;;  %v373_v31 = vld [vmem:[%s1143_s13 + $0x28] sm:$0xff] }
  0x16   : > { %517 = vmatpush.msra.mxu0 %v404_v4  ;;  %1003 = vmatpush.msra.mxu1 %v404_v4  ;;  %v379_v24 = vld [vmem:[%s1143_s13 + $0x58] sm:$0xff]  ;;  %v380_v28 = vld [vmem:[%s1143_s13 + $0x60] sm:$0xff]  ;;  %v381_v32 = vld [vmem:[%s1143_s13 + $0x68] sm:$0xff] }
  0x17   : > { %1007 = vmatpush.msra.mxu2 %v403_v5  ;;  %1008 = vmatpush.msra.mxu3 %v403_v5  ;;  %v390_v33 = vld [vmem:[%s1143_s13 + $0xb0] sm:$0xff]  ;;  %v391_v37 = vld [vmem:[%s1143_s13 + $0xb8] sm:$0xff]  ;;  %v1215_v41 = vld [vmem:[%s1336_s2] ss:$0 sm:$0xff] }
  0x18   : > { %518 = vmatpush.msra.mxu0 %v403_v5  ;;  %1006 = vmatpush.msra.mxu1 %v403_v5  ;;  %v398_v34 = vld [vmem:[%s1143_s13 + $0xf0] sm:$0xff]  ;;  %v399_v38 = vld [vmem:[%s1143_s13 + $0xf8] sm:$0xff]  ;;  %v1220_v42 = vld [vmem:[%s1337_s3] ss:$0 sm:$0xff] }
  0x19   : > { %1010 = vmatpush.msra.mxu2 %v402_v6  ;;  %1011 = vmatpush.msra.mxu3 %v402_v6  ;;  %v374_v35 = vld [vmem:[%s1143_s13 + $0x30] sm:$0xff]  ;;  %v375_v39 = vld [vmem:[%s1143_s13 + $0x38] sm:$0xff] }
  0x1a   : > { %519 = vmatpush.msra.mxu0 %v402_v6  ;;  %1009 = vmatpush.msra.mxu1 %v402_v6  ;;  %v382_v36 = vld [vmem:[%s1143_s13 + $0x70] sm:$0xff]  ;;  %v383_v40 = vld [vmem:[%s1143_s13 + $0x78] sm:$0xff] }
  0x1b   : > { %1013 = vmatpush.msra.mxu2 %v401_v7  ;;  %1014 = vmatpush.msra.mxu3 %v401_v7 }
  0x1c   : > { %520 = vmatpush.msra.mxu0 %v401_v7  ;;  %1012 = vmatpush.msra.mxu1 %v401_v7 }
  0x1d   : > { %1016 = vmatpush.msra.mxu2 %v400_v8  ;;  %1017 = vmatpush.msra.mxu3 %v400_v8 }
  0x1e   : > { %973 = vmatmul.msk.f32.vlgmr.msra.gmra.mxu2 %vm409_vm0, %v384_v9  ;;  %981 = vmatmul.msk.f32.vlgmr.msra.gmra.mxu3 %vm409_vm0, %v392_v10 }
  0x1f   : > { %521 = vmatpush.msra.mxu0 %v400_v8  ;;  %1015 = vmatpush.msra.mxu1 %v400_v8 }
  0x20   : > { %957 = vmatmul.msk.f32.vlgmr.msra.gmra.mxu0 %vm409_vm0, %v368_v11  ;;  %965 = vmatmul.msk.f32.vlgmr.msra.gmra.mxu1 %vm409_vm0, %v376_v12 }
  0x26   : > { %974 = vmatmul.msk.f32.gmra.mxu2 %vm409_vm0, %v385_v13  ;;  %982 = vmatmul.msk.f32.gmra.mxu3 %vm409_vm0, %v393_v14 }
  0x28   : > { %958 = vmatmul.msk.f32.gmra.mxu0 %vm409_vm0, %v369_v15  ;;  %966 = vmatmul.msk.f32.gmra.mxu1 %vm409_vm0, %v377_v16 }
  0x2e   : > { %975 = vmatmul.msk.f32.gmra.mxu2 %vm409_vm0, %v386_v17  ;;  %983 = vmatmul.msk.f32.gmra.mxu3 %vm409_vm0, %v394_v18 }
  0x30   : > { %959 = vmatmul.msk.f32.gmra.mxu0 %vm409_vm0, %v370_v19  ;;  %967 = vmatmul.msk.f32.gmra.mxu1 %vm409_vm0, %v378_v20 }
  0x36   : > { %976 = vmatmul.msk.f32.gmra.mxu2 %vm409_vm0, %v387_v21  ;;  %984 = vmatmul.msk.f32.gmra.mxu3 %vm409_vm0, %v395_v22 }
  0x38   : > { %960 = vmatmul.msk.f32.gmra.mxu0 %vm409_vm0, %v371_v23  ;;  %968 = vmatmul.msk.f32.gmra.mxu1 %vm409_vm0, %v379_v24 }
  0x3e   : > { %977 = vmatmul.msk.f32.gmra.mxu2 %vm409_vm0, %v388_v25  ;;  %985 = vmatmul.msk.f32.gmra.mxu3 %vm409_vm0, %v396_v26 }
  0x40   : > { %961 = vmatmul.msk.f32.gmra.mxu0 %vm409_vm0, %v372_v27  ;;  %969 = vmatmul.msk.f32.gmra.mxu1 %vm409_vm0, %v380_v28 }
  0x46   : > { %978 = vmatmul.msk.f32.gmra.mxu2 %vm409_vm0, %v389_v29  ;;  %986 = vmatmul.msk.f32.gmra.mxu3 %vm409_vm0, %v397_v30 }
  0x48   : > { %962 = vmatmul.msk.f32.gmra.mxu0 %vm409_vm0, %v373_v31  ;;  %970 = vmatmul.msk.f32.gmra.mxu1 %vm409_vm0, %v381_v32 }
  0x4e   : > { %979 = vmatmul.msk.f32.gmra.mxu2 %vm409_vm0, %v390_v33  ;;  %987 = vmatmul.msk.f32.gmra.mxu3 %vm409_vm0, %v398_v34 }
  0x50   : > { %963 = vmatmul.msk.f32.gmra.mxu0 %vm409_vm0, %v374_v35  ;;  %971 = vmatmul.msk.f32.gmra.mxu1 %vm409_vm0, %v382_v36 }
  0x56   : > { %980 = vmatmul.msk.f32.gmra.mxu2 %vm409_vm0, %v391_v37  ;;  %988 = vmatmul.msk.f32.gmra.mxu3 %vm409_vm0, %v399_v38 }
  0x58   : > { %964 = vmatmul.msk.f32.gmra.mxu0 %vm409_vm0, %v375_v39  ;;  %972 = vmatmul.msk.f32.gmra.mxu1 %vm409_vm0, %v383_v40 }
  0x9d   : > { %v523_v43 = vpop.f32.mrf.mxu0  ;;  %v547_v44 = vpop.f32.mrf.mxu1 }
  0x9e   : > { %v722_v45 = vmul.f32 %v1215_v41, %v523_v43  ;;  %v730_v46 = vmul.f32 %v1215_v41, %v547_v44 }
  0xa0   : > { %v758_v47 = vadd.f32 %v1220_v42, %v722_v45  ;;  %v766_v48 = vadd.f32 %v1220_v42, %v730_v46 }
  0xa1   : > { %v571_v49 = vpop.f32.mrf.mxu2  ;;  %v595_v50 = vpop.f32.mrf.mxu3 }
  0xa2   : > { %790 = vst [vmem:[%s1229_s26] sm:$0xff] %v758_v47  ;;  %v738_v51 = vmul.f32 %v1215_v41, %v571_v49  ;;  %v746_v52 = vmul.f32 %v1215_v41, %v595_v50 }
  0xa3   : > { %798 = vst [vmem:[%s1229_s26 + $0x40] sm:$0xff] %v766_v48 }
  0xa4   : > { %v774_v53 = vadd.f32 %v1220_v42, %v738_v51  ;;  %v782_v54 = vadd.f32 %v1220_v42, %v746_v52 }
  0xa5   : > { %v526_v55 = vpop.f32.mrf.mxu0  ;;  %v550_v56 = vpop.f32.mrf.mxu1 }
  0xa6   : > { %806 = vst [vmem:[%s1229_s26 + $0x80] sm:$0xff] %v774_v53  ;;  %v723_v57 = vmul.f32 %v1215_v41, %v526_v55  ;;  %v731_v58 = vmul.f32 %v1215_v41, %v550_v56 }
  0xa7   : > { %814 = vst [vmem:[%s1229_s26 + $0xc0] sm:$0xff] %v782_v54 }
  0xa8   : > { %v759_v59 = vadd.f32 %v1220_v42, %v723_v57  ;;  %v767_v60 = vadd.f32 %v1220_v42, %v731_v58 }
  0xa9   : > { %v574_v61 = vpop.f32.mrf.mxu2  ;;  %v598_v62 = vpop.f32.mrf.mxu3 }
  0xaa   : > { %791 = vst [vmem:[%s1229_s26 + $0x8] sm:$0xff] %v759_v59  ;;  %v739_v63 = vmul.f32 %v1215_v41, %v574_v61  ;;  %v747_v0 = vmul.f32 %v1215_v41, %v598_v62 }
  0xab   : > { %799 = vst [vmem:[%s1229_s26 + $0x48] sm:$0xff] %v767_v60 }
  0xac   : > { %v775_v1 = vadd.f32 %v1220_v42, %v739_v63  ;;  %v783_v2 = vadd.f32 %v1220_v42, %v747_v0 }
  0xad   : > { %v529_v3 = vpop.f32.mrf.mxu0  ;;  %v553_v4 = vpop.f32.mrf.mxu1 }
  0xae   : > { %807 = vst [vmem:[%s1229_s26 + $0x88] sm:$0xff] %v775_v1  ;;  %v724_v5 = vmul.f32 %v1215_v41, %v529_v3  ;;  %v732_v6 = vmul.f32 %v1215_v41, %v553_v4 }
  0xaf   : > { %815 = vst [vmem:[%s1229_s26 + $0xc8] sm:$0xff] %v783_v2 }
  0xb0   : > { %v760_v7 = vadd.f32 %v1220_v42, %v724_v5  ;;  %v768_v8 = vadd.f32 %v1220_v42, %v732_v6 }
  0xb1   : > { %v577_v9 = vpop.f32.mrf.mxu2  ;;  %v601_v10 = vpop.f32.mrf.mxu3 }
  0xb2   : > { %792 = vst [vmem:[%s1229_s26 + $0x10] sm:$0xff] %v760_v7  ;;  %v740_v11 = vmul.f32 %v1215_v41, %v577_v9  ;;  %v748_v12 = vmul.f32 %v1215_v41, %v601_v10 }
  0xb3   : > { %800 = vst [vmem:[%s1229_s26 + $0x50] sm:$0xff] %v768_v8 }
  0xb4   : > { %v776_v13 = vadd.f32 %v1220_v42, %v740_v11  ;;  %v784_v14 = vadd.f32 %v1220_v42, %v748_v12 }
  0xb5   : > { %v532_v15 = vpop.f32.mrf.mxu0  ;;  %v556_v16 = vpop.f32.mrf.mxu1 }
  0xb6   : > { %808 = vst [vmem:[%s1229_s26 + $0x90] sm:$0xff] %v776_v13  ;;  %v725_v17 = vmul.f32 %v1215_v41, %v532_v15  ;;  %v733_v18 = vmul.f32 %v1215_v41, %v556_v16 }
  0xb7   : > { %816 = vst [vmem:[%s1229_s26 + $0xd0] sm:$0xff] %v784_v14 }
  0xb8   : > { %v761_v19 = vadd.f32 %v1220_v42, %v725_v17  ;;  %v769_v20 = vadd.f32 %v1220_v42, %v733_v18 }
  0xb9   : > { %v580_v21 = vpop.f32.mrf.mxu2  ;;  %v604_v22 = vpop.f32.mrf.mxu3 }
  0xba   : > { %793 = vst [vmem:[%s1229_s26 + $0x18] sm:$0xff] %v761_v19  ;;  %v741_v23 = vmul.f32 %v1215_v41, %v580_v21  ;;  %v749_v24 = vmul.f32 %v1215_v41, %v604_v22 }
  0xbb   : > { %801 = vst [vmem:[%s1229_s26 + $0x58] sm:$0xff] %v769_v20 }
  0xbc   : > { %v777_v25 = vadd.f32 %v1220_v42, %v741_v23  ;;  %v785_v26 = vadd.f32 %v1220_v42, %v749_v24 }
  0xbd   : > { %v535_v27 = vpop.f32.mrf.mxu0  ;;  %v559_v28 = vpop.f32.mrf.mxu1 }
  0xbe   : > { %809 = vst [vmem:[%s1229_s26 + $0x98] sm:$0xff] %v777_v25  ;;  %v726_v29 = vmul.f32 %v1215_v41, %v535_v27  ;;  %v734_v30 = vmul.f32 %v1215_v41, %v559_v28 }
  0xbf   : > { %817 = vst [vmem:[%s1229_s26 + $0xd8] sm:$0xff] %v785_v26 }
  0xc0   : > { %v762_v31 = vadd.f32 %v1220_v42, %v726_v29  ;;  %v770_v32 = vadd.f32 %v1220_v42, %v734_v30 }
  0xc1   : > { %v583_v33 = vpop.f32.mrf.mxu2  ;;  %v607_v34 = vpop.f32.mrf.mxu3 }
  0xc2   : > { %794 = vst [vmem:[%s1229_s26 + $0x20] sm:$0xff] %v762_v31  ;;  %v742_v35 = vmul.f32 %v1215_v41, %v583_v33  ;;  %v750_v36 = vmul.f32 %v1215_v41, %v607_v34 }
  0xc3   : > { %802 = vst [vmem:[%s1229_s26 + $0x60] sm:$0xff] %v770_v32 }
  0xc4   : > { %v778_v37 = vadd.f32 %v1220_v42, %v742_v35  ;;  %v786_v38 = vadd.f32 %v1220_v42, %v750_v36 }
  0xc5   : > { %v538_v39 = vpop.f32.mrf.mxu0  ;;  %v562_v40 = vpop.f32.mrf.mxu1 }
  0xc6   : > { %810 = vst [vmem:[%s1229_s26 + $0xa0] sm:$0xff] %v778_v37  ;;  %v727_v43 = vmul.f32 %v1215_v41, %v538_v39  ;;  %v735_v44 = vmul.f32 %v1215_v41, %v562_v40 }
  0xc7   : > { %818 = vst [vmem:[%s1229_s26 + $0xe0] sm:$0xff] %v786_v38 }
  0xc8   : > { %v763_v45 = vadd.f32 %v1220_v42, %v727_v43  ;;  %v771_v46 = vadd.f32 %v1220_v42, %v735_v44 }
  0xc9   : > { %v586_v47 = vpop.f32.mrf.mxu2  ;;  %v610_v48 = vpop.f32.mrf.mxu3 }
  0xca   : > { %795 = vst [vmem:[%s1229_s26 + $0x28] sm:$0xff] %v763_v45  ;;  %v743_v49 = vmul.f32 %v1215_v41, %v586_v47  ;;  %v751_v50 = vmul.f32 %v1215_v41, %v610_v48 }
  0xcb   : > { %803 = vst [vmem:[%s1229_s26 + $0x68] sm:$0xff] %v771_v46 }
  0xcc   : > { %v779_v51 = vadd.f32 %v1220_v42, %v743_v49  ;;  %v787_v52 = vadd.f32 %v1220_v42, %v751_v50 }
  0xcd   : > { %v541_v53 = vpop.f32.mrf.mxu0  ;;  %v565_v54 = vpop.f32.mrf.mxu1 }
  0xce   : > { %811 = vst [vmem:[%s1229_s26 + $0xa8] sm:$0xff] %v779_v51  ;;  %v728_v55 = vmul.f32 %v1215_v41, %v541_v53  ;;  %v736_v56 = vmul.f32 %v1215_v41, %v565_v54 }
  0xcf   : > { %819 = vst [vmem:[%s1229_s26 + $0xe8] sm:$0xff] %v787_v52 }
  0xd0   : > { %v764_v57 = vadd.f32 %v1220_v42, %v728_v55  ;;  %v772_v58 = vadd.f32 %v1220_v42, %v736_v56 }
  0xd1   : > { %v589_v59 = vpop.f32.mrf.mxu2  ;;  %v613_v60 = vpop.f32.mrf.mxu3 }
  0xd2   : > { %796 = vst [vmem:[%s1229_s26 + $0x30] sm:$0xff] %v764_v57  ;;  %v744_v61 = vmul.f32 %v1215_v41, %v589_v59  ;;  %v752_v62 = vmul.f32 %v1215_v41, %v613_v60 }
  0xd3   : > { %804 = vst [vmem:[%s1229_s26 + $0x70] sm:$0xff] %v772_v58 }
  0xd4   : > { %v780_v63 = vadd.f32 %v1220_v42, %v744_v61  ;;  %v788_v0 = vadd.f32 %v1220_v42, %v752_v62 }
  0xd5   : > { %v544_v1 = vpop.f32.mrf.mxu0  ;;  %v568_v2 = vpop.f32.mrf.mxu1 }
  0xd6   : > { %812 = vst [vmem:[%s1229_s26 + $0xb0] sm:$0xff] %v780_v63  ;;  %v729_v3 = vmul.f32 %v1215_v41, %v544_v1  ;;  %v737_v4 = vmul.f32 %v1215_v41, %v568_v2 }
  0xd7   : > { %820 = vst [vmem:[%s1229_s26 + $0xf0] sm:$0xff] %v788_v0 }
  0xd8   : > { %v765_v5 = vadd.f32 %v1220_v42, %v729_v3  ;;  %v773_v6 = vadd.f32 %v1220_v42, %v737_v4 }
  0xd9   : > { %v592_v7 = vpop.f32.mrf.mxu2  ;;  %v616_v8 = vpop.f32.mrf.mxu3 }
  0xda   : > { %797 = vst [vmem:[%s1229_s26 + $0x38] sm:$0xff] %v765_v5  ;;  %v745_v9 = vmul.f32 %v1215_v41, %v592_v7  ;;  %v753_v10 = vmul.f32 %v1215_v41, %v616_v8 }
  0xdb   : > { %805 = vst [vmem:[%s1229_s26 + $0x78] sm:$0xff] %v773_v6 }
  0xdc   : > { %v781_v11 = vadd.f32 %v1220_v42, %v745_v9  ;;  %v789_v12 = vadd.f32 %v1220_v42, %v753_v10 }
  0xde   : > { %813 = vst [vmem:[%s1229_s26 + $0xb8] sm:$0xff] %v781_v11 }
  0xdf   : > { %821 = vst [vmem:[%s1229_s26 + $0xf8] sm:$0xff] %v789_v12 }
  0xe0 PF: > { %s14_s17 = sadd.s32 1, %s1066_s17   ;;  %s1339_s15 = smov %s1062_s16 }
  0xe1   : > { %p11_p5 = scmp.ge.s32.totalorder %s14_s17, 4   ;;  %s1340_s16 = smov %s1342_s18 }
  0xe3   :  { %13 = sbr.rel (!%p11_p5) target bundleno = 2 (0x2), region = 83 }

// kernel: _lambda_.27
= control target key start
LH: loop header
LB: loop body
LE: loop exit
PB: predicated region body
PF: predicated region fallthrough
CT: control target
= control target key end

     0   :  { %vm73_vm0 = vcmask 261120   ;;  %s501_s1 = inlined_call_operand.vmem [shape: f32[32,128], index: 1, kind: input, shape index: {}]   ;;  %s502_s0 = inlined_call_operand.vmem [shape: f32[128,32], index: 0, kind: input, shape index: {}]   ;;  %s503_s2 = inlined_call_operand.vmem [shape: f32[1,128], index: 2, kind: input, shape index: {}]   ;;  %s504_s3 = inlined_call_operand.vmem [shape: f32[1,128], index: 3, kind: input, shape index: {}]   ;;  %s505_s4 = inlined_call_operand.vmem [shape: f32[128,128], index: 4, kind: output, shape index: {}]  }
   0x1   :  { %v72_v0 = vld [vmem:[%s501_s1 + $0x18] sm:$0xff]  ;;  %v71_v1 = vld [vmem:[%s501_s1 + $0x10] sm:$0xff]  ;;  %v70_v2 = vld [vmem:[%s501_s1 + $0x8] sm:$0xff] }
   0x2   :  { %315 = vmatpush.msra.mxu2 %v72_v0  ;;  %316 = vmatpush.msra.mxu3 %v72_v0  ;;  %v69_v3 = vld [vmem:[%s501_s1] sm:$0xff]  ;;  %v62_v8 = vld [vmem:[%s502_s0 + $0x48] sm:$0xff]  ;;  %v63_v12 = vld [vmem:[%s502_s0 + $0x50] sm:$0xff] }
   0x3   :  { %134 = vmatpush.msra.mxu0 %v72_v0  ;;  %314 = vmatpush.msra.mxu1 %v72_v0  ;;  %v61_v4 = vld [vmem:[%s502_s0 + $0x40] sm:$0xff]  ;;  %v66_v9 = vld [vmem:[%s502_s0 + $0x68] sm:$0xff]  ;;  %v67_v13 = vld [vmem:[%s502_s0 + $0x70] sm:$0xff] }
   0x4   :  { %318 = vmatpush.msra.mxu2 %v71_v1  ;;  %319 = vmatpush.msra.mxu3 %v71_v1  ;;  %v65_v5 = vld [vmem:[%s502_s0 + $0x60] sm:$0xff]  ;;  %v54_v10 = vld [vmem:[%s502_s0 + $0x8] sm:$0xff]  ;;  %v55_v14 = vld [vmem:[%s502_s0 + $0x10] sm:$0xff] }
   0x5   :  { %135 = vmatpush.msra.mxu0 %v71_v1  ;;  %317 = vmatpush.msra.mxu1 %v71_v1  ;;  %v53_v6 = vld [vmem:[%s502_s0] sm:$0xff]  ;;  %v58_v11 = vld [vmem:[%s502_s0 + $0x28] sm:$0xff]  ;;  %v59_v15 = vld [vmem:[%s502_s0 + $0x30] sm:$0xff] }
   0x6   :  { %321 = vmatpush.msra.mxu2 %v70_v2  ;;  %322 = vmatpush.msra.mxu3 %v70_v2  ;;  %v57_v7 = vld [vmem:[%s502_s0 + $0x20] sm:$0xff]  ;;  %v64_v16 = vld [vmem:[%s502_s0 + $0x58] sm:$0xff] }
   0x7   :  { %136 = vmatpush.msra.mxu0 %v70_v2  ;;  %320 = vmatpush.msra.mxu1 %v70_v2  ;;  %v68_v17 = vld [vmem:[%s502_s0 + $0x78] sm:$0xff]  ;;  %v326_v20 = vld [vmem:[%s503_s2] ss:$0 sm:$0xff] }
   0x8   :  { %324 = vmatpush.msra.mxu2 %v69_v3  ;;  %325 = vmatpush.msra.mxu3 %v69_v3  ;;  %v56_v18 = vld [vmem:[%s502_s0 + $0x18] sm:$0xff]  ;;  %v435_v21 = vld [vmem:[%s504_s3] ss:$0 sm:$0xff] }
   0x9   :  { %306 = vmatmul.msk.f32.vlgmr.msra.gmra.mxu2 %vm73_vm0, %v61_v4  ;;  %310 = vmatmul.msk.f32.vlgmr.msra.gmra.mxu3 %vm73_vm0, %v65_v5  ;;  %v60_v19 = vld [vmem:[%s502_s0 + $0x38] sm:$0xff] }
   0xa   :  { %137 = vmatpush.msra.mxu0 %v69_v3  ;;  %323 = vmatpush.msra.mxu1 %v69_v3 }
   0xb   :  { %298 = vmatmul.msk.f32.vlgmr.msra.gmra.mxu0 %vm73_vm0, %v53_v6  ;;  %302 = vmatmul.msk.f32.vlgmr.msra.gmra.mxu1 %vm73_vm0, %v57_v7 }
  0x11   :  { %307 = vmatmul.msk.f32.gmra.mxu2 %vm73_vm0, %v62_v8  ;;  %311 = vmatmul.msk.f32.gmra.mxu3 %vm73_vm0, %v66_v9 }
  0x13   :  { %299 = vmatmul.msk.f32.gmra.mxu0 %vm73_vm0, %v54_v10  ;;  %303 = vmatmul.msk.f32.gmra.mxu1 %vm73_vm0, %v58_v11 }
  0x19   :  { %308 = vmatmul.msk.f32.gmra.mxu2 %vm73_vm0, %v63_v12  ;;  %312 = vmatmul.msk.f32.gmra.mxu3 %vm73_vm0, %v67_v13 }
  0x1b   :  { %300 = vmatmul.msk.f32.gmra.mxu0 %vm73_vm0, %v55_v14  ;;  %304 = vmatmul.msk.f32.gmra.mxu1 %vm73_vm0, %v59_v15 }
  0x21   :  { %309 = vmatmul.msk.f32.gmra.mxu2 %vm73_vm0, %v64_v16  ;;  %313 = vmatmul.msk.f32.gmra.mxu3 %vm73_vm0, %v68_v17 }
  0x23   :  { %301 = vmatmul.msk.f32.gmra.mxu0 %vm73_vm0, %v56_v18  ;;  %305 = vmatmul.msk.f32.gmra.mxu1 %vm73_vm0, %v60_v19 }
  0x88   :  { %v139_v22 = vpop.f32.mrf.mxu0  ;;  %v151_v23 = vpop.f32.mrf.mxu1 }
  0x89   :  { %v242_v24 = vmul.f32 %v326_v20, %v139_v22  ;;  %v246_v25 = vmul.f32 %v326_v20, %v151_v23 }
  0x8b   :  { %v262_v26 = vadd.f32 %v435_v21, %v242_v24  ;;  %v266_v27 = vadd.f32 %v435_v21, %v246_v25 }
  0x8c   :  { %v163_v28 = vpop.f32.mrf.mxu2  ;;  %v175_v29 = vpop.f32.mrf.mxu3 }
  0x8d   :  { %278 = vst [vmem:[%s505_s4] sm:$0xff] %v262_v26  ;;  %v250_v30 = vmul.f32 %v326_v20, %v163_v28  ;;  %v254_v31 = vmul.f32 %v326_v20, %v175_v29 }
  0x8e   :  { %282 = vst [vmem:[%s505_s4 + $0x20] sm:$0xff] %v266_v27 }
  0x8f   :  { %v270_v32 = vadd.f32 %v435_v21, %v250_v30  ;;  %v274_v33 = vadd.f32 %v435_v21, %v254_v31 }
  0x90   :  { %v142_v34 = vpop.f32.mrf.mxu0  ;;  %v154_v35 = vpop.f32.mrf.mxu1 }
  0x91   :  { %286 = vst [vmem:[%s505_s4 + $0x40] sm:$0xff] %v270_v32  ;;  %v243_v36 = vmul.f32 %v326_v20, %v142_v34  ;;  %v247_v37 = vmul.f32 %v326_v20, %v154_v35 }
  0x92   :  { %290 = vst [vmem:[%s505_s4 + $0x60] sm:$0xff] %v274_v33 }
  0x93   :  { %v263_v38 = vadd.f32 %v435_v21, %v243_v36  ;;  %v267_v39 = vadd.f32 %v435_v21, %v247_v37 }
  0x94   :  { %v166_v40 = vpop.f32.mrf.mxu2  ;;  %v178_v41 = vpop.f32.mrf.mxu3 }
  0x95   :  { %279 = vst [vmem:[%s505_s4 + $0x8] sm:$0xff] %v263_v38  ;;  %v251_v42 = vmul.f32 %v326_v20, %v166_v40  ;;  %v255_v43 = vmul.f32 %v326_v20, %v178_v41 }
  0x96   :  { %283 = vst [vmem:[%s505_s4 + $0x28] sm:$0xff] %v267_v39 }
  0x97   :  { %v271_v44 = vadd.f32 %v435_v21, %v251_v42  ;;  %v275_v45 = vadd.f32 %v435_v21, %v255_v43 }
  0x98   :  { %v145_v46 = vpop.f32.mrf.mxu0  ;;  %v157_v47 = vpop.f32.mrf.mxu1 }
  0x99   :  { %287 = vst [vmem:[%s505_s4 + $0x48] sm:$0xff] %v271_v44  ;;  %v244_v48 = vmul.f32 %v326_v20, %v145_v46  ;;  %v248_v49 = vmul.f32 %v326_v20, %v157_v47 }
  0x9a   :  { %291 = vst [vmem:[%s505_s4 + $0x68] sm:$0xff] %v275_v45 }
  0x9b   :  { %v264_v50 = vadd.f32 %v435_v21, %v244_v48  ;;  %v268_v51 = vadd.f32 %v435_v21, %v248_v49 }
  0x9c   :  { %v169_v52 = vpop.f32.mrf.mxu2  ;;  %v181_v53 = vpop.f32.mrf.mxu3 }
  0x9d   :  { %280 = vst [vmem:[%s505_s4 + $0x10] sm:$0xff] %v264_v50  ;;  %v252_v54 = vmul.f32 %v326_v20, %v169_v52  ;;  %v256_v55 = vmul.f32 %v326_v20, %v181_v53 }
  0x9e   :  { %284 = vst [vmem:[%s505_s4 + $0x30] sm:$0xff] %v268_v51 }
  0x9f   :  { %v272_v56 = vadd.f32 %v435_v21, %v252_v54  ;;  %v276_v57 = vadd.f32 %v435_v21, %v256_v55 }
  0xa0   :  { %v148_v58 = vpop.f32.mrf.mxu0  ;;  %v160_v59 = vpop.f32.mrf.mxu1 }
  0xa1   :  { %288 = vst [vmem:[%s505_s4 + $0x50] sm:$0xff] %v272_v56  ;;  %v245_v60 = vmul.f32 %v326_v20, %v148_v58  ;;  %v249_v61 = vmul.f32 %v326_v20, %v160_v59 }
  0xa2   :  { %292 = vst [vmem:[%s505_s4 + $0x70] sm:$0xff] %v276_v57 }
  0xa3   :  { %v265_v62 = vadd.f32 %v435_v21, %v245_v60  ;;  %v269_v63 = vadd.f32 %v435_v21, %v249_v61 }
  0xa4   :  { %v172_v0 = vpop.f32.mrf.mxu2  ;;  %v184_v1 = vpop.f32.mrf.mxu3 }
  0xa5   :  { %281 = vst [vmem:[%s505_s4 + $0x18] sm:$0xff] %v265_v62  ;;  %v253_v2 = vmul.f32 %v326_v20, %v172_v0  ;;  %v257_v3 = vmul.f32 %v326_v20, %v184_v1 }
  0xa6   :  { %285 = vst [vmem:[%s505_s4 + $0x38] sm:$0xff] %v269_v63 }
  0xa7   :  { %v273_v4 = vadd.f32 %v435_v21, %v253_v2  ;;  %v277_v5 = vadd.f32 %v435_v21, %v257_v3 }
  0xa9   :  { %289 = vst [vmem:[%s505_s4 + $0x58] sm:$0xff] %v273_v4 }
  0xaa   :  { %293 = vst [vmem:[%s505_s4 + $0x78] sm:$0xff] %v277_v5 }

// kernel: _lambda_.26
= control target key start
LH: loop header
LB: loop body
LE: loop exit
PB: predicated region body
PF: predicated region fallthrough
CT: control target
= control target key end

     0   :  { %vm167_vm0 = vcmask 130048   ;;  %s1078_s1 = inlined_call_operand.vmem [shape: f32[400,128], index: 1, kind: input, shape index: {}]   ;;  %s1079_s0 = inlined_call_operand.vmem [shape: f32[128,400], index: 0, kind: input, shape index: {}]   ;;  %s1080_s2 = inlined_call_operand.vmem [shape: f32[1,128], index: 2, kind: input, shape index: {}]   ;;  %s1081_s3 = inlined_call_operand.vmem [shape: f32[1,128], index: 3, kind: input, shape index: {}]   ;;  %s1082_s4 = inlined_call_operand.vmem [shape: f32[128,128], index: 4, kind: output, shape index: {}]  }
   0x1   :  { %v164_v0 = vld [vmem:[%s1078_s1 + $0x178] sm:$0xff]  ;;  %v163_v1 = vld [vmem:[%s1078_s1 + $0x170] sm:$0xff]  ;;  %v162_v5 = vld [vmem:[%s1078_s1 + $0x168] sm:$0xff] }
   0x2   :  { %v132_v2 = vld [vmem:[%s1078_s1 + $0x78] sm:$0xff]  ;;  %346 = vmatpush.msra.mxu2 %v164_v0  ;;  %v131_v4 = vld [vmem:[%s1078_s1 + $0x70] sm:$0xff]  ;;  %v130_v7 = vld [vmem:[%s1078_s1 + $0x68] sm:$0xff] }
   0x3   :  { %216 = vmatpush.msra.mxu0 %v132_v2  ;;  %v148_v3 = vld [vmem:[%s1078_s1 + $0xf8] sm:$0xff]  ;;  %v147_v6 = vld [vmem:[%s1078_s1 + $0xf0] sm:$0xff]  ;;  %v146_v8 = vld [vmem:[%s1078_s1 + $0xe8] sm:$0xff] }
   0x4   :  { %281 = vmatpush.msra.mxu1 %v148_v3  ;;  %347 = vmatpush.msra.mxu2 %v163_v1  ;;  %v161_v9 = vld [vmem:[%s1078_s1 + $0x160] sm:$0xff]  ;;  %v160_v12 = vld [vmem:[%s1078_s1 + $0x158] sm:$0xff]  ;;  %v159_v15 = vld [vmem:[%s1078_s1 + $0x150] sm:$0xff] }
   0x5   :  { %217 = vmatpush.msra.mxu0 %v131_v4  ;;  %v129_v10 = vld [vmem:[%s1078_s1 + $0x60] sm:$0xff]  ;;  %v128_v13 = vld [vmem:[%s1078_s1 + $0x58] sm:$0xff]  ;;  %v127_v16 = vld [vmem:[%s1078_s1 + $0x50] sm:$0xff] }
   0x6   :  { %282 = vmatpush.msra.mxu1 %v147_v6  ;;  %348 = vmatpush.msra.mxu2 %v162_v5  ;;  %v145_v11 = vld [vmem:[%s1078_s1 + $0xe0] sm:$0xff]  ;;  %v144_v14 = vld [vmem:[%s1078_s1 + $0xd8] sm:$0xff]  ;;  %v143_v17 = vld [vmem:[%s1078_s1 + $0xd0] sm:$0xff] }
   0x7   :  { %218 = vmatpush.msra.mxu0 %v130_v7  ;;  %v158_v18 = vld [vmem:[%s1078_s1 + $0x148] sm:$0xff]  ;;  %v157_v21 = vld [vmem:[%s1078_s1 + $0x140] sm:$0xff]  ;;  %v156_v24 = vld [vmem:[%s1078_s1 + $0x138] sm:$0xff] }
   0x8   :  { %283 = vmatpush.msra.mxu1 %v146_v8  ;;  %349 = vmatpush.msra.mxu2 %v161_v9  ;;  %v126_v19 = vld [vmem:[%s1078_s1 + $0x48] sm:$0xff]  ;;  %v125_v22 = vld [vmem:[%s1078_s1 + $0x40] sm:$0xff]  ;;  %v124_v25 = vld [vmem:[%s1078_s1 + $0x38] sm:$0xff] }
   0x9   :  { %219 = vmatpush.msra.mxu0 %v129_v10  ;;  %v142_v20 = vld [vmem:[%s1078_s1 + $0xc8] sm:$0xff]  ;;  %v141_v23 = vld [vmem:[%s1078_s1 + $0xc0] sm:$0xff]  ;;  %v140_v27 = vld [vmem:[%s1078_s1 + $0xb8] sm:$0xff] }
   0xa   :  { %284 = vmatpush.msra.mxu1 %v145_v11  ;;  %350 = vmatpush.msra.mxu2 %v160_v12  ;;  %v166_v26 = vld [vmem:[%s1078_s1 + $0x188] sm:$0xff]  ;;  %v155_v28 = vld [vmem:[%s1078_s1 + $0x130] sm:$0xff]  ;;  %v165_v30 = vld [vmem:[%s1078_s1 + $0x180] sm:$0xff] }
   0xb   :  { %220 = vmatpush.msra.mxu0 %v128_v13  ;;  %v123_v29 = vld [vmem:[%s1078_s1 + $0x30] sm:$0xff]  ;;  %425 = vmatpush.msra.mxu3 %v166_v26  ;;  %v56_v32 = vld [vmem:[%s1079_s0 + $0x18] sm:$0xff]  ;;  %v154_v33 = vld [vmem:[%s1078_s1 + $0x128] sm:$0xff] }
   0xc   :  { %285 = vmatpush.msra.mxu1 %v144_v14  ;;  %351 = vmatpush.msra.mxu2 %v159_v15  ;;  %v139_v31 = vld [vmem:[%s1078_s1 + $0xb0] sm:$0xff]  ;;  %v122_v34 = vld [vmem:[%s1078_s1 + $0x28] sm:$0xff]  ;;  %v153_v36 = vld [vmem:[%s1078_s1 + $0x120] sm:$0xff] }
   0xd   :  { %221 = vmatpush.msra.mxu0 %v127_v16  ;;  %426 = vmatpush.msra.mxu3 %v165_v30  ;;  %v138_v35 = vld [vmem:[%s1078_s1 + $0xa8] sm:$0xff]  ;;  %v121_v37 = vld [vmem:[%s1078_s1 + $0x20] sm:$0xff]  ;;  %v152_v39 = vld [vmem:[%s1078_s1 + $0x118] sm:$0xff] }
   0xe   :  { %286 = vmatpush.msra.mxu1 %v143_v17  ;;  %352 = vmatpush.msra.mxu2 %v158_v18  ;;  %v137_v38 = vld [vmem:[%s1078_s1 + $0xa0] sm:$0xff]  ;;  %v120_v40 = vld [vmem:[%s1078_s1 + $0x18] sm:$0xff]  ;;  %v151_v42 = vld [vmem:[%s1078_s1 + $0x110] sm:$0xff] }
   0xf   :  { %222 = vmatpush.msra.mxu0 %v126_v19  ;;  %587 = vmatmul.msk.f32.vlgmr.msra.gmra.mxu3 %vm167_vm0, %v56_v32  ;;  %v136_v41 = vld [vmem:[%s1078_s1 + $0x98] sm:$0xff]  ;;  %v119_v43 = vld [vmem:[%s1078_s1 + $0x10] sm:$0xff]  ;;  %v150_v46 = vld [vmem:[%s1078_s1 + $0x108] sm:$0xff] }
  0x10   :  { %287 = vmatpush.msra.mxu1 %v142_v20  ;;  %353 = vmatpush.msra.mxu2 %v157_v21  ;;  %v135_v44 = vld [vmem:[%s1078_s1 + $0x90] sm:$0xff]  ;;  %v60_v45 = vld [vmem:[%s1079_s0 + $0x38] sm:$0xff]  ;;  %v118_v47 = vld [vmem:[%s1078_s1 + $0x8] sm:$0xff] }
  0x11   :  { %223 = vmatpush.msra.mxu0 %v125_v22  ;;  %v134_v48 = vld [vmem:[%s1078_s1 + $0x88] sm:$0xff]  ;;  %v149_v49 = vld [vmem:[%s1078_s1 + $0x100] sm:$0xff]  ;;  %v55_v51 = vld [vmem:[%s1079_s0 + $0x10] sm:$0xff] }
  0x12   :  { %288 = vmatpush.msra.mxu1 %v141_v23  ;;  %354 = vmatpush.msra.mxu2 %v156_v24  ;;  %v117_v50 = vld [vmem:[%s1078_s1] sm:$0xff]  ;;  %v54_v54 = vld [vmem:[%s1079_s0 + $0x8] sm:$0xff]  ;;  %v64_v55 = vld [vmem:[%s1079_s0 + $0x58] sm:$0xff] }
  0x13   :  { %224 = vmatpush.msra.mxu0 %v124_v25  ;;  %v133_v52 = vld [vmem:[%s1078_s1 + $0x80] sm:$0xff]  ;;  %v59_v56 = vld [vmem:[%s1079_s0 + $0x30] sm:$0xff]  ;;  %v58_v58 = vld [vmem:[%s1079_s0 + $0x28] sm:$0xff] }
  0x14   :  { %289 = vmatpush.msra.mxu1 %v140_v27  ;;  %355 = vmatpush.msra.mxu2 %v155_v28  ;;  %v53_v53 = vld [vmem:[%s1079_s0] sm:$0xff]  ;;  %v68_v59 = vld [vmem:[%s1079_s0 + $0x78] sm:$0xff]  ;;  %v63_v60 = vld [vmem:[%s1079_s0 + $0x50] sm:$0xff] }
  0x15   :  { %225 = vmatpush.msra.mxu0 %v123_v29  ;;  %v57_v57 = vld [vmem:[%s1079_s0 + $0x20] sm:$0xff]  ;;  %v62_v62 = vld [vmem:[%s1079_s0 + $0x48] sm:$0xff]  ;;  %v72_v63 = vld [vmem:[%s1079_s0 + $0x98] sm:$0xff] }
  0x16   :  { %290 = vmatpush.msra.mxu1 %v139_v31  ;;  %356 = vmatpush.msra.mxu2 %v154_v33  ;;  %v61_v61 = vld [vmem:[%s1079_s0 + $0x40] sm:$0xff]  ;;  %v67_v0 = vld [vmem:[%s1079_s0 + $0x70] sm:$0xff]  ;;  %v66_v2 = vld [vmem:[%s1079_s0 + $0x68] sm:$0xff] }
  0x17   :  { %226 = vmatpush.msra.mxu0 %v122_v34  ;;  %588 = vmatmul.msk.f32.gmra.mxu3 %vm167_vm0, %v60_v45  ;;  %v65_v1 = vld [vmem:[%s1079_s0 + $0x60] sm:$0xff]  ;;  %v76_v3 = vld [vmem:[%s1079_s0 + $0xb8] sm:$0xff]  ;;  %v71_v4 = vld [vmem:[%s1079_s0 + $0x90] sm:$0xff] }
  0x18   :  { %291 = vmatpush.msra.mxu1 %v138_v35  ;;  %357 = vmatpush.msra.mxu2 %v153_v36  ;;  %v69_v5 = vld [vmem:[%s1079_s0 + $0x80] sm:$0xff]  ;;  %v70_v6 = vld [vmem:[%s1079_s0 + $0x88] sm:$0xff]  ;;  %v80_v7 = vld [vmem:[%s1079_s0 + $0xd8] sm:$0xff] }
  0x19   :  { %227 = vmatpush.msra.mxu0 %v121_v37  ;;  %v75_v8 = vld [vmem:[%s1079_s0 + $0xb0] sm:$0xff]  ;;  %v73_v9 = vld [vmem:[%s1079_s0 + $0xa0] sm:$0xff]  ;;  %v74_v10 = vld [vmem:[%s1079_s0 + $0xa8] sm:$0xff] }
  0x1a   :  { %292 = vmatpush.msra.mxu1 %v137_v38  ;;  %358 = vmatpush.msra.mxu2 %v152_v39  ;;  %v84_v11 = vld [vmem:[%s1079_s0 + $0xf8] sm:$0xff]  ;;  %v79_v12 = vld [vmem:[%s1079_s0 + $0xd0] sm:$0xff]  ;;  %v77_v13 = vld [vmem:[%s1079_s0 + $0xc0] sm:$0xff] }
  0x1b   :  { %228 = vmatpush.msra.mxu0 %v120_v40  ;;  %v78_v14 = vld [vmem:[%s1079_s0 + $0xc8] sm:$0xff]  ;;  %v88_v15 = vld [vmem:[%s1079_s0 + $0x118] sm:$0xff]  ;;  %v83_v16 = vld [vmem:[%s1079_s0 + $0xf0] sm:$0xff] }
  0x1c   :  { %293 = vmatpush.msra.mxu1 %v136_v41  ;;  %359 = vmatpush.msra.mxu2 %v151_v42  ;;  %v81_v17 = vld [vmem:[%s1079_s0 + $0xe0] sm:$0xff]  ;;  %v82_v18 = vld [vmem:[%s1079_s0 + $0xe8] sm:$0xff]  ;;  %v92_v19 = vld [vmem:[%s1079_s0 + $0x138] sm:$0xff] }
  0x1d   :  { %229 = vmatpush.msra.mxu0 %v119_v43  ;;  %v87_v20 = vld [vmem:[%s1079_s0 + $0x110] sm:$0xff]  ;;  %v85_v21 = vld [vmem:[%s1079_s0 + $0x100] sm:$0xff]  ;;  %v86_v22 = vld [vmem:[%s1079_s0 + $0x108] sm:$0xff] }
  0x1e   :  { %294 = vmatpush.msra.mxu1 %v135_v44  ;;  %360 = vmatpush.msra.mxu2 %v150_v46  ;;  %v96_v23 = vld [vmem:[%s1079_s0 + $0x158] sm:$0xff]  ;;  %v91_v24 = vld [vmem:[%s1079_s0 + $0x130] sm:$0xff]  ;;  %v89_v25 = vld [vmem:[%s1079_s0 + $0x120] sm:$0xff] }
  0x1f   :  { %230 = vmatpush.msra.mxu0 %v118_v47  ;;  %589 = vmatmul.msk.f32.gmra.mxu3 %vm167_vm0, %v64_v55  ;;  %v90_v26 = vld [vmem:[%s1079_s0 + $0x128] sm:$0xff]  ;;  %v100_v27 = vld [vmem:[%s1079_s0 + $0x178] sm:$0xff]  ;;  %v95_v28 = vld [vmem:[%s1079_s0 + $0x150] sm:$0xff] }
  0x20   :  { %295 = vmatpush.msra.mxu1 %v134_v48  ;;  %361 = vmatpush.msra.mxu2 %v149_v49  ;;  %v93_v29 = vld [vmem:[%s1079_s0 + $0x140] sm:$0xff]  ;;  %v94_v30 = vld [vmem:[%s1079_s0 + $0x148] sm:$0xff]  ;;  %v104_v31 = vld [vmem:[%s1079_s0 + $0x198] sm:$0xff] }
  0x21   :  { %231 = vmatpush.msra.mxu0 %v117_v50  ;;  %362 = vmatmul.f32.vlgmr.msra.gmra.mxu2 %v55_v51  ;;  %v99_v32 = vld [vmem:[%s1079_s0 + $0x170] sm:$0xff]  ;;  %v97_v33 = vld [vmem:[%s1079_s0 + $0x160] sm:$0xff]  ;;  %v98_v34 = vld [vmem:[%s1079_s0 + $0x168] sm:$0xff] }
  0x22   :  { %296 = vmatpush.msra.mxu1 %v133_v52  ;;  %232 = vmatmul.f32.vlgmr.msra.gmra.mxu0 %v53_v53  ;;  %v108_v35 = vld [vmem:[%s1079_s0 + $0x1b8] sm:$0xff]  ;;  %v103_v36 = vld [vmem:[%s1079_s0 + $0x190] sm:$0xff]  ;;  %v101_v37 = vld [vmem:[%s1079_s0 + $0x180] sm:$0xff] }
  0x23   :  { %297 = vmatmul.f32.vlgmr.msra.gmra.mxu1 %v54_v54  ;;  %v102_v38 = vld [vmem:[%s1079_s0 + $0x188] sm:$0xff]  ;;  %v112_v39 = vld [vmem:[%s1079_s0 + $0x1d8] sm:$0xff]  ;;  %v107_v40 = vld [vmem:[%s1079_s0 + $0x1b0] sm:$0xff] }
  0x24   :  { %v105_v41 = vld [vmem:[%s1079_s0 + $0x1a0] sm:$0xff]  ;;  %v106_v42 = vld [vmem:[%s1079_s0 + $0x1a8] sm:$0xff]  ;;  %v116_v43 = vld [vmem:[%s1079_s0 + $0x1f8] sm:$0xff] }
  0x25   :  { %v111_v44 = vld [vmem:[%s1079_s0 + $0x1d0] sm:$0xff]  ;;  %v109_v45 = vld [vmem:[%s1079_s0 + $0x1c0] sm:$0xff]  ;;  %v110_v46 = vld [vmem:[%s1079_s0 + $0x1c8] sm:$0xff] }
  0x26   :  { %v115_v47 = vld [vmem:[%s1079_s0 + $0x1f0] sm:$0xff]  ;;  %v113_v48 = vld [vmem:[%s1079_s0 + $0x1e0] sm:$0xff]  ;;  %v114_v49 = vld [vmem:[%s1079_s0 + $0x1e8] sm:$0xff] }
  0x27   :  { %590 = vmatmul.msk.f32.gmra.mxu3 %vm167_vm0, %v68_v59  ;;  %v996_v59 = vld [vmem:[%s1081_s3] ss:$0 sm:$0xff] }
  0x29   :  { %365 = vmatmul.f32.gmra.mxu2 %v59_v56 }
  0x2a   :  { %235 = vmatmul.f32.gmra.mxu0 %v57_v57  ;;  %v991_v57 = vld [vmem:[%s1080_s2] ss:$0 sm:$0xff] }
  0x2b   :  { %300 = vmatmul.f32.gmra.mxu1 %v58_v58 }
  0x2f   :  { %591 = vmatmul.msk.f32.gmra.mxu3 %vm167_vm0, %v72_v63 }
  0x31   :  { %368 = vmatmul.f32.gmra.mxu2 %v63_v60 }
  0x32   :  { %238 = vmatmul.f32.gmra.mxu0 %v61_v61 }
  0x33   :  { %303 = vmatmul.f32.gmra.mxu1 %v62_v62 }
  0x37   :  { %592 = vmatmul.msk.f32.gmra.mxu3 %vm167_vm0, %v76_v3 }
  0x39   :  { %371 = vmatmul.f32.gmra.mxu2 %v67_v0 }
  0x3a   :  { %241 = vmatmul.f32.gmra.mxu0 %v65_v1 }
  0x3b   :  { %306 = vmatmul.f32.gmra.mxu1 %v66_v2 }
  0x3f   :  { %593 = vmatmul.msk.f32.gmra.mxu3 %vm167_vm0, %v80_v7 }
  0x41   :  { %374 = vmatmul.f32.gmra.mxu2 %v71_v4 }
  0x42   :  { %244 = vmatmul.f32.gmra.mxu0 %v69_v5 }
  0x43   :  { %309 = vmatmul.f32.gmra.mxu1 %v70_v6 }
  0x47   :  { %594 = vmatmul.msk.f32.gmra.mxu3 %vm167_vm0, %v84_v11 }
  0x49   :  { %377 = vmatmul.f32.gmra.mxu2 %v75_v8 }
  0x4a   :  { %247 = vmatmul.f32.gmra.mxu0 %v73_v9 }
  0x4b   :  { %312 = vmatmul.f32.gmra.mxu1 %v74_v10 }
  0x4f   :  { %595 = vmatmul.msk.f32.gmra.mxu3 %vm167_vm0, %v88_v15 }
  0x51   :  { %380 = vmatmul.f32.gmra.mxu2 %v79_v12 }
  0x52   :  { %250 = vmatmul.f32.gmra.mxu0 %v77_v13 }
  0x53   :  { %315 = vmatmul.f32.gmra.mxu1 %v78_v14 }
  0x57   :  { %596 = vmatmul.msk.f32.gmra.mxu3 %vm167_vm0, %v92_v19 }
  0x59   :  { %383 = vmatmul.f32.gmra.mxu2 %v83_v16 }
  0x5a   :  { %253 = vmatmul.f32.gmra.mxu0 %v81_v17 }
  0x5b   :  { %318 = vmatmul.f32.gmra.mxu1 %v82_v18 }
  0x5f   :  { %597 = vmatmul.msk.f32.gmra.mxu3 %vm167_vm0, %v96_v23 }
  0x61   :  { %386 = vmatmul.f32.gmra.mxu2 %v87_v20 }
  0x62   :  { %256 = vmatmul.f32.gmra.mxu0 %v85_v21 }
  0x63   :  { %321 = vmatmul.f32.gmra.mxu1 %v86_v22 }
  0x67   :  { %598 = vmatmul.msk.f32.gmra.mxu3 %vm167_vm0, %v100_v27 }
  0x69   :  { %389 = vmatmul.f32.gmra.mxu2 %v91_v24 }
  0x6a   :  { %259 = vmatmul.f32.gmra.mxu0 %v89_v25 }
  0x6b   :  { %324 = vmatmul.f32.gmra.mxu1 %v90_v26 }
  0x6f   :  { %599 = vmatmul.msk.f32.gmra.mxu3 %vm167_vm0, %v104_v31 }
  0x71   :  { %392 = vmatmul.f32.gmra.mxu2 %v95_v28 }
  0x72   :  { %262 = vmatmul.f32.gmra.mxu0 %v93_v29 }
  0x73   :  { %327 = vmatmul.f32.gmra.mxu1 %v94_v30 }
  0x77   :  { %600 = vmatmul.msk.f32.gmra.mxu3 %vm167_vm0, %v108_v35 }
  0x79   :  { %395 = vmatmul.f32.gmra.mxu2 %v99_v32 }
  0x7a   :  { %265 = vmatmul.f32.gmra.mxu0 %v97_v33 }
  0x7b   :  { %330 = vmatmul.f32.gmra.mxu1 %v98_v34 }
  0x7f   :  { %601 = vmatmul.msk.f32.gmra.mxu3 %vm167_vm0, %v112_v39 }
  0x81   :  { %398 = vmatmul.f32.gmra.mxu2 %v103_v36 }
  0x82   :  { %268 = vmatmul.f32.gmra.mxu0 %v101_v37 }
  0x83   :  { %333 = vmatmul.f32.gmra.mxu1 %v102_v38 }
  0x87   :  { %602 = vmatmul.msk.f32.gmra.mxu3 %vm167_vm0, %v116_v43 }
  0x89   :  { %401 = vmatmul.f32.gmra.mxu2 %v107_v40 }
  0x8a   :  { %271 = vmatmul.f32.gmra.mxu0 %v105_v41 }
  0x8b   :  { %336 = vmatmul.f32.gmra.mxu1 %v106_v42 }
  0x91   :  { %404 = vmatmul.f32.gmra.mxu2 %v111_v44 }
  0x92   :  { %274 = vmatmul.f32.gmra.mxu0 %v109_v45  ;;  %v428_v50 = vpop.f32.mrf.mxu3 }
  0x93   :  { %339 = vmatmul.f32.gmra.mxu1 %v110_v46 }
  0x99   :  { %407 = vmatmul.f32.gmra.mxu2 %v115_v47 }
  0x9a   :  { %277 = vmatmul.f32.gmra.mxu0 %v113_v48  ;;  %v431_v53 = vpop.f32.mrf.mxu3 }
  0x9b   :  { %342 = vmatmul.f32.gmra.mxu1 %v114_v49 }
  0x9f   :  { %v233_v51 = vpop.f32.mrf.mxu0 }
  0xa0   :  { %v298_v52 = vpop.f32.mrf.mxu1 }
  0xa1   :  { %v299_v54 = vadd.f32 %v298_v52, %v233_v51 }
  0xa2   :  { %v434_v62 = vpop.f32.mrf.mxu3 }
  0xa4   :  { %v363_v55 = vpop.f32.mrf.mxu2 }
  0xa5   :  { %v364_v56 = vadd.f32 %v363_v55, %v299_v54 }
  0xa7   :  { %v429_v58 = vadd.f32 %v428_v50, %v364_v56  ;;  %v236_v60 = vpop.f32.mrf.mxu0 }
  0xa8   :  { %v301_v61 = vpop.f32.mrf.mxu1 }
  0xa9   :  { %v531_v63 = vmul.f32 %v991_v57, %v429_v58  ;;  %v302_v0 = vadd.f32 %v301_v61, %v236_v60 }
  0xaa   :  { %v437_v7 = vpop.f32.mrf.mxu3 }
  0xab   :  { %v551_v1 = vadd.f32 %v996_v59, %v531_v63 }
  0xac   :  { %v366_v2 = vpop.f32.mrf.mxu2 }
  0xad   :  { %567 = vst [vmem:[%s1082_s4] sm:$0xff] %v551_v1  ;;  %v367_v3 = vadd.f32 %v366_v2, %v302_v0 }
  0xaf   :  { %v432_v4 = vadd.f32 %v431_v53, %v367_v3  ;;  %v239_v5 = vpop.f32.mrf.mxu0 }
  0xb0   :  { %v304_v6 = vpop.f32.mrf.mxu1 }
  0xb1   :  { %v532_v8 = vmul.f32 %v991_v57, %v432_v4  ;;  %v305_v9 = vadd.f32 %v304_v6, %v239_v5 }
  0xb2   :  { %v440_v16 = vpop.f32.mrf.mxu3 }
  0xb3   :  { %v552_v10 = vadd.f32 %v996_v59, %v532_v8 }
  0xb4   :  { %v369_v11 = vpop.f32.mrf.mxu2 }
  0xb5   :  { %568 = vst [vmem:[%s1082_s4 + $0x8] sm:$0xff] %v552_v10  ;;  %v370_v12 = vadd.f32 %v369_v11, %v305_v9 }
  0xb7   :  { %v435_v13 = vadd.f32 %v434_v62, %v370_v12  ;;  %v242_v14 = vpop.f32.mrf.mxu0 }
  0xb8   :  { %v307_v15 = vpop.f32.mrf.mxu1 }
  0xb9   :  { %v533_v17 = vmul.f32 %v991_v57, %v435_v13  ;;  %v308_v18 = vadd.f32 %v307_v15, %v242_v14 }
  0xba   :  { %v443_v25 = vpop.f32.mrf.mxu3 }
  0xbb   :  { %v553_v19 = vadd.f32 %v996_v59, %v533_v17 }
  0xbc   :  { %v372_v20 = vpop.f32.mrf.mxu2 }
  0xbd   :  { %569 = vst [vmem:[%s1082_s4 + $0x10] sm:$0xff] %v553_v19  ;;  %v373_v21 = vadd.f32 %v372_v20, %v308_v18 }
  0xbf   :  { %v438_v22 = vadd.f32 %v437_v7, %v373_v21  ;;  %v245_v23 = vpop.f32.mrf.mxu0 }
  0xc0   :  { %v310_v24 = vpop.f32.mrf.mxu1 }
  0xc1   :  { %v534_v26 = vmul.f32 %v991_v57, %v438_v22  ;;  %v311_v27 = vadd.f32 %v310_v24, %v245_v23 }
  0xc2   :  { %v446_v34 = vpop.f32.mrf.mxu3 }
  0xc3   :  { %v554_v28 = vadd.f32 %v996_v59, %v534_v26 }
  0xc4   :  { %v375_v29 = vpop.f32.mrf.mxu2 }
  0xc5   :  { %570 = vst [vmem:[%s1082_s4 + $0x18] sm:$0xff] %v554_v28  ;;  %v376_v30 = vadd.f32 %v375_v29, %v311_v27 }
  0xc7   :  { %v441_v31 = vadd.f32 %v440_v16, %v376_v30  ;;  %v248_v32 = vpop.f32.mrf.mxu0 }
  0xc8   :  { %v313_v33 = vpop.f32.mrf.mxu1 }
  0xc9   :  { %v535_v35 = vmul.f32 %v991_v57, %v441_v31  ;;  %v314_v36 = vadd.f32 %v313_v33, %v248_v32 }
  0xca   :  { %v449_v43 = vpop.f32.mrf.mxu3 }
  0xcb   :  { %v555_v37 = vadd.f32 %v996_v59, %v535_v35 }
  0xcc   :  { %v378_v38 = vpop.f32.mrf.mxu2 }
  0xcd   :  { %571 = vst [vmem:[%s1082_s4 + $0x20] sm:$0xff] %v555_v37  ;;  %v379_v39 = vadd.f32 %v378_v38, %v314_v36 }
  0xcf   :  { %v444_v40 = vadd.f32 %v443_v25, %v379_v39  ;;  %v251_v41 = vpop.f32.mrf.mxu0 }
  0xd0   :  { %v316_v42 = vpop.f32.mrf.mxu1 }
  0xd1   :  { %v536_v44 = vmul.f32 %v991_v57, %v444_v40  ;;  %v317_v45 = vadd.f32 %v316_v42, %v251_v41 }
  0xd2   :  { %v452_v52 = vpop.f32.mrf.mxu3 }
  0xd3   :  { %v556_v46 = vadd.f32 %v996_v59, %v536_v44 }
  0xd4   :  { %v381_v47 = vpop.f32.mrf.mxu2 }
  0xd5   :  { %572 = vst [vmem:[%s1082_s4 + $0x28] sm:$0xff] %v556_v46  ;;  %v382_v48 = vadd.f32 %v381_v47, %v317_v45 }
  0xd7   :  { %v447_v49 = vadd.f32 %v446_v34, %v382_v48  ;;  %v254_v50 = vpop.f32.mrf.mxu0 }
  0xd8   :  { %v319_v51 = vpop.f32.mrf.mxu1 }
  0xd9   :  { %v537_v53 = vmul.f32 %v991_v57, %v447_v49  ;;  %v320_v54 = vadd.f32 %v319_v51, %v254_v50 }
  0xda   :  { %v455_v63 = vpop.f32.mrf.mxu3 }
  0xdb   :  { %v557_v55 = vadd.f32 %v996_v59, %v537_v53 }
  0xdc   :  { %v384_v56 = vpop.f32.mrf.mxu2 }
  0xdd   :  { %573 = vst [vmem:[%s1082_s4 + $0x30] sm:$0xff] %v557_v55  ;;  %v385_v58 = vadd.f32 %v384_v56, %v320_v54 }
  0xdf   :  { %v450_v60 = vadd.f32 %v449_v43, %v385_v58  ;;  %v257_v61 = vpop.f32.mrf.mxu0 }
  0xe0   :  { %v322_v62 = vpop.f32.mrf.mxu1 }
  0xe1   :  { %v538_v0 = vmul.f32 %v991_v57, %v450_v60  ;;  %v323_v1 = vadd.f32 %v322_v62, %v257_v61 }
  0xe2   :  { %v458_v10 = vpop.f32.mrf.mxu3 }
  0xe3   :  { %v558_v2 = vadd.f32 %v996_v59, %v538_v0 }
  0xe4   :  { %v387_v3 = vpop.f32.mrf.mxu2 }
  0xe5   :  { %574 = vst [vmem:[%s1082_s4 + $0x38] sm:$0xff] %v558_v2  ;;  %v388_v4 = vadd.f32 %v387_v3, %v323_v1 }
  0xe7   :  { %v453_v5 = vadd.f32 %v452_v52, %v388_v4  ;;  %v260_v6 = vpop.f32.mrf.mxu0 }
  0xe8   :  { %v325_v7 = vpop.f32.mrf.mxu1 }
  0xe9   :  { %v539_v8 = vmul.f32 %v991_v57, %v453_v5  ;;  %v326_v9 = vadd.f32 %v325_v7, %v260_v6 }
  0xea   :  { %v461_v21 = vpop.f32.mrf.mxu3 }
  0xeb   :  { %v559_v11 = vadd.f32 %v996_v59, %v539_v8 }
  0xec   :  { %v390_v12 = vpop.f32.mrf.mxu2 }
  0xed   :  { %575 = vst [vmem:[%s1082_s4 + $0x40] sm:$0xff] %v559_v11  ;;  %v391_v13 = vadd.f32 %v390_v12, %v326_v9 }
  0xef   :  { %v456_v14 = vadd.f32 %v455_v63, %v391_v13  ;;  %v263_v15 = vpop.f32.mrf.mxu0 }
  0xf0   :  { %v328_v16 = vpop.f32.mrf.mxu1 }
  0xf1   :  { %v540_v17 = vmul.f32 %v991_v57, %v456_v14  ;;  %v329_v18 = vadd.f32 %v328_v16, %v263_v15 }
  0xf2   :  { %v464_v31 = vpop.f32.mrf.mxu3 }
  0xf3   :  { %v560_v19 = vadd.f32 %v996_v59, %v540_v17 }
  0xf4   :  { %v393_v20 = vpop.f32.mrf.mxu2 }
  0xf5   :  { %576 = vst [vmem:[%s1082_s4 + $0x48] sm:$0xff] %v560_v19  ;;  %v394_v22 = vadd.f32 %v393_v20, %v329_v18 }
  0xf7   :  { %v459_v23 = vadd.f32 %v458_v10, %v394_v22  ;;  %v266_v24 = vpop.f32.mrf.mxu0 }
  0xf8   :  { %v331_v25 = vpop.f32.mrf.mxu1 }
  0xf9   :  { %v541_v26 = vmul.f32 %v991_v57, %v459_v23  ;;  %v332_v27 = vadd.f32 %v331_v25, %v266_v24 }
  0xfa   :  { %v467_v43 = vpop.f32.mrf.mxu3 }
  0xfb   :  { %v561_v28 = vadd.f32 %v996_v59, %v541_v26 }
  0xfc   :  { %v396_v29 = vpop.f32.mrf.mxu2 }
  0xfd   :  { %577 = vst [vmem:[%s1082_s4 + $0x50] sm:$0xff] %v561_v28  ;;  %v397_v30 = vadd.f32 %v396_v29, %v332_v27 }
  0xff   :  { %v462_v32 = vadd.f32 %v461_v21, %v397_v30  ;;  %v269_v33 = vpop.f32.mrf.mxu0 }
 0x100   :  { %v334_v34 = vpop.f32.mrf.mxu1 }
 0x101   :  { %v542_v35 = vmul.f32 %v991_v57, %v462_v32  ;;  %v335_v36 = vadd.f32 %v334_v34, %v269_v33 }
 0x102   :  { %v470_v54 = vpop.f32.mrf.mxu3 }
 0x103   :  { %v562_v37 = vadd.f32 %v996_v59, %v542_v35 }
 0x104   :  { %v399_v38 = vpop.f32.mrf.mxu2 }
 0x105   :  { %578 = vst [vmem:[%s1082_s4 + $0x58] sm:$0xff] %v562_v37  ;;  %v400_v39 = vadd.f32 %v399_v38, %v335_v36 }
 0x107   :  { %v465_v40 = vadd.f32 %v464_v31, %v400_v39  ;;  %v272_v41 = vpop.f32.mrf.mxu0 }
 0x108   :  { %v337_v42 = vpop.f32.mrf.mxu1 }
 0x109   :  { %v543_v44 = vmul.f32 %v991_v57, %v465_v40  ;;  %v338_v45 = vadd.f32 %v337_v42, %v272_v41 }
 0x10a   :  { %v473_v3 = vpop.f32.mrf.mxu3 }
 0x10b   :  { %v563_v46 = vadd.f32 %v996_v59, %v543_v44 }
 0x10c   :  { %v402_v47 = vpop.f32.mrf.mxu2 }
 0x10d   :  { %579 = vst [vmem:[%s1082_s4 + $0x60] sm:$0xff] %v563_v46  ;;  %v403_v48 = vadd.f32 %v402_v47, %v338_v45 }
 0x10f   :  { %v468_v49 = vadd.f32 %v467_v43, %v403_v48  ;;  %v275_v50 = vpop.f32.mrf.mxu0 }
 0x110   :  { %v340_v51 = vpop.f32.mrf.mxu1 }
 0x111   :  { %v544_v52 = vmul.f32 %v991_v57, %v468_v49  ;;  %v341_v53 = vadd.f32 %v340_v51, %v275_v50 }
 0x113   :  { %v564_v55 = vadd.f32 %v996_v59, %v544_v52 }
 0x114   :  { %v405_v56 = vpop.f32.mrf.mxu2 }
 0x115   :  { %580 = vst [vmem:[%s1082_s4 + $0x68] sm:$0xff] %v564_v55  ;;  %v406_v58 = vadd.f32 %v405_v56, %v341_v53 }
 0x117   :  { %v471_v60 = vadd.f32 %v470_v54, %v406_v58  ;;  %v278_v61 = vpop.f32.mrf.mxu0 }
 0x118   :  { %v343_v62 = vpop.f32.mrf.mxu1 }
 0x119   :  { %v545_v63 = vmul.f32 %v991_v57, %v471_v60  ;;  %v344_v0 = vadd.f32 %v343_v62, %v278_v61 }
 0x11b   :  { %v565_v1 = vadd.f32 %v996_v59, %v545_v63 }
 0x11c   :  { %v408_v2 = vpop.f32.mrf.mxu2 }
 0x11d   :  { %581 = vst [vmem:[%s1082_s4 + $0x70] sm:$0xff] %v565_v1  ;;  %v409_v4 = vadd.f32 %v408_v2, %v344_v0 }
 0x11f   :  { %v474_v5 = vadd.f32 %v473_v3, %v409_v4 }
 0x121   :  { %v546_v6 = vmul.f32 %v991_v57, %v474_v5 }
 0x123   :  { %v566_v7 = vadd.f32 %v996_v59, %v546_v6 }
 0x125   :  { %582 = vst [vmem:[%s1082_s4 + $0x78] sm:$0xff] %v566_v7 }

// kernel: _lambda_.30
= control target key start
LH: loop header
LB: loop body
LE: loop exit
PB: predicated region body
PF: predicated region fallthrough
CT: control target
= control target key end

     0   :  { %vm103_vm0 = vcmask 130048   ;;  %s737_s1 = inlined_call_operand.vmem [shape: f32[144,128], index: 1, kind: input, shape index: {}]   ;;  %s738_s0 = inlined_call_operand.vmem [shape: f32[128,144], index: 0, kind: input, shape index: {}]   ;;  %s739_s2 = inlined_call_operand.vmem [shape: f32[1,128], index: 2, kind: input, shape index: {}]   ;;  %s740_s3 = inlined_call_operand.vmem [shape: f32[1,128], index: 3, kind: input, shape index: {}]   ;;  %s741_s4 = inlined_call_operand.vmem [shape: f32[128,128], index: 4, kind: output, shape index: {}]  }
   0x1   :  { %v100_v0 = vld [vmem:[%s737_s1 + $0x78] sm:$0xff]  ;;  %v476_v1 = vld [vmem:[%s737_s1 + $0x88] sm:$0xff]  ;;  %v99_v2 = vld [vmem:[%s737_s1 + $0x70] sm:$0xff] }
   0x2   :  { %152 = vmatpush.msra.mxu0 %v100_v0  ;;  %409 = vmatpush.msra.mxu2 %v100_v0  ;;  %v484_v3 = vld [vmem:[%s737_s1 + $0x80] sm:$0xff]  ;;  %v54_v4 = vld [vmem:[%s738_s0 + $0x8] sm:$0xff]  ;;  %v96_v7 = vld [vmem:[%s737_s1 + $0x58] sm:$0xff] }
   0x3   :  { %410 = vmatpush.msra.mxu3 %v100_v0  ;;  %231 = vmatpush.msra.mxu1 %v476_v1  ;;  %v98_v5 = vld [vmem:[%s737_s1 + $0x68] sm:$0xff]  ;;  %v97_v6 = vld [vmem:[%s737_s1 + $0x60] sm:$0xff]  ;;  %v95_v8 = vld [vmem:[%s737_s1 + $0x50] sm:$0xff] }
   0x4   :  { %153 = vmatpush.msra.mxu0 %v99_v2  ;;  %411 = vmatpush.msra.mxu2 %v99_v2  ;;  %v56_v9 = vld [vmem:[%s738_s0 + $0x18] sm:$0xff]  ;;  %v94_v10 = vld [vmem:[%s737_s1 + $0x48] sm:$0xff]  ;;  %v93_v11 = vld [vmem:[%s737_s1 + $0x40] sm:$0xff] }
   0x5   :  { %412 = vmatpush.msra.mxu3 %v99_v2  ;;  %232 = vmatpush.msra.mxu1 %v484_v3  ;;  %v92_v12 = vld [vmem:[%s737_s1 + $0x38] sm:$0xff]  ;;  %v91_v13 = vld [vmem:[%s737_s1 + $0x30] sm:$0xff]  ;;  %v58_v14 = vld [vmem:[%s738_s0 + $0x28] sm:$0xff] }
   0x6   :  { %393 = vmatmul.msk.f32.vlgmr.msra.gmra.mxu1 %vm103_vm0, %v54_v4  ;;  %154 = vmatpush.msra.mxu0 %v98_v5  ;;  %v90_v15 = vld [vmem:[%s737_s1 + $0x28] sm:$0xff]  ;;  %v89_v16 = vld [vmem:[%s737_s1 + $0x20] sm:$0xff]  ;;  %v88_v17 = vld [vmem:[%s737_s1 + $0x18] sm:$0xff] }
   0x7   :  { %413 = vmatpush.msra.mxu2 %v98_v5  ;;  %414 = vmatpush.msra.mxu3 %v98_v5  ;;  %v87_v18 = vld [vmem:[%s737_s1 + $0x10] sm:$0xff]  ;;  %v60_v19 = vld [vmem:[%s738_s0 + $0x38] sm:$0xff]  ;;  %v86_v20 = vld [vmem:[%s737_s1 + $0x8] sm:$0xff] }
   0x8   :  { %155 = vmatpush.msra.mxu0 %v97_v6  ;;  %v85_v21 = vld [vmem:[%s737_s1] sm:$0xff]  ;;  %v67_v23 = vld [vmem:[%s738_s0 + $0x70] sm:$0xff]  ;;  %v62_v25 = vld [vmem:[%s738_s0 + $0x48] sm:$0xff] }
   0x9   :  { %415 = vmatpush.msra.mxu2 %v97_v6  ;;  %416 = vmatpush.msra.mxu3 %v97_v6  ;;  %v53_v22 = vld [vmem:[%s738_s0] sm:$0xff]  ;;  %v83_v24 = vld [vmem:[%s738_s0 + $0xf0] sm:$0xff]  ;;  %v74_v28 = vld [vmem:[%s738_s0 + $0xa8] sm:$0xff] }
   0xa   :  { %156 = vmatpush.msra.mxu0 %v96_v7  ;;  %v55_v26 = vld [vmem:[%s738_s0 + $0x10] sm:$0xff]  ;;  %v69_v27 = vld [vmem:[%s738_s0 + $0x80] sm:$0xff]  ;;  %v64_v29 = vld [vmem:[%s738_s0 + $0x58] sm:$0xff] }
   0xb   :  { %417 = vmatpush.msra.mxu2 %v96_v7  ;;  %418 = vmatpush.msra.mxu3 %v96_v7  ;;  %v57_v30 = vld [vmem:[%s738_s0 + $0x20] sm:$0xff]  ;;  %v71_v31 = vld [vmem:[%s738_s0 + $0x90] sm:$0xff]  ;;  %v76_v32 = vld [vmem:[%s738_s0 + $0xb8] sm:$0xff] }
   0xc   :  { %157 = vmatpush.msra.mxu0 %v95_v8  ;;  %v66_v33 = vld [vmem:[%s738_s0 + $0x68] sm:$0xff]  ;;  %v59_v34 = vld [vmem:[%s738_s0 + $0x30] sm:$0xff]  ;;  %v73_v35 = vld [vmem:[%s738_s0 + $0xa0] sm:$0xff] }
   0xd   :  { %419 = vmatpush.msra.mxu2 %v95_v8  ;;  %420 = vmatpush.msra.mxu3 %v95_v8  ;;  %v78_v36 = vld [vmem:[%s738_s0 + $0xc8] sm:$0xff]  ;;  %v68_v37 = vld [vmem:[%s738_s0 + $0x78] sm:$0xff]  ;;  %v61_v38 = vld [vmem:[%s738_s0 + $0x40] sm:$0xff] }
   0xe   :  { %394 = vmatmul.msk.f32.gmra.mxu1 %vm103_vm0, %v56_v9  ;;  %158 = vmatpush.msra.mxu0 %v94_v10  ;;  %v75_v39 = vld [vmem:[%s738_s0 + $0xb0] sm:$0xff]  ;;  %v80_v40 = vld [vmem:[%s738_s0 + $0xd8] sm:$0xff]  ;;  %v70_v41 = vld [vmem:[%s738_s0 + $0x88] sm:$0xff] }
   0xf   :  { %421 = vmatpush.msra.mxu2 %v94_v10  ;;  %422 = vmatpush.msra.mxu3 %v94_v10  ;;  %v63_v42 = vld [vmem:[%s738_s0 + $0x50] sm:$0xff]  ;;  %v77_v43 = vld [vmem:[%s738_s0 + $0xc0] sm:$0xff]  ;;  %v82_v44 = vld [vmem:[%s738_s0 + $0xe8] sm:$0xff] }
  0x10   :  { %159 = vmatpush.msra.mxu0 %v93_v11  ;;  %v72_v45 = vld [vmem:[%s738_s0 + $0x98] sm:$0xff]  ;;  %v65_v46 = vld [vmem:[%s738_s0 + $0x60] sm:$0xff]  ;;  %v79_v47 = vld [vmem:[%s738_s0 + $0xd0] sm:$0xff] }
  0x11   :  { %423 = vmatpush.msra.mxu2 %v93_v11  ;;  %424 = vmatpush.msra.mxu3 %v93_v11  ;;  %v84_v48 = vld [vmem:[%s738_s0 + $0xf8] sm:$0xff]  ;;  %v81_v49 = vld [vmem:[%s738_s0 + $0xe0] sm:$0xff] }
  0x12   :  { %160 = vmatpush.msra.mxu0 %v92_v12  ;;  %v647_v54 = vld [vmem:[%s739_s2] ss:$0 sm:$0xff] }
  0x13   :  { %425 = vmatpush.msra.mxu2 %v92_v12  ;;  %426 = vmatpush.msra.mxu3 %v92_v12  ;;  %v652_v57 = vld [vmem:[%s740_s3] ss:$0 sm:$0xff] }
  0x14   :  { %161 = vmatpush.msra.mxu0 %v91_v13 }
  0x15   :  { %427 = vmatpush.msra.mxu2 %v91_v13  ;;  %428 = vmatpush.msra.mxu3 %v91_v13 }
  0x16   :  { %395 = vmatmul.msk.f32.gmra.mxu1 %vm103_vm0, %v58_v14  ;;  %162 = vmatpush.msra.mxu0 %v90_v15 }
  0x17   :  { %429 = vmatpush.msra.mxu2 %v90_v15  ;;  %430 = vmatpush.msra.mxu3 %v90_v15 }
  0x18   :  { %163 = vmatpush.msra.mxu0 %v89_v16 }
  0x19   :  { %431 = vmatpush.msra.mxu2 %v89_v16  ;;  %432 = vmatpush.msra.mxu3 %v89_v16 }
  0x1a   :  { %164 = vmatpush.msra.mxu0 %v88_v17 }
  0x1b   :  { %433 = vmatpush.msra.mxu2 %v88_v17  ;;  %434 = vmatpush.msra.mxu3 %v88_v17 }
  0x1c   :  { %165 = vmatpush.msra.mxu0 %v87_v18 }
  0x1d   :  { %435 = vmatpush.msra.mxu2 %v87_v18  ;;  %436 = vmatpush.msra.mxu3 %v87_v18 }
  0x1e   :  { %396 = vmatmul.msk.f32.gmra.mxu1 %vm103_vm0, %v60_v19  ;;  %166 = vmatpush.msra.mxu0 %v86_v20 }
  0x1f   :  { %437 = vmatpush.msra.mxu2 %v86_v20  ;;  %438 = vmatpush.msra.mxu3 %v86_v20 }
  0x20   :  { %167 = vmatpush.msra.mxu0 %v85_v21 }
  0x21   :  { %439 = vmatpush.msra.mxu2 %v85_v21  ;;  %440 = vmatpush.msra.mxu3 %v85_v21 }
  0x22   :  { %168 = vmatmul.f32.vlgmr.msra.gmra.mxu0 %v53_v22  ;;  %189 = vmatmul.f32.vlgmr.msra.gmra.mxu2 %v67_v23 }
  0x23   :  { %213 = vmatmul.f32.vlgmr.msra.gmra.mxu3 %v83_v24 }
  0x24   :  { %441 = vmatpush.msrb.mxu3 %v476_v1 }
  0x26   :  { %397 = vmatmul.msk.f32.gmra.mxu1 %vm103_vm0, %v62_v25  ;;  %442 = vmatpush.msrb.mxu3 %v484_v3 }
  0x2a   :  { %171 = vmatmul.f32.gmra.mxu0 %v55_v26  ;;  %192 = vmatmul.f32.gmra.mxu2 %v69_v27 }
  0x2b   :  { %403 = vmatmul.msk.f32.vlgmr.msrb.gmra.mxu3 %vm103_vm0, %v74_v28 }
  0x2e   :  { %398 = vmatmul.msk.f32.gmra.mxu1 %vm103_vm0, %v64_v29 }
  0x32   :  { %174 = vmatmul.f32.gmra.mxu0 %v57_v30  ;;  %195 = vmatmul.f32.gmra.mxu2 %v71_v31 }
  0x33   :  { %404 = vmatmul.msk.f32.gmra.mxu3 %vm103_vm0, %v76_v32 }
  0x36   :  { %399 = vmatmul.msk.f32.gmra.mxu1 %vm103_vm0, %v66_v33 }
  0x3a   :  { %177 = vmatmul.f32.gmra.mxu0 %v59_v34  ;;  %198 = vmatmul.f32.gmra.mxu2 %v73_v35 }
  0x3b   :  { %405 = vmatmul.msk.f32.gmra.mxu3 %vm103_vm0, %v78_v36 }
  0x3e   :  { %400 = vmatmul.msk.f32.gmra.mxu1 %vm103_vm0, %v68_v37 }
  0x42   :  { %180 = vmatmul.f32.gmra.mxu0 %v61_v38  ;;  %201 = vmatmul.f32.gmra.mxu2 %v75_v39 }
  0x43   :  { %406 = vmatmul.msk.f32.gmra.mxu3 %vm103_vm0, %v80_v40 }
  0x46   :  { %401 = vmatmul.msk.f32.gmra.mxu1 %vm103_vm0, %v70_v41 }
  0x4a   :  { %183 = vmatmul.f32.gmra.mxu0 %v63_v42  ;;  %204 = vmatmul.f32.gmra.mxu2 %v77_v43 }
  0x4b   :  { %407 = vmatmul.msk.f32.gmra.mxu3 %vm103_vm0, %v82_v44 }
  0x4e   :  { %402 = vmatmul.msk.f32.gmra.mxu1 %vm103_vm0, %v72_v45 }
  0x52   :  { %186 = vmatmul.f32.gmra.mxu0 %v65_v46  ;;  %207 = vmatmul.f32.gmra.mxu2 %v79_v47 }
  0x53   :  { %408 = vmatmul.msk.f32.gmra.mxu3 %vm103_vm0, %v84_v48 }
  0x5a   :  { %210 = vmatmul.f32.gmra.mxu2 %v81_v49 }
  0x83   :  { %v234_v50 = vpop.f32.mrf.mxu1 }
  0x8b   :  { %v237_v51 = vpop.f32.mrf.mxu1 }
  0x93   :  { %v240_v52 = vpop.f32.mrf.mxu1 }
  0x9b   :  { %v243_v53 = vpop.f32.mrf.mxu1 }
  0x9f   :  { %v169_v55 = vpop.f32.mrf.mxu0 }
  0xa0   :  { %v235_v56 = vadd.f32 %v234_v50, %v169_v55 }
  0xa2   :  { %v337_v58 = vmul.f32 %v647_v54, %v235_v56 }
  0xa3   :  { %v246_v59 = vpop.f32.mrf.mxu1 }
  0xa4   :  { %v357_v60 = vadd.f32 %v652_v57, %v337_v58 }
  0xa5   :  { %v190_v61 = vpop.f32.mrf.mxu2 }
  0xa6   :  { %373 = vst [vmem:[%s741_s4] sm:$0xff] %v357_v60  ;;  %v659_v62 = vpop.f32.mrf.mxu3 }
  0xa7   :  { %v172_v63 = vpop.f32.mrf.mxu0 }
  0xa8   :  { %v238_v0 = vadd.f32 %v237_v51, %v172_v63 }
  0xaa   :  { %v338_v1 = vmul.f32 %v647_v54, %v238_v0 }
  0xab   :  { %v249_v2 = vpop.f32.mrf.mxu1 }
  0xac   :  { %v358_v3 = vadd.f32 %v652_v57, %v338_v1 }
  0xad   :  { %v193_v4 = vpop.f32.mrf.mxu2 }
  0xae   :  { %374 = vst [vmem:[%s741_s4 + $0x8] sm:$0xff] %v358_v3  ;;  %v264_v5 = vpop.f32.mrf.mxu3 }
  0xaf   :  { %v175_v6 = vpop.f32.mrf.mxu0 }
  0xb0   :  { %v241_v7 = vadd.f32 %v240_v52, %v175_v6 }
  0xb2   :  { %v339_v8 = vmul.f32 %v647_v54, %v241_v7 }
  0xb3   :  { %v252_v9 = vpop.f32.mrf.mxu1 }
  0xb4   :  { %v359_v10 = vadd.f32 %v652_v57, %v339_v8 }
  0xb5   :  { %v196_v11 = vpop.f32.mrf.mxu2 }
  0xb6   :  { %375 = vst [vmem:[%s741_s4 + $0x10] sm:$0xff] %v359_v10  ;;  %v267_v12 = vpop.f32.mrf.mxu3 }
  0xb7   :  { %v178_v13 = vpop.f32.mrf.mxu0 }
  0xb8   :  { %v244_v14 = vadd.f32 %v243_v53, %v178_v13 }
  0xba   :  { %v340_v15 = vmul.f32 %v647_v54, %v244_v14 }
  0xbb   :  { %v255_v16 = vpop.f32.mrf.mxu1 }
  0xbc   :  { %v360_v17 = vadd.f32 %v652_v57, %v340_v15  ;;  %v256_v18 = vadd.f32 %v255_v16, %v190_v61 }
  0xbd   :  { %v199_v19 = vpop.f32.mrf.mxu2 }
  0xbe   :  { %376 = vst [vmem:[%s741_s4 + $0x18] sm:$0xff] %v360_v17  ;;  %v344_v20 = vmul.f32 %v647_v54, %v256_v18  ;;  %v265_v21 = vadd.f32 %v264_v5, %v199_v19  ;;  %v270_v22 = vpop.f32.mrf.mxu3 }
  0xbf   :  { %v181_v23 = vpop.f32.mrf.mxu0 }
  0xc0   :  { %v364_v24 = vadd.f32 %v652_v57, %v344_v20  ;;  %v347_v25 = vmul.f32 %v647_v54, %v265_v21  ;;  %v247_v26 = vadd.f32 %v246_v59, %v181_v23 }
  0xc2   :  { %380 = vst [vmem:[%s741_s4 + $0x38] sm:$0xff] %v364_v24  ;;  %v367_v27 = vadd.f32 %v652_v57, %v347_v25  ;;  %v341_v28 = vmul.f32 %v647_v54, %v247_v26 }
  0xc3   :  { %v258_v29 = vpop.f32.mrf.mxu1 }
  0xc4   :  { %383 = vst [vmem:[%s741_s4 + $0x50] sm:$0xff] %v367_v27  ;;  %v361_v30 = vadd.f32 %v652_v57, %v341_v28  ;;  %v259_v31 = vadd.f32 %v258_v29, %v193_v4 }
  0xc5   :  { %v202_v32 = vpop.f32.mrf.mxu2 }
  0xc6   :  { %377 = vst [vmem:[%s741_s4 + $0x20] sm:$0xff] %v361_v30  ;;  %v345_v33 = vmul.f32 %v647_v54, %v259_v31  ;;  %v268_v34 = vadd.f32 %v267_v12, %v202_v32  ;;  %v273_v35 = vpop.f32.mrf.mxu3 }
  0xc7   :  { %v184_v36 = vpop.f32.mrf.mxu0 }
  0xc8   :  { %v365_v37 = vadd.f32 %v652_v57, %v345_v33  ;;  %v348_v38 = vmul.f32 %v647_v54, %v268_v34  ;;  %v250_v39 = vadd.f32 %v249_v2, %v184_v36 }
  0xca   :  { %381 = vst [vmem:[%s741_s4 + $0x40] sm:$0xff] %v365_v37  ;;  %v368_v40 = vadd.f32 %v652_v57, %v348_v38  ;;  %v342_v41 = vmul.f32 %v647_v54, %v250_v39 }
  0xcb   :  { %v261_v42 = vpop.f32.mrf.mxu1 }
  0xcc   :  { %384 = vst [vmem:[%s741_s4 + $0x58] sm:$0xff] %v368_v40  ;;  %v362_v43 = vadd.f32 %v652_v57, %v342_v41  ;;  %v262_v44 = vadd.f32 %v261_v42, %v196_v11 }
  0xcd   :  { %v205_v45 = vpop.f32.mrf.mxu2 }
  0xce   :  { %378 = vst [vmem:[%s741_s4 + $0x28] sm:$0xff] %v362_v43  ;;  %v346_v46 = vmul.f32 %v647_v54, %v262_v44  ;;  %v271_v47 = vadd.f32 %v270_v22, %v205_v45  ;;  %v276_v48 = vpop.f32.mrf.mxu3 }
  0xcf   :  { %v187_v49 = vpop.f32.mrf.mxu0 }
  0xd0   :  { %v366_v50 = vadd.f32 %v652_v57, %v346_v46  ;;  %v349_v51 = vmul.f32 %v647_v54, %v271_v47  ;;  %v253_v52 = vadd.f32 %v252_v9, %v187_v49 }
  0xd2   :  { %382 = vst [vmem:[%s741_s4 + $0x48] sm:$0xff] %v366_v50  ;;  %v369_v53 = vadd.f32 %v652_v57, %v349_v51  ;;  %v343_v55 = vmul.f32 %v647_v54, %v253_v52 }
  0xd4   :  { %385 = vst [vmem:[%s741_s4 + $0x60] sm:$0xff] %v369_v53  ;;  %v363_v56 = vadd.f32 %v652_v57, %v343_v55 }
  0xd5   :  { %v208_v58 = vpop.f32.mrf.mxu2 }
  0xd6   :  { %379 = vst [vmem:[%s741_s4 + $0x30] sm:$0xff] %v363_v56  ;;  %v274_v59 = vadd.f32 %v273_v35, %v208_v58  ;;  %v279_v60 = vpop.f32.mrf.mxu3 }
  0xd7   :  { %v280_v61 = vadd.f32 %v279_v60, %v659_v62 }
  0xd8   :  { %v350_v63 = vmul.f32 %v647_v54, %v274_v59 }
  0xd9   :  { %v352_v0 = vmul.f32 %v647_v54, %v280_v61 }
  0xda   :  { %v370_v1 = vadd.f32 %v652_v57, %v350_v63 }
  0xdb   :  { %v372_v2 = vadd.f32 %v652_v57, %v352_v0 }
  0xdc   :  { %386 = vst [vmem:[%s741_s4 + $0x68] sm:$0xff] %v370_v1 }
  0xdd   :  { %388 = vst [vmem:[%s741_s4 + $0x78] sm:$0xff] %v372_v2  ;;  %v211_v3 = vpop.f32.mrf.mxu2 }
  0xde   :  { %v277_v4 = vadd.f32 %v276_v48, %v211_v3 }
  0xe0   :  { %v351_v62 = vmul.f32 %v647_v54, %v277_v4 }
  0xe2   :  { %v371_v5 = vadd.f32 %v652_v57, %v351_v62 }
  0xe4   :  { %387 = vst [vmem:[%s741_s4 + $0x70] sm:$0xff] %v371_v5 }

// kernel: _lambda_.31
= control target key start
LH: loop header
LB: loop body
LE: loop exit
PB: predicated region body
PF: predicated region fallthrough
CT: control target
= control target key end

     0   :  { %vm78_vm0 = vcmask 261120   ;;  %vm271_vm1 = vcmask 1041409   ;;  %vm273_vm2 = vcmask 1042434   ;;  %vm275_vm3 = vcmask 1043459   ;;  %s609_s1 = inlined_call_operand.vmem [shape: f32[32,128], index: 1, kind: input, shape index: {}]   ;;  %s610_s0 = inlined_call_operand.vmem [shape: f32[8,64,32], index: 0, kind: input, shape index: {}]   ;;  %s611_s2 = inlined_call_operand.vmem [shape: f32[1,128], index: 2, kind: input, shape index: {}]   ;;  %s612_s3 = inlined_call_operand.vmem [shape: f32[8,128], index: 3, kind: output, shape index: {}]  }
   0x1   :  { %v258_v0 = vld [vmem:[%s609_s1 + $0x18] sm:$0xff]  ;;  %v257_v1 = vld [vmem:[%s609_s1 + $0x10] sm:$0xff]  ;;  %v256_v2 = vld [vmem:[%s609_s1 + $0x8] sm:$0xff]  ;;  %vm277_vm4 = vcmask 1044484   ;;  %vm279_vm5 = vcmask 1045509   ;;  %vm281_vm6 = vcmask 1046534  }
   0x2   :  { %299 = vmatpush.msra.mxu0 %v258_v0  ;;  %v14_v3 = vld [vmem:[%s610_s0] sm:$0xff]  ;;  %v15_v4 = vld [vmem:[%s610_s0 + $0x8] sm:$0xff]  ;;  %v16_v6 = vld [vmem:[%s610_s0 + $0x10] sm:$0xff]  ;;  %vm283_vm7 = vcmask 1047559  }
   0x3   :  { %v255_v5 = vld [vmem:[%s609_s1] sm:$0xff]  ;;  %v17_v7 = vld [vmem:[%s610_s0 + $0x18] sm:$0xff]  ;;  %v79_v9 = vsel %vm78_vm0, %v14_v3, 0.0  ;;  %v80_v10 = vsel %vm78_vm0, %v15_v4, 0.0  ;;  %v19_v11 = vld [vmem:[%s610_s0 + $0x28] sm:$0xff]  ;;  %v82_v15 = vsel %vm78_vm0, %v16_v6, 0.0 }
   0x4   :  { %v18_v8 = vld [vmem:[%s610_s0 + $0x20] sm:$0xff]  ;;  %300 = vmatpush.msra.mxu0 %v257_v1  ;;  %v20_v12 = vld [vmem:[%s610_s0 + $0x30] sm:$0xff]  ;;  %v21_v13 = vld [vmem:[%s610_s0 + $0x38] sm:$0xff]  ;;  %v81_v14 = vadd.f32 %v80_v10, %v79_v9  ;;  %v84_v19 = vsel %vm78_vm0, %v17_v7, 0.0  ;;  %v88_v21 = vsel %vm78_vm0, %v19_v11, 0.0 }
   0x5   :  { %v22_v16 = vld [vmem:[%s610_s0 + $0x40] sm:$0xff]  ;;  %v23_v17 = vld [vmem:[%s610_s0 + $0x48] sm:$0xff]  ;;  %v24_v18 = vld [vmem:[%s610_s0 + $0x50] sm:$0xff]  ;;  %v86_v20 = vsel %vm78_vm0, %v18_v8, 0.0  ;;  %v90_v32 = vsel %vm78_vm0, %v20_v12, 0.0  ;;  %v92_v33 = vsel %vm78_vm0, %v21_v13, 0.0 }
   0x6   :  { %301 = vmatpush.msra.mxu0 %v256_v2  ;;  %v25_v22 = vld [vmem:[%s610_s0 + $0x58] sm:$0xff]  ;;  %v26_v23 = vld [vmem:[%s610_s0 + $0x60] sm:$0xff]  ;;  %v27_v24 = vld [vmem:[%s610_s0 + $0x68] sm:$0xff]  ;;  %v83_v25 = vadd.f32 %v82_v15, %v81_v14  ;;  %v100_v26 = vsel %vm78_vm0, %v22_v16, 0.0  ;;  %v101_v27 = vsel %vm78_vm0, %v23_v17, 0.0  ;;  %v103_v28 = vsel %vm78_vm0, %v24_v18, 0.0 }
   0x7   :  { %v28_v29 = vld [vmem:[%s610_s0 + $0x70] sm:$0xff]  ;;  %v29_v30 = vld [vmem:[%s610_s0 + $0x78] sm:$0xff]  ;;  %v30_v31 = vld [vmem:[%s610_s0 + $0x80] sm:$0xff]  ;;  %v102_v34 = vadd.f32 %v101_v27, %v100_v26  ;;  %v105_v35 = vsel %vm78_vm0, %v25_v22, 0.0  ;;  %v107_v40 = vsel %vm78_vm0, %v26_v23, 0.0  ;;  %v109_v41 = vsel %vm78_vm0, %v27_v24, 0.0 }
   0x8   :  { %302 = vmatpush.msra.mxu0 %v255_v5  ;;  %v31_v36 = vld [vmem:[%s610_s0 + $0x88] sm:$0xff]  ;;  %v32_v37 = vld [vmem:[%s610_s0 + $0x90] sm:$0xff]  ;;  %v33_v38 = vld [vmem:[%s610_s0 + $0x98] sm:$0xff]  ;;  %v85_v39 = vadd.f32 %v84_v19, %v83_v25  ;;  %v121_v42 = vsel %vm78_vm0, %v30_v31, 0.0  ;;  %v111_v47 = vsel %vm78_vm0, %v28_v29, 0.0  ;;  %v113_v54 = vsel %vm78_vm0, %v29_v30, 0.0 }
   0x9   :  { %v34_v43 = vld [vmem:[%s610_s0 + $0xa0] sm:$0xff]  ;;  %v35_v44 = vld [vmem:[%s610_s0 + $0xa8] sm:$0xff]  ;;  %v36_v45 = vld [vmem:[%s610_s0 + $0xb0] sm:$0xff]  ;;  %v104_v46 = vadd.f32 %v103_v28, %v102_v34  ;;  %v122_v48 = vsel %vm78_vm0, %v31_v36, 0.0  ;;  %v124_v49 = vsel %vm78_vm0, %v32_v37, 0.0  ;;  %v126_v56 = vsel %vm78_vm0, %v33_v38, 0.0 }
   0xa   :  { %v37_v50 = vld [vmem:[%s610_s0 + $0xb8] sm:$0xff]  ;;  %v38_v51 = vld [vmem:[%s610_s0 + $0xc0] sm:$0xff]  ;;  %v39_v52 = vld [vmem:[%s610_s0 + $0xc8] sm:$0xff]  ;;  %v87_v53 = vadd.f32 %v86_v20, %v85_v39  ;;  %v123_v55 = vadd.f32 %v122_v48, %v121_v42  ;;  %v128_v61 = vsel %vm78_vm0, %v34_v43, 0.0  ;;  %v130_v62 = vsel %vm78_vm0, %v35_v44, 0.0 }
   0xb   :  { %v40_v57 = vld [vmem:[%s610_s0 + $0xd0] sm:$0xff]  ;;  %v41_v58 = vld [vmem:[%s610_s0 + $0xd8] sm:$0xff]  ;;  %v42_v59 = vld [vmem:[%s610_s0 + $0xe0] sm:$0xff]  ;;  %v106_v60 = vadd.f32 %v105_v35, %v104_v46  ;;  %v142_v63 = vsel %vm78_vm0, %v38_v51, 0.0  ;;  %v143_v3 = vsel %vm78_vm0, %v39_v52, 0.0  ;;  %v132_v9 = vsel %vm78_vm0, %v36_v45, 0.0 }
   0xc   :  { %v43_v0 = vld [vmem:[%s610_s0 + $0xe8] sm:$0xff]  ;;  %v89_v1 = vadd.f32 %v88_v21, %v87_v53  ;;  %v125_v2 = vadd.f32 %v124_v49, %v123_v55  ;;  %v145_v4 = vsel %vm78_vm0, %v40_v57, 0.0  ;;  %v46_v5 = vld [vmem:[%s610_s0 + $0x100] sm:$0xff]  ;;  %v48_v7 = vld [vmem:[%s610_s0 + $0x110] sm:$0xff]  ;;  %v134_v10 = vsel %vm78_vm0, %v37_v50, 0.0 }
   0xd   :  { %v47_v6 = vld [vmem:[%s610_s0 + $0x108] sm:$0xff]  ;;  %v108_v8 = vadd.f32 %v107_v40, %v106_v60  ;;  %v144_v11 = vadd.f32 %v143_v3, %v142_v63  ;;  %v44_v12 = vld [vmem:[%s610_s0 + $0xf0] sm:$0xff]  ;;  %v147_v15 = vsel %vm78_vm0, %v41_v58, 0.0  ;;  %v149_v16 = vsel %vm78_vm0, %v42_v59, 0.0  ;;  %v45_v17 = vld [vmem:[%s610_s0 + $0xf8] sm:$0xff] }
   0xe   :  { %v91_v13 = vadd.f32 %v90_v32, %v89_v1  ;;  %v127_v14 = vadd.f32 %v126_v56, %v125_v2  ;;  %v49_v18 = vld [vmem:[%s610_s0 + $0x118] sm:$0xff]  ;;  %v151_v21 = vsel %vm78_vm0, %v43_v0, 0.0  ;;  %v163_v22 = vsel %vm78_vm0, %v46_v5, 0.0  ;;  %v50_v23 = vld [vmem:[%s610_s0 + $0x120] sm:$0xff]  ;;  %v51_v28 = vld [vmem:[%s610_s0 + $0x128] sm:$0xff] }
   0xf   :  { %v110_v19 = vadd.f32 %v109_v41, %v108_v8  ;;  %v146_v20 = vadd.f32 %v145_v4, %v144_v11  ;;  %v164_v26 = vsel %vm78_vm0, %v47_v6, 0.0  ;;  %v166_v27 = vsel %vm78_vm0, %v48_v7, 0.0  ;;  %v54_v29 = vld [vmem:[%s610_s0 + $0x140] sm:$0xff]  ;;  %v56_v39 = vld [vmem:[%s610_s0 + $0x150] sm:$0xff]  ;;  %v57_v44 = vld [vmem:[%s610_s0 + $0x158] sm:$0xff] }
  0x10   :  { %v93_v24 = vadd.f32 %v92_v33, %v91_v13  ;;  %v129_v25 = vadd.f32 %v128_v61, %v127_v14  ;;  %v153_v32 = vsel %vm78_vm0, %v44_v12, 0.0  ;;  %v165_v34 = vadd.f32 %v164_v26, %v163_v22  ;;  %v55_v33 = vld [vmem:[%s610_s0 + $0x148] sm:$0xff]  ;;  %v52_v49 = vld [vmem:[%s610_s0 + $0x130] sm:$0xff]  ;;  %v53_v59 = vld [vmem:[%s610_s0 + $0x138] sm:$0xff] }
  0x11   :  { %v112_v30 = vadd.f32 %v111_v47, %v110_v19  ;;  %v148_v31 = vadd.f32 %v147_v15, %v146_v20  ;;  %v155_v37 = vsel %vm78_vm0, %v45_v17, 0.0  ;;  %v168_v38 = vsel %vm78_vm0, %v49_v18, 0.0  ;;  %v59_v0 = vld [vmem:[%s610_s0 + $0x168] sm:$0xff]  ;;  %v60_v4 = vld [vmem:[%s610_s0 + $0x170] sm:$0xff]  ;;  %v62_v5 = vld [vmem:[%s610_s0 + $0x180] sm:$0xff] }
  0x12   :  { %v94_v35 = vrot.slane %v93_v24, 4  ;;  %v131_v36 = vadd.f32 %v130_v62, %v129_v25  ;;  %v167_v42 = vadd.f32 %v166_v27, %v165_v34  ;;  %v170_v43 = vsel %vm78_vm0, %v50_v23, 0.0  ;;  %v64_v15 = vld [vmem:[%s610_s0 + $0x190] sm:$0xff]  ;;  %v61_v19 = vld [vmem:[%s610_s0 + $0x178] sm:$0xff] }
  0x13   :  { %v114_v40 = vadd.f32 %v113_v54, %v112_v30  ;;  %v150_v41 = vadd.f32 %v149_v16, %v148_v31  ;;  %v172_v47 = vsel %vm78_vm0, %v51_v28, 0.0  ;;  %v184_v48 = vsel %vm78_vm0, %v54_v29, 0.0  ;;  %v58_v54 = vld [vmem:[%s610_s0 + $0x160] sm:$0xff]  ;;  %v65_v20 = vld [vmem:[%s610_s0 + $0x198] sm:$0xff] }
  0x14   :  { %v95_v45 = vadd.f32 %v94_v35, %v93_v24  ;;  %v133_v46 = vadd.f32 %v132_v9, %v131_v36  ;;  %v169_v52 = vadd.f32 %v168_v38, %v167_v42  ;;  %v185_v53 = vsel %vm78_vm0, %v55_v33, 0.0  ;;  %v66_v29 = vld [vmem:[%s610_s0 + $0x1a0] sm:$0xff]  ;;  %v67_v38 = vld [vmem:[%s610_s0 + $0x1a8] sm:$0xff] }
  0x15   :  { %v115_v50 = vrot.slane %v114_v40, 4  ;;  %v152_v51 = vadd.f32 %v151_v21, %v150_v41  ;;  %v186_v57 = vadd.f32 %v185_v53, %v184_v48  ;;  %v187_v58 = vsel %vm78_vm0, %v56_v39, 0.0  ;;  %v70_v39 = vld [vmem:[%s610_s0 + $0x1c0] sm:$0xff]  ;;  %v68_v48 = vld [vmem:[%s610_s0 + $0x1b0] sm:$0xff] }
  0x16   :  { %v96_v55 = vrot.slane %v95_v45, 2  ;;  %v135_v56 = vadd.f32 %v134_v10, %v133_v46  ;;  %v171_v62 = vadd.f32 %v170_v43, %v169_v52  ;;  %v189_v63 = vsel %vm78_vm0, %v57_v44, 0.0  ;;  %v63_v10 = vld [vmem:[%s610_s0 + $0x188] sm:$0xff]  ;;  %v72_v43 = vld [vmem:[%s610_s0 + $0x1d0] sm:$0xff] }
  0x17   :  { %v116_v60 = vadd.f32 %v115_v50, %v114_v40  ;;  %v154_v61 = vadd.f32 %v153_v32, %v152_v51  ;;  %v174_v2 = vsel %vm78_vm0, %v52_v49, 0.0  ;;  %v188_v3 = vadd.f32 %v187_v58, %v186_v57  ;;  %v71_v40 = vld [vmem:[%s610_s0 + $0x1c8] sm:$0xff]  ;;  %v73_v49 = vld [vmem:[%s610_s0 + $0x1d8] sm:$0xff] }
  0x18   :  { %v136_v1 = vrot.slane %v135_v56, 4  ;;  %v173_v8 = vadd.f32 %v172_v47, %v171_v62  ;;  %v191_v9 = vsel %vm78_vm0, %v58_v54, 0.0  ;;  %v97_v11 = vadd.f32 %v96_v55, %v95_v45  ;;  %v69_v58 = vld [vmem:[%s610_s0 + $0x1b8] sm:$0xff] }
  0x19   :  { %v117_v6 = vrot.slane %v116_v60, 2  ;;  %v156_v7 = vadd.f32 %v155_v37, %v154_v61  ;;  %v176_v13 = vsel %vm78_vm0, %v53_v59, 0.0  ;;  %v190_v14 = vadd.f32 %v189_v63, %v188_v3  ;;  %v74_v59 = vld [vmem:[%s610_s0 + $0x1e0] sm:$0xff] }
  0x1a   :  { %v137_v12 = vadd.f32 %v136_v1, %v135_v56  ;;  %v175_v17 = vadd.f32 %v174_v2, %v173_v8  ;;  %v193_v18 = vsel %vm78_vm0, %v59_v0, 0.0  ;;  %v195_v23 = vsel %vm78_vm0, %v60_v4, 0.0  ;;  %v75_v4 = vld [vmem:[%s610_s0 + $0x1e8] sm:$0xff] }
  0x1b   :  { %v157_v16 = vrot.slane %v156_v7, 4  ;;  %v118_v21 = vadd.f32 %v117_v6, %v116_v60  ;;  %v192_v22 = vadd.f32 %v191_v9, %v190_v14  ;;  %v205_v24 = vsel %vm78_vm0, %v62_v5, 0.0 }
  0x1c   :  { %v138_v25 = vrot.slane %v137_v12, 2  ;;  %v177_v27 = vadd.f32 %v176_v13, %v175_v17  ;;  %v206_v28 = vsel %vm78_vm0, %v63_v10, 0.0  ;;  %v98_v30 = vrot.slane %v97_v11, 1 }
  0x1d   :  { %v158_v26 = vadd.f32 %v157_v16, %v156_v7  ;;  %v194_v31 = vadd.f32 %v193_v18, %v192_v22  ;;  %v207_v32 = vadd.f32 %v206_v28, %v205_v24  ;;  %v208_v34 = vsel %vm78_vm0, %v64_v15, 0.0 }
  0x1e   :  { %v178_v35 = vrot.slane %v177_v27, 4  ;;  %v197_v36 = vsel %vm78_vm0, %v61_v19, 0.0  ;;  %v210_v37 = vsel %vm78_vm0, %v65_v20, 0.0  ;;  %v119_v44 = vrot.slane %v118_v21, 1  ;;  %v77_v20 = vld [vmem:[%s610_s0 + $0x1f8] sm:$0xff] }
  0x1f   :  { %v159_v33 = vrot.slane %v158_v26, 2  ;;  %v196_v41 = vadd.f32 %v195_v23, %v194_v31  ;;  %v209_v42 = vadd.f32 %v208_v34, %v207_v32  ;;  %v139_v45 = vadd.f32 %v138_v25, %v137_v12 }
  0x20   :  { %v179_v46 = vadd.f32 %v178_v35, %v177_v27  ;;  %v212_v47 = vsel %vm78_vm0, %v66_v29, 0.0  ;;  %v99_v50 = vadd.f32 %v98_v30, %v97_v11  ;;  %v214_v55 = vsel %vm78_vm0, %v67_v38, 0.0  ;;  %v76_v11 = vld [vmem:[%s610_s0 + $0x1f0] sm:$0xff] }
  0x21   :  { %v160_v51 = vadd.f32 %v159_v33, %v158_v26  ;;  %v198_v52 = vadd.f32 %v197_v36, %v196_v41  ;;  %v211_v53 = vadd.f32 %v210_v37, %v209_v42  ;;  %v226_v56 = vsel %vm78_vm0, %v70_v39, 0.0 }
  0x22   :  { %v180_v54 = vrot.slane %v179_v46, 2  ;;  %v227_v57 = vsel %vm78_vm0, %v71_v40, 0.0  ;;  %v229_v63 = vsel %vm78_vm0, %v72_v43, 0.0  ;;  %v120_v0 = vadd.f32 %v119_v44, %v118_v21 }
  0x23   :  { %v199_v60 = vrot.slane %v198_v52, 4  ;;  %v213_v61 = vadd.f32 %v212_v47, %v211_v53  ;;  %v228_v62 = vadd.f32 %v227_v57, %v226_v56  ;;  %v140_v1 = vrot.slane %v139_v45, 1 }
  0x24   :  { %v216_v2 = vsel %vm78_vm0, %v68_v48, 0.0  ;;  %v231_v3 = vsel %vm78_vm0, %v73_v49, 0.0  ;;  %v181_v8 = vadd.f32 %v180_v54, %v179_v46  ;;  %v218_v9 = vsel %vm78_vm0, %v69_v58, 0.0 }
  0x25   :  { %v200_v5 = vadd.f32 %v199_v60, %v198_v52  ;;  %v215_v6 = vadd.f32 %v214_v55, %v213_v61  ;;  %v230_v7 = vadd.f32 %v229_v63, %v228_v62  ;;  %v233_v10 = vsel %vm78_vm0, %v74_v59, 0.0  ;;  %v313_v59 = vld [vmem:[%s611_s2] ss:$0 sm:$0xff] }
  0x26   :  { %v161_v12 = vrot.slane %v160_v51, 1  ;;  %v141_v16 = vadd.f32 %v140_v1, %v139_v45  ;;  %v235_v17 = vsel %vm78_vm0, %v75_v4, 0.0  ;;  %v247_v18 = vmul.f32 0.015625, %v99_v50 }
  0x27   :  { %v201_v13 = vrot.slane %v200_v5, 2  ;;  %v217_v14 = vadd.f32 %v216_v2, %v215_v6  ;;  %v232_v15 = vadd.f32 %v231_v3, %v230_v7  ;;  %v248_v19 = vmul.f32 0.015625, %v120_v0 }
  0x28   :  { %v182_v24 = vrot.slane %v181_v8, 1  ;;  %v237_v25 = vsel %vm78_vm0, %v76_v11, 0.0  ;;  %v162_v26 = vadd.f32 %v161_v12, %v160_v51  ;;  %v239_v29 = vsel %vm78_vm0, %v77_v20, 0.0 }
  0x29   :  { %v202_v21 = vadd.f32 %v201_v13, %v200_v5  ;;  %v219_v22 = vadd.f32 %v218_v9, %v217_v14  ;;  %v234_v23 = vadd.f32 %v233_v10, %v232_v15  ;;  %v249_v30 = vmul.f32 0.015625, %v141_v16 }
  0x2a   :  { %v272_v31 = vsel %vm271_vm1, %v248_v19, %v247_v18  ;;  %v183_v35 = vadd.f32 %v182_v24, %v181_v8  ;;  %v250_v38 = vmul.f32 0.015625, %v162_v26 }
  0x2b   :  { %v220_v27 = vrot.slane %v219_v22, 4  ;;  %v236_v28 = vadd.f32 %v235_v17, %v234_v23  ;;  %v203_v32 = vrot.slane %v202_v21, 1  ;;  %v274_v39 = vsel %vm273_vm2, %v249_v30, %v272_v31 }
  0x2c   :  { %v251_v43 = vmul.f32 0.015625, %v183_v35  ;;  %v276_v46 = vsel %vm275_vm3, %v250_v38, %v274_v39 }
  0x2d   :  { %v221_v34 = vadd.f32 %v220_v27, %v219_v22  ;;  %v238_v33 = vadd.f32 %v237_v25, %v236_v28  ;;  %v204_v40 = vadd.f32 %v203_v32, %v202_v21 }
  0x2e   :  { %v278_v50 = vsel %vm277_vm4, %v251_v43, %v276_v46 }
  0x2f   :  { %v222_v36 = vrot.slane %v221_v34, 2  ;;  %v240_v37 = vadd.f32 %v239_v29, %v238_v33  ;;  %v252_v49 = vmul.f32 0.015625, %v204_v40 }
  0x31   :  { %v223_v41 = vadd.f32 %v222_v36, %v221_v34  ;;  %v241_v42 = vrot.slane %v240_v37, 4  ;;  %v280_v54 = vsel %vm279_vm5, %v252_v49, %v278_v50 }
  0x33   :  { %v224_v44 = vrot.slane %v223_v41, 1  ;;  %v242_v45 = vadd.f32 %v241_v42, %v240_v37 }
  0x35   :  { %v225_v47 = vadd.f32 %v224_v44, %v223_v41  ;;  %v243_v48 = vrot.slane %v242_v45, 2 }
  0x37   :  { %v244_v51 = vadd.f32 %v243_v48, %v242_v45  ;;  %v253_v52 = vmul.f32 0.015625, %v225_v47 }
  0x39   :  { %v245_v53 = vrot.slane %v244_v51, 1  ;;  %v282_v56 = vsel %vm281_vm6, %v253_v52, %v280_v54 }
  0x3b   :  { %v246_v55 = vadd.f32 %v245_v53, %v244_v51 }
  0x3d   :  { %v254_v57 = vmul.f32 0.015625, %v246_v55 }
  0x3f   :  { %v284_v58 = vsel %vm283_vm7, %v254_v57, %v282_v56 }
  0x40   :  { %312 = vmatmul.msk.f32.vlgmr.msra.gmra.mxu0 %vm78_vm0, %v284_v58 }
  0xbd   :  { %v304_v60 = vpop.f32.mrf.mxu0 }
  0xbe   :  { %v305_v61 = vadd.f32 %v313_v59, %v304_v60 }
  0xc0   :  { %307 = vst [vmem:[%s612_s3] sm:$0xff] %v305_v61 }

</bundles_post_ra>
